<compile_context>
chip_gen: v7x
topology: tpu7x:2x2x1
jax: 0.10.0
libtpu: 0.0.40
codegen_flags: <defaults>
</compile_context>

<pallas_src>
import jax
import jax.numpy as jnp
from jax import lax
from jax.experimental import pallas as pl
from jax.experimental.pallas import tpu as pltpu

# ---- synthetic model config ----
VOCAB = 64
SEQ = 8             # num_words per title
SEQ_LOG2 = 3        # SEQ == 1 << SEQ_LOG2
HIDDEN = 32         # sentence embedding dim
N_HEADS = 2
HEAD = HIDDEN // N_HEADS   # 16
FFN = 64

LANES = 128
CHUNK_SENT = 16                    # sentences per attention chunk
CHUNK_ROWS = CHUNK_SENT * SEQ      # 128 token rows = one full lane tile
MAX_TB = 128                       # max sentences per grid step

# ---- packed bf16 weight slab layout (rows of a (SLAB_ROWS, 128) array) ----
# all matrix block offsets are multiples of 16 (bf16 sublane tile)
R_TOK = 0        # tok_emb.T                  (32, 64)
R_POS = 32       # pos_emb.T pre-tiled        (32, 128)
R_QKV = 64       # [wq*scale | wk | wv]       (32, 96)
R_WO = 96        # wo                         (32, 32)
R_W1 = 128       # w1                         (32, 64)
R_W2 = 160       # w2                         (64, 32)
R_VEC = 224      # 8 vector rows: b_qkv, bo, b1, b2, ln1g, ln1b, ln2g, ln2b
N_VEC = 8
SLAB_ROWS = 240


def _round_up(a, b):
    return (a + b - 1) // b * b


def _layernorm(z, gamma, beta):
    mu = jnp.mean(z, axis=-1, keepdims=True)
    var = jnp.mean((z - mu) ** 2, axis=-1, keepdims=True)
    return (z - mu) * lax.rsqrt(var + 1e-5) * gamma + beta


def encoder_kernel(ids_ref, mask_ref, w_ref, o_ref):
    f32 = jnp.float32
    bf16 = jnp.bfloat16
    tbr = ids_ref.shape[2]            # token rows in this block (TB * SEQ)
    n_chunks = tbr // CHUNK_ROWS

    ids = ids_ref[0]                  # (1, tbr) int32, sentence-major token order
    msk = mask_ref[0]                 # (1, tbr) f32 attention mask (lane-major)

    # ---- weights: static slices of the packed bf16 slab ----
    tok_T = w_ref[R_TOK:R_TOK + HIDDEN, 0:VOCAB]           # (32, 64)
    posT_tiled = w_ref[R_POS:R_POS + HIDDEN, :]            # (32, 128) pre-tiled
    w_qkv = w_ref[R_QKV:R_QKV + HIDDEN, 0:3 * HIDDEN]      # (32, 96), wq pre-scaled
    wo = w_ref[R_WO:R_WO + HIDDEN, 0:HIDDEN]               # (32, 32)
    w1 = w_ref[R_W1:R_W1 + HIDDEN, 0:FFN]                  # (32, 64)
    w2 = w_ref[R_W2:R_W2 + FFN, 0:HIDDEN]                  # (64, 32)
    vec = w_ref[R_VEC:R_VEC + N_VEC, :]                    # (8, 128)
    b_qkv = vec[0:1, 0:3 * HIDDEN].astype(f32)             # (1, 96), bq pre-scaled
    bo = vec[1:2, 0:HIDDEN].astype(f32)
    b1 = vec[2:3, 0:FFN].astype(f32)
    b2 = vec[3:4, 0:HIDDEN].astype(f32)
    ln1g = vec[4:5, 0:HIDDEN].astype(f32)
    ln1b = vec[5:6, 0:HIDDEN].astype(f32)
    ln2g = vec[6:7, 0:HIDDEN].astype(f32)
    ln2b = vec[7:8, 0:HIDDEN].astype(f32)

    # ---- hoisted per-chunk constants ----
    vocab_iota = lax.broadcasted_iota(jnp.int32, (VOCAB, CHUNK_ROWS), 0)
    ri = lax.broadcasted_iota(jnp.int32, (CHUNK_ROWS, CHUNK_ROWS), 0)
    ci = lax.broadcasted_iota(jnp.int32, (CHUNK_ROWS, CHUNK_ROWS), 1)
    same_sent = (jnp.right_shift(ri, SEQ_LOG2)
                 == jnp.right_shift(ci, SEQ_LOG2)).astype(f32)   # (128, 128)
    gi = lax.broadcasted_iota(jnp.int32, (CHUNK_SENT, CHUNK_ROWS), 0)
    ti = lax.broadcasted_iota(jnp.int32, (CHUNK_SENT, CHUNK_ROWS), 1)
    pool_sel = (gi == jnp.right_shift(ti, SEQ_LOG2)).astype(f32)  # (16, 128)
    lane_h = lax.broadcasted_iota(jnp.int32, (1, HIDDEN), 1)
    h0 = (lane_h < HEAD).astype(f32)                              # (1, 32)
    h1 = 1.0 - h0
    pos_f32 = posT_tiled.astype(f32)                              # (32, 128)

    for c in range(n_chunks):
        r0 = c * CHUNK_ROWS
        ids_c = ids[:, r0:r0 + CHUNK_ROWS]        # (1, 128) int32
        m_c = msk[:, r0:r0 + CHUNK_ROWS]          # (1, 128) f32 key mask

        # -- fused token + positional embedding (bf16 one-hot matmul) --
        oh_T = (vocab_iota == ids_c).astype(bf16)                           # (64, 128)
        xT = jnp.dot(tok_T, oh_T, preferred_element_type=f32) + pos_f32     # (32, 128)
        x = xT.T                                                            # (128, 32)

        # -- fused QKV projection: single MXU call --
        qkv = jnp.dot(x.astype(bf16), w_qkv, preferred_element_type=f32) + b_qkv
        q_b = qkv[:, 0:HIDDEN].astype(bf16)                                 # (128, 32)
        k_f = qkv[:, HIDDEN:2 * HIDDEN]
        v_f = qkv[:, 2 * HIDDEN:3 * HIDDEN]
        # block-diagonal head packing -> both heads in one scores / one PV matmul
        k_bd = jnp.concatenate([k_f * h0, k_f * h1], axis=0).astype(bf16)   # (256, 32)
        v_bd = jnp.concatenate([v_f * h0, v_f * h1], axis=0).astype(bf16)   # (256, 32)

        # scores for both heads: (128, 256), lanes 0:128 head0 / 128:256 head1
        s = lax.dot_general(q_b, k_bd, (((1,), (1,)), ((), ())),
                            preferred_element_type=f32)
        s = s - jnp.max(s, axis=-1, keepdims=True)
        allow = same_sent * m_c                                             # (128, 128)
        p = jnp.exp(s) * jnp.concatenate([allow, allow], axis=1)            # (128, 256)
        d0 = jnp.sum(p[:, 0:CHUNK_ROWS], axis=-1, keepdims=True)
        d1 = jnp.sum(p[:, CHUNK_ROWS:], axis=-1, keepdims=True)
        inv = jnp.concatenate(
            [jnp.broadcast_to(pl.reciprocal(jnp.maximum(d0, 1e-20), approx=True),
                              (CHUNK_ROWS, HEAD)),
             jnp.broadcast_to(pl.reciprocal(jnp.maximum(d1, 1e-20), approx=True),
                              (CHUNK_ROWS, HEAD))], axis=1)                 # (128, 32)
        ctx = jnp.dot(p.astype(bf16), v_bd, preferred_element_type=f32) * inv
        attn = jnp.dot(ctx.astype(bf16), wo, preferred_element_type=f32) + bo

        # -- residual + LN, feed-forward (GELU), residual + LN --
        y = _layernorm(x + attn, ln1g, ln1b)
        h = jax.nn.gelu(jnp.dot(y.astype(bf16), w1, preferred_element_type=f32) + b1,
                        approximate=True)
        ff = jnp.dot(h.astype(bf16), w2, preferred_element_type=f32) + b2
        z = _layernorm(y + ff, ln2g, ln2b)                                  # (128, 32)

        # -- masked mean pooling + L2 normalize (SentenceTransformer head) --
        mp = pool_sel * m_c                                                 # (16, 128)
        pooled = jnp.dot(mp, z, preferred_element_type=f32)                 # (16, 32)
        denom = jnp.sum(mp, axis=-1, keepdims=True)                         # (16, 1)
        emb = pooled * pl.reciprocal(jnp.maximum(denom, 1e-9), approx=True)
        sq = jnp.sum(emb * emb, axis=-1, keepdims=True)
        emb = emb * lax.rsqrt(jnp.maximum(sq, 1e-24))                       # L2 normalize

        # per-chunk writeback (no cross-chunk concatenate / live ranges)
        o_ref[c * CHUNK_SENT:(c + 1) * CHUNK_SENT, :] = emb


def init_params(key):
    ks = jax.random.split(key, 8)
    s = 0.02
    return {
        "tok_emb": s * jax.random.normal(ks[0], (VOCAB, HIDDEN), jnp.float32),
        "pos_emb": s * jax.random.normal(ks[1], (SEQ, HIDDEN), jnp.float32),
        "wq": s * jax.random.normal(ks[2], (HIDDEN, HIDDEN), jnp.float32),
        "wk": s * jax.random.normal(ks[3], (HIDDEN, HIDDEN), jnp.float32),
        "wv": s * jax.random.normal(ks[4], (HIDDEN, HIDDEN), jnp.float32),
        "wo": s * jax.random.normal(ks[5], (HIDDEN, HIDDEN), jnp.float32),
        "bq": jnp.zeros((HIDDEN,), jnp.float32),
        "bk": jnp.zeros((HIDDEN,), jnp.float32),
        "bv": jnp.zeros((HIDDEN,), jnp.float32),
        "bo": jnp.zeros((HIDDEN,), jnp.float32),
        "w1": s * jax.random.normal(ks[6], (HIDDEN, FFN), jnp.float32),
        "b1": jnp.zeros((FFN,), jnp.float32),
        "w2": s * jax.random.normal(ks[7], (FFN, HIDDEN), jnp.float32),
        "b2": jnp.zeros((HIDDEN,), jnp.float32),
        "ln1_g": jnp.ones((HIDDEN,), jnp.float32),
        "ln1_b": jnp.zeros((HIDDEN,), jnp.float32),
        "ln2_g": jnp.ones((HIDDEN,), jnp.float32),
        "ln2_b": jnp.zeros((HIDDEN,), jnp.float32),
    }


def pack_params(p):
    """Pack all weights into one (SLAB_ROWS, 128) bfloat16 slab (single DMA)."""
    scale = 1.0 / (HEAD ** 0.5)
    w = jnp.zeros((SLAB_ROWS, LANES), jnp.float32)
    w = w.at[R_TOK:R_TOK + HIDDEN, 0:VOCAB].set(p["tok_emb"].T)
    w = w.at[R_POS:R_POS + HIDDEN, :].set(jnp.tile(p["pos_emb"].T, (1, CHUNK_SENT)))
    w = w.at[R_QKV:R_QKV + HIDDEN, 0:3 * HIDDEN].set(
        jnp.concatenate([p["wq"] * scale, p["wk"], p["wv"]], axis=1))
    w = w.at[R_WO:R_WO + HIDDEN, 0:HIDDEN].set(p["wo"])
    w = w.at[R_W1:R_W1 + HIDDEN, 0:FFN].set(p["w1"])
    w = w.at[R_W2:R_W2 + FFN, 0:HIDDEN].set(p["w2"])
    w = w.at[R_VEC + 0, 0:3 * HIDDEN].set(
        jnp.concatenate([p["bq"] * scale, p["bk"], p["bv"]]))
    w = w.at[R_VEC + 1, 0:HIDDEN].set(p["bo"])
    w = w.at[R_VEC + 2, 0:FFN].set(p["b1"])
    w = w.at[R_VEC + 3, 0:HIDDEN].set(p["b2"])
    w = w.at[R_VEC + 4, 0:HIDDEN].set(p["ln1_g"])
    w = w.at[R_VEC + 5, 0:HIDDEN].set(p["ln1_b"])
    w = w.at[R_VEC + 6, 0:HIDDEN].set(p["ln2_g"])
    w = w.at[R_VEC + 7, 0:HIDDEN].set(p["ln2_b"])
    return w.astype(jnp.bfloat16)


def sentence_transformer_news_encoder(titles, packed_w):
    """Mirrors SentenceTransformerNewsEncoder.forward on a tokenized titles dict."""
    input_ids = jnp.asarray(titles["input_ids"])
    attention_mask = jnp.asarray(titles["attention_mask"])

    has_multiple_news = input_ids.ndim == 3
    if has_multiple_news:
        B, N, S = input_ids.shape
        input_ids = input_ids.reshape(-1, S)          # stack_batches
        attention_mask = attention_mask.reshape(-1, S)
    BN, S = input_ids.shape
    assert S == SEQ

    # sentences per grid step: chunk-multiple, >=2 steps when BN > 32 (megacore)
    if BN <= 2 * CHUNK_SENT:
        tb = _round_up(max(BN, 1), CHUNK_SENT)
    else:
        tb = min(MAX_TB, _round_up((BN + 1) // 2, CHUNK_SENT))
    bn_pad = _round_up(BN, tb)
    n_steps = bn_pad // tb
    tbr = tb * SEQ
    pad = bn_pad - BN

    ids = jnp.pad(input_ids.astype(jnp.int32), ((0, pad), (0, 0)))
    msk = jnp.pad(attention_mask.astype(jnp.float32), ((0, pad), (0, 0)))
    ids_rows = ids.reshape(n_steps, 1, tbr)           # lane-major token ids
    msk_rows = msk.reshape(n_steps, 1, tbr)           # lane-major mask

    out = pl.pallas_call(
        encoder_kernel,
        out_shape=jax.ShapeDtypeStruct((bn_pad, HIDDEN), jnp.float32),
        grid=(n_steps,),
        in_specs=[
            pl.BlockSpec((1, 1, tbr), lambda i: (i, 0, 0)),            # token ids
            pl.BlockSpec((1, 1, tbr), lambda i: (i, 0, 0)),            # attention mask
            pl.BlockSpec((SLAB_ROWS, LANES), lambda i: (0, 0)),        # packed weights
        ],
        out_specs=pl.BlockSpec((tb, HIDDEN), lambda i: (i, 0)),
        compiler_params=pltpu.CompilerParams(
            dimension_semantics=("parallel",)),
    )(ids_rows, msk_rows, packed_w)

    news_vectors = out[:BN]
    if has_multiple_news:
        news_vectors = news_vectors.reshape(B, N, HIDDEN)              # unstack_batches
    return news_vectors


if __name__ == "__main__":
    # TODO(synk): tokenization (raw text -> input_ids) and the pretrained
    # 'all-distilroberta-v1' weights have no Pallas equivalent; inputs are
    # already-tokenized ids and the encoder is a synthetic 1-layer stand-in.
    key = jax.random.PRNGKey(0)
    k_param, k_ids, k_len = jax.random.split(key, 3)

    params = init_params(k_param)
    packed_w = pack_params(params)

    B, N = 2, 3  # batch_size, n_news per user
    input_ids = jax.random.randint(k_ids, (B, N, SEQ), 1, VOCAB, dtype=jnp.int32)
    lengths = jax.random.randint(k_len, (B, N), 3, SEQ + 1, dtype=jnp.int32)
    attention_mask = (jnp.arange(SEQ)[None, None, :] < lengths[:, :, None]).astype(jnp.int32)
    input_ids = input_ids * attention_mask  # pad tokens -> id 0

    news = {"title": {"input_ids": input_ids, "attention_mask": attention_mask}}

    news_vectors = sentence_transformer_news_encoder(news["title"], packed_w)
    news_vectors = jax.block_until_ready(news_vectors)

    assert news_vectors.shape == (B, N, HIDDEN), news_vectors.shape
    # sanity: embeddings are L2-normalized like SentenceTransformer's Normalize module
    norms = jnp.linalg.norm(news_vectors, axis=-1)
    assert bool(jnp.all(jnp.abs(norms - 1.0) < 1e-3))
    print("KERNEL_OK")
</pallas_src>

<mosaic_0001>
module attributes {stable_mosaic.version = 11 : i64} {
  func.func @encoder_kernel(%arg0: i32, %arg1: memref<1x1x128xi32, #tpu.memory_space<vmem>>, %arg2: memref<1x1x128xf32, #tpu.memory_space<vmem>>, %arg3: memref<240x128xbf16, #tpu.memory_space<vmem>>, %arg4: memref<16x32xf32, #tpu.memory_space<vmem>>) attributes {dimension_semantics = [#tpu.dimension_semantics<parallel>], iteration_bounds = array<i64: 1>, scalar_prefetch = 0 : i64, scratch_operands = 0 : i64, tpu.core_type = #tpu.core_type<tc>, window_params = [{transform_indices = @transform_0, window_bounds = array<i64: 1, 1, 128>}, {transform_indices = @transform_1, window_bounds = array<i64: 1, 1, 128>}, {pipeline_mode = #tpu.pipeline_mode<synchronous>, transform_indices = @transform_2, window_bounds = array<i64: 240, 128>}, {transform_indices = @transform_3, window_bounds = array<i64: 16, 32>}]} {
    %c0 = arith.constant 0 : index
    %c0_0 = arith.constant 0 : index
    %c0_1 = arith.constant 0 : index
    %0 = vector.load %arg1[%c0, %c0_0, %c0_1] : memref<1x1x128xi32, #tpu.memory_space<vmem>>, vector<1x1x128xi32>
    %1 = vector.shape_cast %0 : vector<1x1x128xi32> to vector<1x128xi32>
    %c0_2 = arith.constant 0 : index
    %c0_3 = arith.constant 0 : index
    %c0_4 = arith.constant 0 : index
    %2 = vector.load %arg2[%c0_2, %c0_3, %c0_4] : memref<1x1x128xf32, #tpu.memory_space<vmem>>, vector<1x1x128xf32>
    %3 = vector.shape_cast %2 : vector<1x1x128xf32> to vector<1x128xf32>
    %c0_5 = arith.constant 0 : index
    %c0_6 = arith.constant 0 : index
    %4 = vector.load %arg3[%c0_5, %c0_6] : memref<240x128xbf16, #tpu.memory_space<vmem>>, vector<32x64xbf16>
    %c32 = arith.constant 32 : index
    %c0_7 = arith.constant 0 : index
    %5 = vector.load %arg3[%c32, %c0_7] : memref<240x128xbf16, #tpu.memory_space<vmem>>, vector<32x128xbf16>
    %c64 = arith.constant 64 : index
    %c0_8 = arith.constant 0 : index
    %6 = vector.load %arg3[%c64, %c0_8] : memref<240x128xbf16, #tpu.memory_space<vmem>>, vector<32x96xbf16>
    %c96 = arith.constant 96 : index
    %c0_9 = arith.constant 0 : index
    %7 = vector.load %arg3[%c96, %c0_9] : memref<240x128xbf16, #tpu.memory_space<vmem>>, vector<32x32xbf16>
    %c128 = arith.constant 128 : index
    %c0_10 = arith.constant 0 : index
    %8 = vector.load %arg3[%c128, %c0_10] : memref<240x128xbf16, #tpu.memory_space<vmem>>, vector<32x64xbf16>
    %c160 = arith.constant 160 : index
    %c0_11 = arith.constant 0 : index
    %9 = vector.load %arg3[%c160, %c0_11] : memref<240x128xbf16, #tpu.memory_space<vmem>>, vector<64x32xbf16>
    %c224 = arith.constant 224 : index
    %c0_12 = arith.constant 0 : index
    %10 = vector.load %arg3[%c224, %c0_12] : memref<240x128xbf16, #tpu.memory_space<vmem>>, vector<8x128xbf16>
    %11 = vector.extract_strided_slice %10 {offsets = [0, 0], sizes = [1, 96], strides = [1, 1]} : vector<8x128xbf16> to vector<1x96xbf16>
    %12 = arith.extf %11 : vector<1x96xbf16> to vector<1x96xf32>
    %13 = vector.extract_strided_slice %10 {offsets = [1, 0], sizes = [1, 32], strides = [1, 1]} : vector<8x128xbf16> to vector<1x32xbf16>
    %14 = arith.extf %13 : vector<1x32xbf16> to vector<1x32xf32>
    %15 = vector.extract_strided_slice %10 {offsets = [2, 0], sizes = [1, 64], strides = [1, 1]} : vector<8x128xbf16> to vector<1x64xbf16>
    %16 = arith.extf %15 : vector<1x64xbf16> to vector<1x64xf32>
    %17 = vector.extract_strided_slice %10 {offsets = [3, 0], sizes = [1, 32], strides = [1, 1]} : vector<8x128xbf16> to vector<1x32xbf16>
    %18 = arith.extf %17 : vector<1x32xbf16> to vector<1x32xf32>
    %19 = vector.extract_strided_slice %10 {offsets = [4, 0], sizes = [1, 32], strides = [1, 1]} : vector<8x128xbf16> to vector<1x32xbf16>
    %20 = arith.extf %19 : vector<1x32xbf16> to vector<1x32xf32>
    %21 = vector.extract_strided_slice %10 {offsets = [5, 0], sizes = [1, 32], strides = [1, 1]} : vector<8x128xbf16> to vector<1x32xbf16>
    %22 = arith.extf %21 : vector<1x32xbf16> to vector<1x32xf32>
    %23 = vector.extract_strided_slice %10 {offsets = [6, 0], sizes = [1, 32], strides = [1, 1]} : vector<8x128xbf16> to vector<1x32xbf16>
    %24 = arith.extf %23 : vector<1x32xbf16> to vector<1x32xf32>
    %25 = vector.extract_strided_slice %10 {offsets = [7, 0], sizes = [1, 32], strides = [1, 1]} : vector<8x128xbf16> to vector<1x32xbf16>
    %26 = arith.extf %25 : vector<1x32xbf16> to vector<1x32xf32>
    %27 = tpu.iota {dimensions = array<i32: 0>} : vector<64x128xi32>
    %28 = tpu.iota {dimensions = array<i32: 0>} : vector<128x128xi32>
    %29 = tpu.iota {dimensions = array<i32: 1>} : vector<128x128xi32>
    %c3_i32 = arith.constant 3 : i32
    %30 = vector.broadcast %c3_i32 : i32 to vector<128x128xi32>
    %31 = arith.shrsi %28, %30 : vector<128x128xi32>
    %c3_i32_13 = arith.constant 3 : i32
    %32 = vector.broadcast %c3_i32_13 : i32 to vector<128x128xi32>
    %33 = arith.shrsi %29, %32 : vector<128x128xi32>
    %34 = arith.cmpi eq, %31, %33 : vector<128x128xi32>
    %35 = arith.extui %34 : vector<128x128xi1> to vector<128x128xi32>
    %36 = arith.sitofp %35 : vector<128x128xi32> to vector<128x128xf32>
    %37 = tpu.iota {dimensions = array<i32: 0>} : vector<16x128xi32>
    %38 = tpu.iota {dimensions = array<i32: 1>} : vector<16x128xi32>
    %c3_i32_14 = arith.constant 3 : i32
    %39 = vector.broadcast %c3_i32_14 : i32 to vector<16x128xi32>
    %40 = arith.shrsi %38, %39 : vector<16x128xi32>
    %41 = arith.cmpi eq, %37, %40 : vector<16x128xi32>
    %42 = arith.extui %41 : vector<16x128xi1> to vector<16x128xi32>
    %43 = arith.sitofp %42 : vector<16x128xi32> to vector<16x128xf32>
    %44 = tpu.iota {dimensions = array<i32: 1>} : vector<1x32xi32>
    %c16_i32 = arith.constant 16 : i32
    %45 = vector.broadcast %c16_i32 : i32 to vector<1x32xi32>
    %46 = arith.cmpi slt, %44, %45 : vector<1x32xi32>
    %47 = arith.extui %46 : vector<1x32xi1> to vector<1x32xi32>
    %48 = arith.sitofp %47 : vector<1x32xi32> to vector<1x32xf32>
    %cst = arith.constant 1.000000e+00 : f32
    %49 = vector.broadcast %cst : f32 to vector<1x32xf32>
    %50 = arith.subf %49, %48 : vector<1x32xf32>
    %51 = arith.extf %5 : vector<32x128xbf16> to vector<32x128xf32>
    %52 = vector.broadcast %1 : vector<1x128xi32> to vector<64x128xi32>
    %53 = arith.cmpi eq, %27, %52 : vector<64x128xi32>
    %54 = arith.extui %53 : vector<64x128xi1> to vector<64x128xi32>
    %55 = arith.sitofp %54 : vector<64x128xi32> to vector<64x128xf32>
    %56 = arith.truncf %55 : vector<64x128xf32> to vector<64x128xbf16>
    %cst_15 = arith.constant dense<0.000000e+00> : vector<32x128xf32>
    %57 = tpu.matmul %4, %56, %cst_15 {dimension_numbers = #tpu.dot_dimension_numbers<[1], [0], [0], [1], [0, 0, 1, 1], [], []>} : vector<32x64xbf16>, vector<64x128xbf16>, vector<32x128xf32> -> vector<32x128xf32>
    %58 = arith.addf %57, %51 : vector<32x128xf32>
    %59 = tpu.transpose %58, [1, 0] : vector<32x128xf32> -> vector<128x32xf32>
    %60 = arith.truncf %59 : vector<128x32xf32> to vector<128x32xbf16>
    %cst_16 = arith.constant dense<0.000000e+00> : vector<128x96xf32>
    %61 = tpu.matmul %60, %6, %cst_16 {dimension_numbers = #tpu.dot_dimension_numbers<[1], [0], [0], [1], [0, 0, 1, 1], [], []>} : vector<128x32xbf16>, vector<32x96xbf16>, vector<128x96xf32> -> vector<128x96xf32>
    %62 = vector.broadcast %12 : vector<1x96xf32> to vector<128x96xf32>
    %63 = arith.addf %61, %62 : vector<128x96xf32>
    %64 = vector.extract_strided_slice %63 {offsets = [0, 0], sizes = [128, 32], strides = [1, 1]} : vector<128x96xf32> to vector<128x32xf32>
    %65 = arith.truncf %64 : vector<128x32xf32> to vector<128x32xbf16>
    %66 = vector.extract_strided_slice %63 {offsets = [0, 32], sizes = [128, 32], strides = [1, 1]} : vector<128x96xf32> to vector<128x32xf32>
    %67 = vector.extract_strided_slice %63 {offsets = [0, 64], sizes = [128, 32], strides = [1, 1]} : vector<128x96xf32> to vector<128x32xf32>
    %68 = vector.broadcast %48 : vector<1x32xf32> to vector<128x32xf32>
    %69 = arith.mulf %66, %68 : vector<128x32xf32>
    %70 = vector.broadcast %50 : vector<1x32xf32> to vector<128x32xf32>
    %71 = arith.mulf %66, %70 : vector<128x32xf32>
    %72 = tpu.concatenate %69, %71 in 0 : vector<128x32xf32>, vector<128x32xf32> -> vector<256x32xf32>
    %73 = arith.truncf %72 : vector<256x32xf32> to vector<256x32xbf16>
    %74 = vector.broadcast %48 : vector<1x32xf32> to vector<128x32xf32>
    %75 = arith.mulf %67, %74 : vector<128x32xf32>
    %76 = vector.broadcast %50 : vector<1x32xf32> to vector<128x32xf32>
    %77 = arith.mulf %67, %76 : vector<128x32xf32>
    %78 = tpu.concatenate %75, %77 in 0 : vector<128x32xf32>, vector<128x32xf32> -> vector<256x32xf32>
    %79 = arith.truncf %78 : vector<256x32xf32> to vector<256x32xbf16>
    %cst_17 = arith.constant dense<0.000000e+00> : vector<128x256xf32>
    %80 = tpu.matmul %65, %73, %cst_17 {dimension_numbers = #tpu.dot_dimension_numbers<[1], [1], [0], [0], [0, 0, 1, 0], [], []>} : vector<128x32xbf16>, vector<256x32xbf16>, vector<128x256xf32> -> vector<128x256xf32>
    %cst_18 = arith.constant dense<0xFF800000> : vector<128xf32>
    %81 = vector.multi_reduction <maximumf>, %80, %cst_18 [1] : vector<128x256xf32> to vector<128xf32>
    %82 = vector.shape_cast %81 : vector<128xf32> to vector<128x1xf32>
    %83 = vector.broadcast %82 : vector<128x1xf32> to vector<128x256xf32>
    %84 = arith.subf %80, %83 : vector<128x256xf32>
    %85 = vector.broadcast %3 : vector<1x128xf32> to vector<128x128xf32>
    %86 = arith.mulf %36, %85 : vector<128x128xf32>
    %87 = math.exp %84 : vector<128x256xf32>
    %88 = tpu.concatenate %86, %86 in 1 : vector<128x128xf32>, vector<128x128xf32> -> vector<128x256xf32>
    %89 = arith.mulf %87, %88 : vector<128x256xf32>
    %90 = vector.extract_strided_slice %89 {offsets = [0, 0], sizes = [128, 128], strides = [1, 1]} : vector<128x256xf32> to vector<128x128xf32>
    %cst_19 = arith.constant dense<0.000000e+00> : vector<128xf32>
    %91 = vector.multi_reduction <add>, %90, %cst_19 [1] : vector<128x128xf32> to vector<128xf32>
    %92 = vector.shape_cast %91 : vector<128xf32> to vector<128x1xf32>
    %93 = vector.extract_strided_slice %89 {offsets = [0, 128], sizes = [128, 128], strides = [1, 1]} : vector<128x256xf32> to vector<128x128xf32>
    %cst_20 = arith.constant dense<0.000000e+00> : vector<128xf32>
    %94 = vector.multi_reduction <add>, %93, %cst_20 [1] : vector<128x128xf32> to vector<128xf32>
    %95 = vector.shape_cast %94 : vector<128xf32> to vector<128x1xf32>
    %cst_21 = arith.constant 9.99999968E-21 : f32
    %96 = vector.broadcast %cst_21 : f32 to vector<128x1xf32>
    %97 = arith.maximumf %92, %96 : vector<128x1xf32>
    %98 = tpu.reciprocal %97 {approx = true} : vector<128x1xf32> -> vector<128x1xf32>
    %99 = vector.shape_cast %98 : vector<128x1xf32> to vector<128x1xf32>
    %100 = vector.broadcast %99 : vector<128x1xf32> to vector<128x16xf32>
    %cst_22 = arith.constant 9.99999968E-21 : f32
    %101 = vector.broadcast %cst_22 : f32 to vector<128x1xf32>
    %102 = arith.maximumf %95, %101 : vector<128x1xf32>
    %103 = tpu.reciprocal %102 {approx = true} : vector<128x1xf32> -> vector<128x1xf32>
    %104 = vector.shape_cast %103 : vector<128x1xf32> to vector<128x1xf32>
    %105 = vector.broadcast %104 : vector<128x1xf32> to vector<128x16xf32>
    %106 = tpu.concatenate %100, %105 in 1 : vector<128x16xf32>, vector<128x16xf32> -> vector<128x32xf32>
    %107 = arith.truncf %89 : vector<128x256xf32> to vector<128x256xbf16>
    %cst_23 = arith.constant dense<0.000000e+00> : vector<128x32xf32>
    %108 = tpu.matmul %107, %79, %cst_23 {dimension_numbers = #tpu.dot_dimension_numbers<[1], [0], [0], [1], [0, 0, 1, 1], [], []>} : vector<128x256xbf16>, vector<256x32xbf16>, vector<128x32xf32> -> vector<128x32xf32>
    %109 = arith.mulf %108, %106 : vector<128x32xf32>
    %110 = arith.truncf %109 : vector<128x32xf32> to vector<128x32xbf16>
    %cst_24 = arith.constant dense<0.000000e+00> : vector<128x32xf32>
    %111 = tpu.matmul %110, %7, %cst_24 {dimension_numbers = #tpu.dot_dimension_numbers<[1], [0], [0], [1], [0, 0, 1, 1], [], []>} : vector<128x32xbf16>, vector<32x32xbf16>, vector<128x32xf32> -> vector<128x32xf32>
    %112 = vector.broadcast %14 : vector<1x32xf32> to vector<128x32xf32>
    %113 = arith.addf %111, %112 : vector<128x32xf32>
    %114 = arith.addf %59, %113 : vector<128x32xf32>
    %cst_25 = arith.constant dense<0.000000e+00> : vector<128xf32>
    %115 = vector.multi_reduction <add>, %114, %cst_25 [1] : vector<128x32xf32> to vector<128xf32>
    %116 = vector.shape_cast %115 : vector<128xf32> to vector<128x1xf32>
    %cst_26 = arith.constant 3.200000e+01 : f32
    %117 = vector.broadcast %cst_26 : f32 to vector<128x1xf32>
    %118 = arith.divf %116, %117 : vector<128x1xf32>
    %119 = vector.broadcast %118 : vector<128x1xf32> to vector<128x32xf32>
    %120 = arith.subf %114, %119 : vector<128x32xf32>
    %121 = arith.mulf %120, %120 : vector<128x32xf32>
    %cst_27 = arith.constant dense<0.000000e+00> : vector<128xf32>
    %122 = vector.multi_reduction <add>, %121, %cst_27 [1] : vector<128x32xf32> to vector<128xf32>
    %123 = vector.shape_cast %122 : vector<128xf32> to vector<128x1xf32>
    %cst_28 = arith.constant 3.200000e+01 : f32
    %124 = vector.broadcast %cst_28 : f32 to vector<128x1xf32>
    %125 = arith.divf %123, %124 : vector<128x1xf32>
    %126 = vector.broadcast %118 : vector<128x1xf32> to vector<128x32xf32>
    %127 = arith.subf %114, %126 : vector<128x32xf32>
    %cst_29 = arith.constant 9.99999974E-6 : f32
    %128 = vector.broadcast %cst_29 : f32 to vector<128x1xf32>
    %129 = arith.addf %125, %128 : vector<128x1xf32>
    %130 = math.rsqrt %129 : vector<128x1xf32>
    %131 = vector.broadcast %130 : vector<128x1xf32> to vector<128x32xf32>
    %132 = arith.mulf %127, %131 : vector<128x32xf32>
    %133 = vector.broadcast %20 : vector<1x32xf32> to vector<128x32xf32>
    %134 = arith.mulf %132, %133 : vector<128x32xf32>
    %135 = vector.broadcast %22 : vector<1x32xf32> to vector<128x32xf32>
    %136 = arith.addf %134, %135 : vector<128x32xf32>
    %137 = arith.truncf %136 : vector<128x32xf32> to vector<128x32xbf16>
    %cst_30 = arith.constant dense<0.000000e+00> : vector<128x64xf32>
    %138 = tpu.matmul %137, %8, %cst_30 {dimension_numbers = #tpu.dot_dimension_numbers<[1], [0], [0], [1], [0, 0, 1, 1], [], []>} : vector<128x32xbf16>, vector<32x64xbf16>, vector<128x64xf32> -> vector<128x64xf32>
    %139 = vector.broadcast %16 : vector<1x64xf32> to vector<128x64xf32>
    %140 = arith.addf %138, %139 : vector<128x64xf32>
    %141 = arith.mulf %140, %140 : vector<128x64xf32>
    %142 = arith.mulf %140, %141 : vector<128x64xf32>
    %cst_31 = arith.constant 4.471500e-02 : f32
    %143 = vector.broadcast %cst_31 : f32 to vector<128x64xf32>
    %144 = arith.mulf %143, %142 : vector<128x64xf32>
    %145 = arith.addf %140, %144 : vector<128x64xf32>
    %cst_32 = arith.constant 0.797884583 : f32
    %146 = vector.broadcast %cst_32 : f32 to vector<128x64xf32>
    %147 = arith.mulf %146, %145 : vector<128x64xf32>
    %148 = math.tanh %147 : vector<128x64xf32>
    %cst_33 = arith.constant 1.000000e+00 : f32
    %149 = vector.broadcast %cst_33 : f32 to vector<128x64xf32>
    %150 = arith.addf %149, %148 : vector<128x64xf32>
    %cst_34 = arith.constant 5.000000e-01 : f32
    %151 = vector.broadcast %cst_34 : f32 to vector<128x64xf32>
    %152 = arith.mulf %151, %150 : vector<128x64xf32>
    %153 = arith.mulf %140, %152 : vector<128x64xf32>
    %154 = arith.truncf %153 : vector<128x64xf32> to vector<128x64xbf16>
    %cst_35 = arith.constant dense<0.000000e+00> : vector<128x32xf32>
    %155 = tpu.matmul %154, %9, %cst_35 {dimension_numbers = #tpu.dot_dimension_numbers<[1], [0], [0], [1], [0, 0, 1, 1], [], []>} : vector<128x64xbf16>, vector<64x32xbf16>, vector<128x32xf32> -> vector<128x32xf32>
    %156 = vector.broadcast %18 : vector<1x32xf32> to vector<128x32xf32>
    %157 = arith.addf %155, %156 : vector<128x32xf32>
    %158 = arith.addf %136, %157 : vector<128x32xf32>
    %cst_36 = arith.constant dense<0.000000e+00> : vector<128xf32>
    %159 = vector.multi_reduction <add>, %158, %cst_36 [1] : vector<128x32xf32> to vector<128xf32>
    %160 = vector.shape_cast %159 : vector<128xf32> to vector<128x1xf32>
    %cst_37 = arith.constant 3.200000e+01 : f32
    %161 = vector.broadcast %cst_37 : f32 to vector<128x1xf32>
    %162 = arith.divf %160, %161 : vector<128x1xf32>
    %163 = vector.broadcast %162 : vector<128x1xf32> to vector<128x32xf32>
    %164 = arith.subf %158, %163 : vector<128x32xf32>
    %165 = arith.mulf %164, %164 : vector<128x32xf32>
    %cst_38 = arith.constant dense<0.000000e+00> : vector<128xf32>
    %166 = vector.multi_reduction <add>, %165, %cst_38 [1] : vector<128x32xf32> to vector<128xf32>
    %167 = vector.shape_cast %166 : vector<128xf32> to vector<128x1xf32>
    %cst_39 = arith.constant 3.200000e+01 : f32
    %168 = vector.broadcast %cst_39 : f32 to vector<128x1xf32>
    %169 = arith.divf %167, %168 : vector<128x1xf32>
    %170 = vector.broadcast %162 : vector<128x1xf32> to vector<128x32xf32>
    %171 = arith.subf %158, %170 : vector<128x32xf32>
    %cst_40 = arith.constant 9.99999974E-6 : f32
    %172 = vector.broadcast %cst_40 : f32 to vector<128x1xf32>
    %173 = arith.addf %169, %172 : vector<128x1xf32>
    %174 = math.rsqrt %173 : vector<128x1xf32>
    %175 = vector.broadcast %174 : vector<128x1xf32> to vector<128x32xf32>
    %176 = arith.mulf %171, %175 : vector<128x32xf32>
    %177 = vector.broadcast %24 : vector<1x32xf32> to vector<128x32xf32>
    %178 = arith.mulf %176, %177 : vector<128x32xf32>
    %179 = vector.broadcast %26 : vector<1x32xf32> to vector<128x32xf32>
    %180 = arith.addf %178, %179 : vector<128x32xf32>
    %181 = vector.broadcast %3 : vector<1x128xf32> to vector<16x128xf32>
    %182 = arith.mulf %43, %181 : vector<16x128xf32>
    %cst_41 = arith.constant dense<0.000000e+00> : vector<16x32xf32>
    %183 = tpu.matmul %182, %180, %cst_41 {dimension_numbers = #tpu.dot_dimension_numbers<[1], [0], [0], [1], [0, 0, 1, 1], [], []>} : vector<16x128xf32>, vector<128x32xf32>, vector<16x32xf32> -> vector<16x32xf32>
    %cst_42 = arith.constant dense<0.000000e+00> : vector<16xf32>
    %184 = vector.multi_reduction <add>, %182, %cst_42 [1] : vector<16x128xf32> to vector<16xf32>
    %185 = vector.shape_cast %184 : vector<16xf32> to vector<16x1xf32>
    %cst_43 = arith.constant 9.99999971E-10 : f32
    %186 = vector.broadcast %cst_43 : f32 to vector<16x1xf32>
    %187 = arith.maximumf %185, %186 : vector<16x1xf32>
    %188 = tpu.reciprocal %187 {approx = true} : vector<16x1xf32> -> vector<16x1xf32>
    %189 = vector.broadcast %188 : vector<16x1xf32> to vector<16x32xf32>
    %190 = arith.mulf %183, %189 : vector<16x32xf32>
    %191 = arith.mulf %190, %190 : vector<16x32xf32>
    %cst_44 = arith.constant dense<0.000000e+00> : vector<16xf32>
    %192 = vector.multi_reduction <add>, %191, %cst_44 [1] : vector<16x32xf32> to vector<16xf32>
    %193 = vector.shape_cast %192 : vector<16xf32> to vector<16x1xf32>
    %cst_45 = arith.constant 1.000000e-24 : f32
    %194 = vector.broadcast %cst_45 : f32 to vector<16x1xf32>
    %195 = arith.maximumf %193, %194 : vector<16x1xf32>
    %196 = math.rsqrt %195 : vector<16x1xf32>
    %197 = vector.broadcast %196 : vector<16x1xf32> to vector<16x32xf32>
    %198 = arith.mulf %190, %197 : vector<16x32xf32>
    %c0_46 = arith.constant 0 : index
    %c0_47 = arith.constant 0 : index
    %199 = vector.load %arg4[%c0_46, %c0_47] : memref<16x32xf32, #tpu.memory_space<vmem>>, vector<16x32xf32>
    tpu.vector_store %arg4[%c0_46, %c0_47], %198 {strides = array<i32>} : memref<16x32xf32, #tpu.memory_space<vmem>>, vector<16x32xf32>,
    return
  }
  func.func @transform_0(%arg0: i32) -> (i32, i32, i32) {
    %c0_i32 = arith.constant 0 : i32
    %c0_i32_0 = arith.constant 0 : i32
    %c0_i32_1 = arith.constant 0 : i32
    return %arg0, %c0_i32, %c0_i32_0 : i32, i32, i32
  }
  func.func @transform_1(%arg0: i32) -> (i32, i32, i32) {
    %c0_i32 = arith.constant 0 : i32
    %c0_i32_0 = arith.constant 0 : i32
    %c0_i32_1 = arith.constant 0 : i32
    return %arg0, %c0_i32, %c0_i32_0 : i32, i32, i32
  }
  func.func @transform_2(%arg0: i32) -> (i32, i32) {
    %c0_i32 = arith.constant 0 : i32
    %c0_i32_0 = arith.constant 0 : i32
    %c0_i32_1 = arith.constant 0 : i32
    return %c0_i32, %c0_i32_0 : i32, i32
  }
  func.func @transform_3(%arg0: i32) -> (i32, i32) {
    %c0_i32 = arith.constant 0 : i32
    %c0_i32_0 = arith.constant 0 : i32
    return %arg0, %c0_i32 : i32, i32
  }
}

</mosaic_0001>

<bundles_post_ra>
// kernel: tpu_custom_call.1
= control target key start
LH: loop header
LB: loop body
LE: loop exit
PB: predicated region body
PF: predicated region fallthrough
CT: control target
= control target key end

     0   :  { %8 = vsyncpa [#allocation3], 0  ;;  %s4752_s0 = inlined_call_operand.hbm [shape: s32[1,1,128], index: 0, kind: input, shape index: {}]   ;;  %s4753_s1 = inlined_call_operand.vmem [shape: f32[1,1,128], index: 1, kind: input, shape index: {}]   ;;  %s4754_s2 = inlined_call_operand.hbm [shape: bf16[240,128], index: 2, kind: input, shape index: {}]   ;;  %s4755_s3 = inlined_call_operand.hbm [shape: f32[16,32], index: 3, kind: output, shape index: {}]  }
   0x1   :  { %9 = vsyncpa [#allocation6], 0 }
   0x2   :  { %10 = vsyncpa [#allocation4], 0  ;;  %s3338_s12 = smov [#allocation2]   ;;  %s3339_s14 = smov [#allocation5]  }
   0x3   :  { %s17_s13 = sshll.u32 %s3338_s12, 4  ;;  %s28_s15 = sshll.u32 %s3339_s14, 4  ;;  %s18_s13 = int_to_ptr.vmem [resolvable:$true] %s17_s13  ;;  %s3369_s15 = int_to_ptr.vmem [resolvable:$true] %s28_s15 }
   0x4   :  { %s3266_s18 = scalar_lea.hbm %s4752_s0, 16 }
   0x5   :  { %p3267_p0 = scmp.ne.s32.totalorder %s4752_s0, %s3266_s18  ;;  %p3270_p1 = scmp.lt.u32.totalorder %s3266_s18, %s4752_s0 }
   0x7   :  { %p3272_p2 = pnand %p3270_p1, %p3267_p0 }
   0x9   :  { %3275 = shalt.err (!%p3272_p2)
}
   0xa   :  { %s3276_s23 = scalar_lea.vmem %s18_s13, 16  ;;  %s3280_s24 = scalar_lea.vmem %s18_s13, 32 }
   0xb   :  { %p3277_p3 = scmp.ne.s32.totalorder %s18_s13, %s3276_s23  ;;  %p3281_p4 = scmp.lt.s32.totalorder %s18_s13, %s18_s13 }
   0xc   :  { %p3282_p5 = scmp.lt.s32.totalorder %s3280_s24, %s3276_s23 }
   0xe   :  { %p3283_p6 = por %p3282_p5, %p3281_p4 }
  0x10   :  { %p3284_p7 = pnand %p3283_p6, %p3277_p3 }
  0x12   :  { %3287 = shalt.err (!%p3284_p7)
}
  0x13   :  { %20 = dma.hbm_to_vmem [thread:$0]  %s4752_s0, 16, %s18_s13, [#allocation3]  }
  0x14   :  { %s3288_s29 = scalar_lea.hbm %s4754_s2, 1920 }
  0x15   :  { %p3289_p8 = scmp.ne.s32.totalorder %s4754_s2, %s3288_s29  ;;  %p3292_p9 = scmp.lt.u32.totalorder %s3288_s29, %s4754_s2 }
  0x17   :  { %p3294_p10 = pnand %p3292_p9, %p3289_p8 }
  0x19   :  { %3297 = shalt.err (!%p3294_p10)
}
  0x1a   :  { %s3298_s7 = scalar_lea.vmem %s3369_s15, 1920  ;;  %p3303_p12 = scmp.lt.s32.totalorder %s3369_s15, %s3369_s15 }
  0x1b   :  { %p3299_p11 = scmp.ne.s32.totalorder %s3369_s15, %s3298_s7  ;;  %p3304_p13 = scmp.lt.s32.totalorder %s3298_s7, %s3298_s7 }
  0x1d   :  { %p3305_p0 = por %p3304_p13, %p3303_p12 }
  0x1f   :  { %p3306_p1 = pnand %p3305_p0, %p3299_p11 }
  0x21   :  { %3309 = shalt.err (!%p3306_p1)
}
  0x22   :  { %s3340_s0 = smov 64   ;;  %s3341_s8 = smov 4  }
  0x23   :  { %34 = dma.hbm_to_vmem [thread:$0]  %s4754_s2, 1920, %s3369_s15, [#allocation6], %s3340_s0, %s3340_s0, %s3341_s8  }
  0x24   :  { %3332 = dma.done.wait [#allocation3], 16  }
  0x25   :  { %3333 = vsyncadd [#allocation3], 4294967280 }
  0x26   :  { %3334 = dma.done.wait [#allocation6], 1920  }
  0x27   :  { %3335 = vsyncadd [#allocation6], 4294965376  ;;  %v74_v0 = vlaneseq  ;;  %vm214_vm0 = vcmask 523264   ;;  %v2595_v7 = vld [vmem:[#allocation2] ss:$0 sm:$0xff]  ;;  %v3021_v8 = vld [vmem:[#allocation5] sm:$0xff]  }
  0x28   :  { %v3342_v9 = vmov 1.0|1.0   ;;  %2847 = vmatprep.mubr.msk.bf16.mxu0 %vm214_vm0, %v3021_v8  ;;  %v3022_v12 = vld [vmem:[#allocation5 + $0x8] sm:$0xff]   ;;  %v2675_v13 = vld [vmem:[#allocation5 + $0x10] sm:$0xff]   ;;  %v2676_v20 = vld [vmem:[#allocation5 + $0x18] sm:$0xff]   ;;  %v4756_v30 = vmov 0.0  }
  0x29   :  { %v3402_v1 = vshrl.u32 %v74_v0, 7  ;;  %v2669_v14 = vunpack.c.l.bf16 %v2675_v13  ;;  %v2670_v18 = vunpack.c.h.bf16 %v2675_v13  ;;  %v2673_v22 = vunpack.c.l.bf16 %v2676_v20  ;;  %v3023_v24 = vld [vmem:[#allocation5 + $0x20] sm:$0xff]   ;;  %v3024_v27 = vld [vmem:[#allocation5 + $0x28] sm:$0xff]   ;;  %s3344_s2 = smov 32   ;;  %v72_v57 = vld [vmem:[#allocation5 + $0x70] sm:$0xf] }
  0x2a   :  { %v2674_v26 = vunpack.c.h.bf16 %v2676_v20  ;;  %2851 = vmatprep.subr.bf16.mxu1 %v3023_v24  ;;  %v3435_v29 = vand.u32 127, %v74_v0  ;;  %vm326_vm14 = vcmask 261120   ;;  %v3501_v58 = vunpack.c.l.bf16 %v72_v57  ;;  %s3345_s11 = smov 96  }
  0x2b   :  { %v3405_v2 = vadd.s32 8, %v3402_v1  ;;  %v3408_v3 = vadd.s32 16, %v3402_v1  ;;  %v3411_v4 = vadd.s32 24, %v3402_v1  ;;  %v3414_v5 = vadd.s32 32, %v3402_v1  ;;  %2852 = vmatpush3.bf16.msra.mxu1 %v3023_v24 }
  0x2c   :  { %v3417_v6 = vadd.s32 40, %v3402_v1  ;;  %vm176_vm1 = vcmp.eq.s32.totalorder %v3402_v1, %v2595_v7  ;;  %v3426_v10 = vadd.s32 48, %v3402_v1  ;;  %v3429_v11 = vadd.s32 56, %v3402_v1  ;;  %2853 = vmatprep.subr.bf16.mxu1 %v3024_v27 }
  0x2d   :  { %vm177_vm2 = vcmp.eq.s32.totalorder %v3405_v2, %v2595_v7  ;;  %vm178_vm3 = vcmp.eq.s32.totalorder %v3408_v3, %v2595_v7  ;;  %vm179_vm4 = vcmp.eq.s32.totalorder %v3411_v4, %v2595_v7  ;;  %vm180_vm6 = vcmp.eq.s32.totalorder %v3414_v5, %v2595_v7 }
  0x2e   :  { %vm2606_vm5 = vmpackc.low %vm177_vm2, %vm176_vm1  ;;  %vm181_vm7 = vcmp.eq.s32.totalorder %v3417_v6, %v2595_v7  ;;  %vm182_vm10 = vcmp.eq.s32.totalorder %v3426_v10, %v2595_v7  ;;  %vm183_vm11 = vcmp.eq.s32.totalorder %v3429_v11, %v2595_v7  ;;  %vm164_vm13 = vcmp.lt.s32.totalorder %v3435_v29, 16 }
  0x2f   :  { %2839 = vmatprep.subr.msk.bf16.mxu0 %vm2606_vm5, %v3342_v9  ;;  %vm2608_vm8 = vmpackc.low %vm179_vm4, %vm178_vm3  ;;  %2854 = vmatpush3.bf16.msra.mxu1 %v3024_v27  ;;  %v3439_v31 = vsel %vm164_vm13, 1.0, %v4756_v30  ;;  %v312_v59 = vsub.s32 0, %v3402_v1 }
  0x30   :  { %2840 = vmatpush3.bf16.msk.msra.mxu0 %vm2606_vm5, %v3342_v9  ;;  %vm2610_vm9 = vmpackc.low %vm181_vm7, %vm180_vm6  ;;  %457 = vrot.lane.b32.xlu1 %v3439_v31, %s3344_s2  ;;  %v167_v32 = vsub.f32 1.0, %v3439_v31 }
  0x31   :  { %2841 = vmatprep.subr.msk.bf16.mxu0 %vm2608_vm8, %v3342_v9  ;;  %vm2612_vm12 = vmpackc.low %vm183_vm11, %vm182_vm10  ;;  %v3505_v60 = vrot.slane %v3501_v58, %v312_v59 }
  0x34   :  { %2842 = vmatpush3.bf16.msk.msra.mxu0 %vm2608_vm8, %v3342_v9  ;;  %477 = vrot.lane.b32.xlu1 %v167_v32, %s3344_s2 }
  0x35   :  { %2843 = vmatprep.subr.msk.bf16.mxu0 %vm2610_vm9, %v3342_v9 }
  0x38   :  { %2844 = vmatpush3.bf16.msk.msra.mxu0 %vm2610_vm9, %v3342_v9 }
  0x39   :  { %2845 = vmatprep.subr.msk.bf16.mxu0 %vm2612_vm12, %v3342_v9 }
  0x3c   :  { %2846 = vmatpush3.bf16.msk.msra.mxu0 %vm2612_vm12, %v3342_v9 }
  0x3f   :  { %2848 = vmatmul.mubr.msk.bf16.vlgmr.msra.gmra.mrb[0].mxu0 %vm214_vm0, %v3022_v12 }
  0xa2   :  { %v3507_v62 = vpop.permute.xlu1 %457 }
 0x112   :  { %v2849_v15 = vpop.f32.mrb[0].mxu0 }
 0x113   :  { %v255_v16 = vpop.f32.mrb[1].mxu0  ;;  %v264_v25 = vadd.f32 %v2849_v15, %v2673_v22 }
 0x114   :  { %v2850_v17 = vpop.f32.mrb[2].mxu0  ;;  %v256_v19 = vadd.f32 %v2669_v14, %v255_v16 }
 0x115   :  { %v258_v21 = vpop.f32.mrb[3].mxu0  ;;  %v267_v28 = vadd.f32 %v2850_v17, %v2674_v26 }
 0x116   :  { %270 = vxpose.xlu0.b32.start [1/4] (short) %v256_v19, 128  ;;  %v259_v23 = vadd.f32 %v2670_v18, %v258_v21  ;;  %v3533_v19 = vpop.permute.xlu1 %477 }
 0x11a   :  { %271 = vxpose.xlu0.b32.cont [2/4] (short) %v259_v23, 128 }
 0x11e   :  { %272 = vxpose.xlu0.b32.cont [3/4] (short) %v264_v25, 128 }
 0x122   :  { %273 = vxpose.xlu0.b32.end [4/4] (short) %v267_v28, 128 }
 0x196   :  { %v3445_v33 = vpop.trf.xlu0 }
 0x19a   :  { %v3447_v34 = vpop.trf.xlu0 }
 0x19b   :  { %v302_v35 = vpack.c.bf16 %v3447_v34, %v3445_v33 }
 0x19d   :  { %2855 = vmatprep.mubr.msk.bf16.mxu1 %vm326_vm14, %v302_v35 }
 0x19e   :  { %v3452_v36 = vpop.trf.xlu0 }
 0x1a2   :  { %v3454_v37 = vpop.trf.xlu0 }
 0x1a3   :  { %v303_v38 = vpack.c.bf16 %v3454_v37, %v3452_v36 }
 0x1a5   :  { %2856 = vmatmul.mubr.msk.bf16.vlgmr.msra.gmra.mrb[0].mxu1 %vm326_vm14, %v303_v38 }
 0x1a6   :  { %v3459_v39 = vpop.trf.xlu0 }
 0x1aa   :  { %v3461_v40 = vpop.trf.xlu0 }
 0x1ab   :  { %v304_v41 = vpack.c.bf16 %v3461_v40, %v3459_v39 }
 0x1ad   :  { %2859 = vmatprep.mubr.msk.bf16.mxu1 %vm326_vm14, %v304_v41 }
 0x1ae   :  { %v3466_v42 = vpop.trf.xlu0 }
 0x1b2   :  { %v3468_v43 = vpop.trf.xlu0 }
 0x1b3   :  { %v305_v44 = vpack.c.bf16 %v3468_v43, %v3466_v42 }
 0x1b5   :  { %2860 = vmatmul.mubr.msk.bf16.gmra.mrb[4].mxu1 %vm326_vm14, %v305_v44 }
 0x1b6   :  { %v3473_v45 = vpop.trf.xlu0 }
 0x1b7   :  { %4766 = vst [vmem:[#allocation11_spill] sm:$0xff] %v3473_v45 }
 0x1ba   :  { %v3475_v46 = vpop.trf.xlu0 }
 0x1bb   :  { %4767 = vst [vmem:[#allocation12_spill] sm:$0xff] %v3475_v46  ;;  %v306_v47 = vpack.c.bf16 %v3475_v46, %v3473_v45  ;;  %v93_v45 = vshra.s32 %v3402_v1, 3 }
 0x1bd   :  { %2863 = vmatprep.mubr.msk.bf16.mxu1 %vm326_vm14, %v306_v47 }
 0x1be   :  { %v3480_v48 = vpop.trf.xlu0 }
 0x1bf   :  { %4768 = vst [vmem:[#allocation13_spill] sm:$0xff] %v3480_v48 }
 0x1c2   :  { %v3482_v49 = vpop.trf.xlu0 }
 0x1c3   :  { %4769 = vst [vmem:[#allocation14_spill] sm:$0xff] %v3482_v49  ;;  %v307_v50 = vpack.c.bf16 %v3482_v49, %v3480_v48 }
 0x1c5   :  { %2864 = vmatmul.mubr.msk.bf16.gmra.mrb[8].mxu1 %vm326_vm14, %v307_v50 }
 0x1c6   :  { %v3487_v51 = vpop.trf.xlu0 }
 0x1c7   :  { %4770 = vst [vmem:[#allocation15_spill] sm:$0xff] %v3487_v51 }
 0x1ca   :  { %v3489_v52 = vpop.trf.xlu0 }
 0x1cb   :  { %4771 = vst [vmem:[#allocation16_spill] sm:$0xff] %v3489_v52  ;;  %v308_v53 = vpack.c.bf16 %v3489_v52, %v3487_v51 }
 0x1cd   :  { %2867 = vmatprep.mubr.msk.bf16.mxu1 %vm326_vm14, %v308_v53 }
 0x1ce   :  { %v3494_v54 = vpop.trf.xlu0 }
 0x1cf   :  { %4772 = vst [vmem:[#allocation17_spill] sm:$0xff] %v3494_v54 }
 0x1d2   :  { %v3496_v55 = vpop.trf.xlu0 }
 0x1d3   :  { %4773 = vst [vmem:[#allocation18_spill] sm:$0xff] %v3496_v55  ;;  %v309_v56 = vpack.c.bf16 %v3496_v55, %v3494_v54 }
 0x1d5   :  { %2868 = vmatmul.mubr.msk.bf16.gmra.mrb[12].mxu1 %vm326_vm14, %v309_v56 }
 0x278   :  { %v2857_v61 = vpop.f32.mrb[0].mxu1 }
 0x279   :  { %v3510_v63 = vadd.f32 %v2857_v61, %v3505_v60  ;;  %v385_v0 = vpop.f32.mrb[1].mxu1 }
 0x27a   :  { %v3513_v7 = vadd.f32 %v385_v0, %v3505_v60  ;;  %v2858_v8 = vpop.f32.mrb[2].mxu1 }
 0x27b   :  { %v3516_v9 = vadd.f32 %v2858_v8, %v3505_v60  ;;  %v388_v12 = vpop.f32.mrb[3].mxu1  ;;  %v462_v14 = vmul.f32 %v3507_v62, %v3510_v63  ;;  %v482_v26 = vmul.f32 %v3533_v19, %v3510_v63 }
 0x27c   :  { %v3519_v13 = vadd.f32 %v388_v12, %v3505_v60  ;;  %v460_v17 = vmul.f32 %v3507_v62, %v3513_v7  ;;  %v480_v23 = vmul.f32 %v3533_v19, %v3513_v7 }
 0x27d   :  { %v463_v15 = vmul.f32 %v3507_v62, %v3516_v9  ;;  %v483_v25 = vmul.f32 %v3533_v19, %v3516_v9 }
 0x27e   :  { %v3527_v16 = vpack.c.bf16 %v3519_v13, %v3513_v7  ;;  %v461_v18 = vmul.f32 %v3507_v62, %v3519_v13  ;;  %v481_v22 = vmul.f32 %v3533_v19, %v3519_v13 }
 0x27f   :  { %v497_v20 = vpack.c.bf16 %v463_v15, %v462_v14  ;;  %v505_v28 = vpack.c.bf16 %v483_v25, %v482_v26 }
 0x280   :  { %2709 = vmatprep.mubr.msk.bf16.mxu1 %vm326_vm14, %v3527_v16  ;;  %v496_v21 = vpack.c.bf16 %v461_v18, %v460_v17  ;;  %v504_v24 = vpack.c.bf16 %v481_v22, %v480_v23 }
 0x281   :  { %584 = vrot.lane.b32.xlu0 %v497_v20, %s3345_s11 }
 0x282   :  { %582 = vrot.lane.b32.xlu1 %v496_v21, %s3345_s11 }
 0x286   :  { %598 = vrot.lane.b32.xlu1 %v504_v24, %s3345_s11 }
 0x288   :  { %v2861_v27 = vpop.f32.mrb[4].mxu1 }
 0x289   :  { %v401_v35 = vpop.f32.mrb[5].mxu1  ;;  %v3565_v61 = vadd.f32 %v2861_v27, %v3505_v60 }
 0x28a   :  { %v3549_v38 = vadd.f32 %v401_v35, %v3505_v60  ;;  %600 = vrot.lane.b32.xlu1 %v505_v28, %s3345_s11  ;;  %v2862_v41 = vpop.f32.mrb[6].mxu1 }
 0x28b   :  { %v404_v44 = vpop.f32.mrb[7].mxu1  ;;  %v3560_v56 = vadd.f32 %v2862_v41, %v3505_v60  ;;  %v466_v14 = vmul.f32 %v3507_v62, %v3565_v61  ;;  %v486_v23 = vmul.f32 %v3533_v19, %v3565_v61 }
 0x28c   :  { %v3553_v47 = vadd.f32 %v404_v44, %v3505_v60  ;;  %v464_v50 = vmul.f32 %v3507_v62, %v3549_v38  ;;  %v484_v0 = vmul.f32 %v3533_v19, %v3549_v38 }
 0x28d   :  { %v467_v12 = vmul.f32 %v3507_v62, %v3560_v56  ;;  %v487_v18 = vmul.f32 %v3533_v19, %v3560_v56 }
 0x28e   :  { %v465_v53 = vmul.f32 %v3507_v62, %v3553_v47  ;;  %v485_v59 = vmul.f32 %v3533_v19, %v3553_v47 }
 0x28f   :  { %v499_v17 = vpack.c.bf16 %v467_v12, %v466_v14  ;;  %v507_v26 = vpack.c.bf16 %v487_v18, %v486_v23 }
 0x290   :  { %v498_v57 = vpack.c.bf16 %v465_v53, %v464_v50  ;;  %v506_v8 = vpack.c.bf16 %v485_v59, %v484_v0 }
 0x292   :  { %586 = vrot.lane.b32.xlu1 %v498_v57, %s3345_s11 }
 0x296   :  { %602 = vrot.lane.b32.xlu1 %v506_v8, %s3345_s11 }
 0x298   :  { %v2865_v15 = vpop.f32.mrb[8].mxu1 }
 0x299   :  { %v417_v20 = vpop.f32.mrb[9].mxu1  ;;  %v3597_v50 = vadd.f32 %v2865_v15, %v3505_v60 }
 0x29a   :  { %v3578_v21 = vadd.f32 %v417_v20, %v3505_v60  ;;  %588 = vrot.lane.b32.xlu1 %v499_v17, %s3345_s11  ;;  %v2866_v22 = vpop.f32.mrb[10].mxu1 }
 0x29b   :  { %v420_v24 = vpop.f32.mrb[11].mxu1  ;;  %v3592_v35 = vadd.f32 %v2866_v22, %v3505_v60  ;;  %v470_v0 = vmul.f32 %v3507_v62, %v3597_v50  ;;  %v490_v20 = vmul.f32 %v3533_v19, %v3597_v50 }
 0x29c   :  { %v3584_v25 = vadd.f32 %v420_v24, %v3505_v60  ;;  %v468_v27 = vmul.f32 %v3507_v62, %v3578_v21  ;;  %v488_v53 = vmul.f32 %v3533_v19, %v3578_v21 }
 0x29d   :  { %v471_v59 = vmul.f32 %v3507_v62, %v3592_v35  ;;  %v491_v14 = vmul.f32 %v3533_v19, %v3592_v35 }
 0x29e   :  { %604 = vrot.lane.b32.xlu1 %v507_v26, %s3345_s11  ;;  %v469_v28 = vmul.f32 %v3507_v62, %v3584_v25  ;;  %v489_v44 = vmul.f32 %v3533_v19, %v3584_v25 }
 0x29f   :  { %v501_v12 = vpack.c.bf16 %v471_v59, %v470_v0  ;;  %v509_v24 = vpack.c.bf16 %v491_v14, %v490_v20 }
 0x2a0   :  { %v500_v41 = vpack.c.bf16 %v469_v28, %v468_v27  ;;  %v508_v57 = vpack.c.bf16 %v489_v44, %v488_v53 }
 0x2a2   :  { %590 = vrot.lane.b32.xlu1 %v500_v41, %s3345_s11 }
 0x2a6   :  { %606 = vrot.lane.b32.xlu1 %v508_v57, %s3345_s11 }
 0x2a8   :  { %v2869_v8 = vpop.f32.mrb[12].mxu1 }
 0x2a9   :  { %v433_v15 = vpop.f32.mrb[13].mxu1  ;;  %v3629_v53 = vadd.f32 %v2869_v8, %v3505_v60 }
 0x2aa   :  { %v3610_v17 = vadd.f32 %v433_v15, %v3505_v60  ;;  %592 = vrot.lane.b32.xlu1 %v501_v12, %s3345_s11  ;;  %v2870_v18 = vpop.f32.mrb[14].mxu1 }
 0x2ab   :  { %v436_v22 = vpop.f32.mrb[15].mxu1  ;;  %v3624_v28 = vadd.f32 %v2870_v18, %v3505_v60  ;;  %v474_v12 = vmul.f32 %v3507_v62, %v3629_v53 }
 0x2ac   :  { %v3616_v23 = vadd.f32 %v436_v22, %v3505_v60  ;;  %v472_v26 = vmul.f32 %v3507_v62, %v3610_v17  ;;  %v492_v57 = vmul.f32 %v3533_v19, %v3610_v17  ;;  %v494_v60 = vmul.f32 %v3533_v19, %v3629_v53 }
 0x2ad   :  { %v475_v0 = vmul.f32 %v3507_v62, %v3624_v28  ;;  %v495_v15 = vmul.f32 %v3533_v19, %v3624_v28 }
 0x2ae   :  { %608 = vrot.lane.b32.xlu1 %v509_v24, %s3345_s11  ;;  %v473_v27 = vmul.f32 %v3507_v62, %v3616_v23  ;;  %v493_v44 = vmul.f32 %v3533_v19, %v3616_v23 }
 0x2af   :  { %v503_v14 = vpack.c.bf16 %v475_v0, %v474_v12  ;;  %v511_v8 = vpack.c.bf16 %v495_v15, %v494_v60 }
 0x2b0   :  { %v502_v41 = vpack.c.bf16 %v473_v27, %v472_v26  ;;  %v510_v59 = vpack.c.bf16 %v493_v44, %v492_v57 }
 0x2b2   :  { %594 = vrot.lane.b32.xlu1 %v502_v41, %s3345_s11 }
 0x2b6   :  { %610 = vrot.lane.b32.xlu1 %v510_v59, %s3345_s11 }
 0x2ba   :  { %596 = vrot.lane.b32.xlu1 %v503_v14, %s3345_s11 }
 0x2be   :  { %612 = vrot.lane.b32.xlu1 %v511_v8, %s3345_s11 }
 0x2c2   :  { %531 = vrot.lane.b32.xlu1 %v167_v32, %s3340_s0 }
 0x2c6   :  { %512 = vrot.lane.b32.xlu1 %v3439_v31, %s3340_s0 }
 0x2f3   :  { %v585_v19 = vpop.permute.xlu0 %584 }
 0x2f4   :  { %v583_v62 = vpop.permute.xlu1 %582  ;;  %v642_v24 = vsel %vm326_vm14, %v585_v19, 0 }
 0x2f5   :  { %v639_v20 = vsel %vm326_vm14, %v583_v62, 0 }
 0x2f8   :  { %v599_v18 = vpop.permute.xlu1 %598 }
 0x2f9   :  { %3002 = vmatprep.subr.msk.bf16.mxu1 %vm326_vm14, %v599_v18 }
 0x2fa   :  { %2694 = vmatpush3.bf16.xpose.msra.mxu1 %v639_v20 }
 0x2fc   :  { %v601_v22 = vpop.permute.xlu1 %600 }
 0x2fd   :  { %3003 = vmatprep.subr.msk.bf16.mxu1 %vm326_vm14, %v601_v22 }
 0x302   :  { %2696 = vmatpush3.bf16.xpose.msra.mxu1 %v642_v24 }
 0x304   :  { %v587_v26 = vpop.permute.xlu1 %586 }
 0x305   :  { %v645_v32 = vsel %vm326_vm14, %v587_v26, 0 }
 0x308   :  { %v603_v27 = vpop.permute.xlu1 %602 }
 0x309   :  { %3004 = vmatprep.subr.msk.bf16.mxu1 %vm326_vm14, %v603_v27 }
 0x30a   :  { %2698 = vmatpush3.bf16.xpose.msra.mxu1 %v645_v32 }
 0x30c   :  { %v589_v31 = vpop.permute.xlu1 %588 }
 0x30d   :  { %v648_v44 = vsel %vm326_vm14, %v589_v31, 0  ;;  %v449_v31 = vpack.c.bf16 %v3516_v9, %v3510_v63 }
 0x310   :  { %v605_v41 = vpop.permute.xlu1 %604 }
 0x311   :  { %3005 = vmatprep.subr.msk.bf16.mxu1 %vm326_vm14, %v605_v41 }
 0x312   :  { %2700 = vmatpush3.bf16.xpose.msra.mxu1 %v648_v44 }
 0x314   :  { %v591_v57 = vpop.permute.xlu1 %590 }
 0x315   :  { %v651_v0 = vsel %vm326_vm14, %v591_v57, 0 }
 0x318   :  { %v607_v59 = vpop.permute.xlu1 %606 }
 0x319   :  { %3006 = vmatprep.subr.msk.bf16.mxu1 %vm326_vm14, %v607_v59 }
 0x31a   :  { %2702 = vmatpush3.bf16.xpose.msra.mxu1 %v651_v0 }
 0x31c   :  { %v593_v12 = vpop.permute.xlu1 %592 }
 0x31d   :  { %v654_v15 = vsel %vm326_vm14, %v593_v12, 0 }
 0x320   :  { %v609_v14 = vpop.permute.xlu1 %608 }
 0x321   :  { %3007 = vmatprep.subr.msk.bf16.mxu1 %vm326_vm14, %v609_v14 }
 0x322   :  { %2704 = vmatpush3.bf16.xpose.msra.mxu1 %v654_v15 }
 0x324   :  { %v595_v60 = vpop.permute.xlu1 %594 }
 0x325   :  { %v657_v62 = vsel %vm326_vm14, %v595_v60, 0 }
 0x328   :  { %v611_v8 = vpop.permute.xlu1 %610 }
 0x329   :  { %3008 = vmatprep.subr.msk.bf16.mxu1 %vm326_vm14, %v611_v8 }
 0x32a   :  { %2706 = vmatpush3.bf16.xpose.msra.mxu1 %v657_v62 }
 0x32c   :  { %v597_v18 = vpop.permute.xlu1 %596 }
 0x32d   :  { %v660_v22 = vsel %vm326_vm14, %v597_v18, 0  ;;  %v450_v18 = vpack.c.bf16 %v3553_v47, %v3549_v38 }
 0x330   :  { %v613_v20 = vpop.permute.xlu1 %612 }
 0x331   :  { %3009 = vmatprep.subr.msk.bf16.mxu1 %vm326_vm14, %v613_v20 }
 0x332   :  { %2708 = vmatpush3.bf16.xpose.msra.mxu1 %v660_v22 }
 0x334   :  { %v3666_v19 = vpop.permute.xlu1 %531 }
 0x335   :  { %v534_v24 = vmul.f32 %v3666_v19, %v3513_v7  ;;  %v535_v26 = vmul.f32 %v3666_v19, %v3519_v13  ;;  %v536_v15 = vmul.f32 %v3666_v19, %v3510_v63  ;;  %v537_v60 = vmul.f32 %v3666_v19, %v3516_v9 }
 0x336   :  { %v549_v30 = vmul.f32 %v3666_v19, %v3624_v28  ;;  %v546_v52 = vmul.f32 %v3666_v19, %v3610_v17  ;;  %v547_v54 = vmul.f32 %v3666_v19, %v3616_v23 }
 0x337   :  { %v558_v27 = vpack.c.bf16 %v535_v26, %v534_v24  ;;  %v559_v62 = vpack.c.bf16 %v537_v60, %v536_v15  ;;  %v540_v24 = vmul.f32 %v3666_v19, %v3565_v61  ;;  %v541_v26 = vmul.f32 %v3666_v19, %v3560_v56 }
 0x338   :  { %v3672_v32 = vpop.permute.xlu1 %512  ;;  %v454_v15 = vpack.c.bf16 %v3616_v23, %v3610_v17  ;;  %v455_v60 = vpack.c.bf16 %v3624_v28, %v3629_v53  ;;  %v564_v48 = vpack.c.bf16 %v547_v54, %v546_v52 }
 0x339   :  { %1190 = vrot.lane.b32.xlu1 %v558_v27, %s3340_s0  ;;  %2710 = vmatmul.mubr.msk.bf16.vlgmr.msra.gmra.mrb[16].mxu1 %vm326_vm14, %v3527_v16  ;;  %v517_v41 = vmul.f32 %v3672_v32, %v3510_v63  ;;  %v518_v44 = vmul.f32 %v3672_v32, %v3516_v9  ;;  %v515_v57 = vmul.f32 %v3672_v32, %v3513_v7 }
 0x33a   :  { %2711 = vmatprep.mubr.msk.bf16.mxu1 %vm326_vm14, %v449_v31  ;;  %v516_v59 = vmul.f32 %v3672_v32, %v3519_v13  ;;  %v519_v12 = vmul.f32 %v3672_v32, %v3549_v38  ;;  %v520_v16 = vmul.f32 %v3672_v32, %v3553_v47  ;;  %v523_v13 = vmul.f32 %v3672_v32, %v3578_v21 }
 0x33b   :  { %v551_v0 = vpack.c.bf16 %v518_v44, %v517_v41  ;;  %v524_v8 = vmul.f32 %v3672_v32, %v3584_v25  ;;  %v538_v63 = vmul.f32 %v3666_v19, %v3549_v38  ;;  %v539_v9 = vmul.f32 %v3666_v19, %v3553_v47 }
 0x33c   :  { %v550_v14 = vpack.c.bf16 %v516_v59, %v515_v57  ;;  %v552_v7 = vpack.c.bf16 %v520_v16, %v519_v12  ;;  %v561_v38 = vpack.c.bf16 %v541_v26, %v540_v24  ;;  %v451_v47 = vpack.c.bf16 %v3560_v56, %v3565_v61 }
 0x33d   :  { %1176 = vrot.lane.b32.xlu0 %v551_v0, %s3340_s0  ;;  %v554_v20 = vpack.c.bf16 %v524_v8, %v523_v13  ;;  %v560_v22 = vpack.c.bf16 %v539_v9, %v538_v63  ;;  %v521_v27 = vmul.f32 %v3672_v32, %v3565_v61  ;;  %v542_v44 = vmul.f32 %v3666_v19, %v3578_v21 }
 0x33e   :  { %1174 = vrot.lane.b32.xlu1 %v550_v14, %s3340_s0  ;;  %v543_v57 = vmul.f32 %v3666_v19, %v3584_v25  ;;  %v452_v61 = vpack.c.bf16 %v3584_v25, %v3578_v21  ;;  %v545_v0 = vmul.f32 %v3666_v19, %v3592_v35  ;;  %v525_v16 = vmul.f32 %v3672_v32, %v3597_v50 }
 0x33f   :  { %v526_v14 = vmul.f32 %v3672_v32, %v3592_v35  ;;  %v453_v25 = vpack.c.bf16 %v3592_v35, %v3597_v50 }
 0x340   :  { %v562_v59 = vpack.c.bf16 %v543_v57, %v542_v44 }
 0x341   :  { %1178 = vrot.lane.b32.xlu0 %v552_v7, %s3340_s0  ;;  %2712 = vmatmul.mubr.msk.bf16.gmra.mrb[20].mxu1 %vm326_vm14, %v449_v31  ;;  %v522_v31 = vmul.f32 %v3672_v32, %v3560_v56  ;;  %v544_v56 = vmul.f32 %v3666_v19, %v3597_v50  ;;  %v555_v21 = vpack.c.bf16 %v526_v14, %v525_v16 }
 0x342   :  { %1192 = vrot.lane.b32.xlu1 %v559_v62, %s3340_s0  ;;  %2713 = vmatprep.mubr.msk.bf16.mxu1 %vm326_vm14, %v450_v18 }
 0x343   :  { %v553_v41 = vpack.c.bf16 %v522_v31, %v521_v27  ;;  %v563_v12 = vpack.c.bf16 %v545_v0, %v544_v56 }
 0x345   :  { %1182 = vrot.lane.b32.xlu0 %v554_v20, %s3340_s0 }
 0x346   :  { %1194 = vrot.lane.b32.xlu1 %v560_v22, %s3340_s0 }
 0x349   :  { %2714 = vmatmul.mubr.msk.bf16.gmra.mrb[24].mxu1 %vm326_vm14, %v450_v18 }
 0x34a   :  { %1196 = vrot.lane.b32.xlu1 %v561_v38, %s3340_s0  ;;  %2715 = vmatprep.mubr.msk.bf16.mxu1 %vm326_vm14, %v451_v47 }
 0x34e   :  { %1180 = vrot.lane.b32.xlu1 %v553_v41, %s3340_s0 }
 0x351   :  { %2716 = vmatmul.mubr.msk.bf16.gmra.mrb[28].mxu1 %vm326_vm14, %v451_v47 }
 0x352   :  { %1198 = vrot.lane.b32.xlu1 %v562_v59, %s3340_s0  ;;  %2717 = vmatprep.mubr.msk.bf16.mxu1 %vm326_vm14, %v452_v61 }
 0x356   :  { %1200 = vrot.lane.b32.xlu1 %v563_v12, %s3340_s0 }
 0x359   :  { %2718 = vmatmul.mubr.msk.bf16.gmra.mrb[32].mxu1 %vm326_vm14, %v452_v61 }
 0x35a   :  { %1184 = vrot.lane.b32.xlu1 %v555_v21, %s3340_s0  ;;  %2719 = vmatprep.mubr.msk.bf16.mxu1 %vm326_vm14, %v453_v25 }
 0x361   :  { %2720 = vmatmul.mubr.msk.bf16.gmra.mrb[36].mxu1 %vm326_vm14, %v453_v25 }
 0x362   :  { %2721 = vmatprep.mubr.msk.bf16.mxu1 %vm326_vm14, %v454_v15 }
 0x369   :  { %2722 = vmatmul.mubr.msk.bf16.gmra.mrb[40].mxu1 %vm326_vm14, %v454_v15 }
 0x36a   :  { %2723 = vmatprep.mubr.msk.bf16.mxu1 %vm326_vm14, %v455_v60 }
 0x371   :  { %2724 = vmatmul.mubr.msk.bf16.gmra.mrb[44].mxu1 %vm326_vm14, %v455_v60 }
 0x3ab   :  { %v1191_v35 = vpop.permute.xlu1 %1190 }
 0x3ac   :  { %2725 = vmatprep.subr.bf16.mxu0 %v1191_v35 }
 0x3af   :  { %v1177_v7 = vpop.permute.xlu0 %1176 }
 0x3b0   :  { %v1175_v50 = vpop.permute.xlu1 %1174 }
 0x3b1   :  { %2726 = vmatpush3.bf16.msra.mxu0 %v1175_v50 }
 0x3b3   :  { %v1179_v62 = vpop.permute.xlu0 %1178 }
 0x3b4   :  { %v1193_v13 = vpop.permute.xlu1 %1192 }
 0x3b5   :  { %2727 = vmatprep.subr.bf16.mxu0 %v1193_v13 }
 0x3b6   :  { %2728 = vmatpush3.bf16.msra.mxu0 %v1177_v7 }
 0x3b7   :  { %v1183_v20 = vpop.permute.xlu0 %1182 }
 0x3b8   :  { %v1195_v8 = vpop.permute.xlu1 %1194 }
 0x3b9   :  { %2729 = vmatprep.subr.bf16.mxu0 %v1195_v8 }
 0x3ba   :  { %2730 = vmatpush3.bf16.msra.mxu0 %v1179_v62 }
 0x3bc   :  { %v1197_v18 = vpop.permute.xlu1 %1196 }
 0x3bd   :  { %2731 = vmatprep.subr.bf16.mxu0 %v1197_v18 }
 0x3c0   :  { %v1181_v63 = vpop.permute.xlu1 %1180 }
 0x3c1   :  { %2732 = vmatpush3.bf16.msra.mxu0 %v1181_v63 }
 0x3c4   :  { %v1199_v9 = vpop.permute.xlu1 %1198 }
 0x3c5   :  { %2733 = vmatprep.subr.bf16.mxu0 %v1199_v9 }
 0x3c6   :  { %2734 = vmatpush3.bf16.msra.mxu0 %v1183_v20 }
 0x3c8   :  { %v1201_v22 = vpop.permute.xlu1 %1200 }
 0x3c9   :  { %2735 = vmatprep.subr.bf16.mxu0 %v1201_v22 }
 0x3cc   :  { %v1185_v24 = vpop.permute.xlu1 %1184 }
 0x3cd   :  { %2736 = vmatpush3.bf16.msra.mxu0 %v1185_v24  ;;  %v527_v24 = vmul.f32 %v3672_v32, %v3610_v17 }
 0x40c   :  { %v3760_v26 = vpop.f32.mrb[16].mxu1 }
 0x40d   :  { %v3762_v38 = vpop.f32.mrb[17].mxu1 }
 0x40e   :  { %v3764_v47 = vpop.f32.mrb[18].mxu1  ;;  %v799_v27 = vmax.f32 %v3760_v26, %v3762_v38 }
 0x40f   :  { %v3768_v31 = vpop.f32.mrb[19].mxu1 }
 0x410   :  { %800 = vmax.xlane.f32.xlu1 %v799_v27  ;;  %v802_v41 = vmax.f32 %v3764_v47, %v3768_v31  ;;  %v528_v27 = vmul.f32 %v3672_v32, %v3616_v23 }
 0x412   :  { %803 = vmax.xlane.f32.xlu0 %v802_v41 }
 0x414   :  { %v3772_v44 = vpop.f32.mrb[20].mxu1 }
 0x415   :  { %v3774_v57 = vpop.f32.mrb[21].mxu1 }
 0x416   :  { %v3776_v59 = vpop.f32.mrb[22].mxu1  ;;  %v805_v61 = vmax.f32 %v3772_v44, %v3774_v57 }
 0x417   :  { %v3780_v56 = vpop.f32.mrb[23].mxu1 }
 0x418   :  { %806 = vmax.xlane.f32.xlu1 %v805_v61  ;;  %v808_v0 = vmax.f32 %v3776_v59, %v3780_v56 }
 0x41a   :  { %809 = vmax.xlane.f32.xlu0 %v808_v0 }
 0x41c   :  { %v3784_v12 = vpop.f32.mrb[24].mxu1 }
 0x41d   :  { %v3786_v16 = vpop.f32.mrb[25].mxu1 }
 0x41e   :  { %v3788_v14 = vpop.f32.mrb[26].mxu1  ;;  %v811_v21 = vmax.f32 %v3784_v12, %v3786_v16 }
 0x41f   :  { %v3792_v25 = vpop.f32.mrb[27].mxu1 }
 0x420   :  { %812 = vmax.xlane.f32.xlu1 %v811_v21  ;;  %v814_v15 = vmax.f32 %v3788_v14, %v3792_v25 }
 0x422   :  { %815 = vmax.xlane.f32.xlu0 %v814_v15 }
 0x424   :  { %v3796_v60 = vpop.f32.mrb[28].mxu1 }
 0x425   :  { %v3798_v35 = vpop.f32.mrb[29].mxu1 }
 0x426   :  { %v3800_v50 = vpop.f32.mrb[30].mxu1  ;;  %v817_v7 = vmax.f32 %v3796_v60, %v3798_v35 }
 0x427   :  { %v3804_v13 = vpop.f32.mrb[31].mxu1 }
 0x428   :  { %818 = vmax.xlane.f32.xlu1 %v817_v7  ;;  %v820_v8 = vmax.f32 %v3800_v50, %v3804_v13  ;;  %v556_v7 = vpack.c.bf16 %v528_v27, %v527_v24  ;;  %v529_v24 = vmul.f32 %v3672_v32, %v3629_v53  ;;  %v530_v27 = vmul.f32 %v3672_v32, %v3624_v28 }
 0x42a   :  { %821 = vmax.xlane.f32.xlu0 %v820_v8  ;;  %v548_v8 = vmul.f32 %v3666_v19, %v3629_v53 }
 0x42c   :  { %v3808_v62 = vpop.f32.mrb[32].mxu1  ;;  %v565_v51 = vpack.c.bf16 %v549_v30, %v548_v8  ;;  %v557_v30 = vpack.c.bf16 %v530_v27, %v529_v24  ;;  %v3879_v27 = vshra.s32 %v3435_v29, 3 }
 0x42d   :  { %v3810_v18 = vpop.f32.mrb[33].mxu1 }
 0x42e   :  { %v3812_v63 = vpop.f32.mrb[34].mxu1  ;;  %v823_v9 = vmax.f32 %v3808_v62, %v3810_v18  ;;  %vm110_vm15 = vcmp.eq.s32.totalorder %v93_v45, %v3879_v27 }
 0x42f   :  { %v3816_v20 = vpop.f32.mrb[35].mxu1 }
 0x430   :  { %v826_v22 = vmax.f32 %v3812_v63, %v3816_v20 }
 0x434   :  { %v3824_v41 = vpop.f32.mrb[36].mxu1 }
 0x435   :  { %v3826_v61 = vpop.f32.mrb[37].mxu1 }
 0x436   :  { %v3828_v0 = vpop.f32.mrb[38].mxu1  ;;  %v829_v21 = vmax.f32 %v3824_v41, %v3826_v61 }
 0x437   :  { %v3832_v15 = vpop.f32.mrb[39].mxu1 }
 0x438   :  { %v832_v55 = vmax.f32 %v3828_v0, %v3832_v15 }
 0x439   :  { %1186 = vrot.lane.b32.xlu1 %v556_v7, %s3340_s0 }
 0x43c   :  { %v3849_v49 = vpop.f32.mrb[40].mxu1 }
 0x43d   :  { %1204 = vrot.lane.b32.xlu1 %v565_v51, %s3340_s0  ;;  %v3852_v46 = vpop.f32.mrb[41].mxu1 }
 0x43e   :  { %v3854_v7 = vpop.f32.mrb[42].mxu1  ;;  %v835_v17 = vmax.f32 %v3849_v49, %v3852_v46 }
 0x43f   :  { %v3858_v23 = vpop.f32.mrb[43].mxu1 }
 0x440   :  { %1202 = vrot.lane.b32.xlu0 %v564_v48, %s3340_s0  ;;  %v838_v28 = vmax.f32 %v3854_v7, %v3858_v23 }
 0x441   :  { %1188 = vrot.lane.b32.xlu1 %v557_v30, %s3340_s0 }
 0x444   :  { %v3864_v53 = vpop.f32.mrb[44].mxu1 }
 0x445   :  { %v3866_v51 = vpop.f32.mrb[45].mxu1 }
 0x446   :  { %v3868_v19 = vpop.f32.mrb[46].mxu1  ;;  %v841_v52 = vmax.f32 %v3864_v53, %v3866_v51 }
 0x447   :  { %v3872_v54 = vpop.f32.mrb[47].mxu1 }
 0x448   :  { %v844_v32 = vmax.f32 %v3868_v19, %v3872_v54 }
 0x45f   :  { %824 = vmax.xlane.f32.xlu0 %v823_v9  ;;  %v94_v9 = vshra.s32 %v3405_v2, 3 }
 0x461   :  { %vm111_vm1 = vcmp.eq.s32.totalorder %v94_v9, %v3879_v27 }
 0x463   :  { %830 = vmax.xlane.f32.xlu0 %v829_v21 }
 0x465   :  { %827 = vmax.xlane.f32.xlu1 %v826_v22 }
 0x467   :  { %833 = vmax.xlane.f32.xlu0 %v832_v55 }
 0x469   :  { %839 = vmax.xlane.f32.xlu1 %v838_v28 }
 0x46b   :  { %836 = vmax.xlane.f32.xlu0 %v835_v17 }
 0x46d   :  { %845 = vmax.xlane.f32.xlu1 %v844_v32 }
 0x46f   :  { %842 = vmax.xlane.f32.xlu0 %v841_v52 }
 0x49d   :  { %v801_v48 = vpop.xlane.xlu1 %800 }
 0x49e   :  { %v847_v8 = vsub.f32 %v3760_v26, %v801_v48  ;;  %v848_v24 = vsub.f32 %v3762_v38, %v801_v48  ;;  %v95_v26 = vshra.s32 %v3408_v3, 3 }
 0x49f   :  { %v804_v30 = vpop.xlane.xlu0 %803 }
 0x4a0   :  { %v901_v21 = vmul.f32 1.442695, %v847_v8  ;;  %v903_v22 = vmul.f32 1.442695, %v848_v24  ;;  %v849_v55 = vsub.f32 %v3764_v47, %v804_v30  ;;  %v850_v17 = vsub.f32 %v3768_v31, %v804_v30  ;;  %v3893_v47 = vld [vmem:[%s4753_s1] ss:$0 sm:$0xff] }
 0x4a1   :  { %v4774_v31 = vmov 0.0   ;;  %v96_v24 = vshra.s32 %v3411_v4, 3  ;;  %vm112_vm2 = vcmp.eq.s32.totalorder %v95_v26, %v3879_v27 }
 0x4a2   :  { %3033 = vpow2.f32 %v901_v21  ;;  %v905_v28 = vmul.f32 1.442695, %v849_v55  ;;  %v907_v52 = vmul.f32 1.442695, %v850_v17  ;;  %v2576_v48 = vsel %vm110_vm15, 1.0, %v4774_v31 }
 0x4a3   :  { %3035 = vpow2.f32 %v903_v22  ;;  %v2577_v45 = vsel %vm111_vm1, 1.0, %v4774_v31  ;;  %v2578_v4 = vsel %vm112_vm2, 1.0, %v4774_v31  ;;  %vm113_vm3 = vcmp.eq.s32.totalorder %v96_v24, %v3879_v27 }
 0x4a4   :  { %3037 = vpow2.f32 %v905_v28  ;;  %v886_v55 = vmul.f32 %v3893_v47, %v2577_v45  ;;  %v887_v45 = vmul.f32 %v3893_v47, %v2578_v4  ;;  %v2579_v24 = vsel %vm113_vm3, 1.0, %v4774_v31 }
 0x4a5   :  { %3039 = vpow2.f32 %v907_v52  ;;  %v807_v29 = vpop.xlane.xlu1 %806  ;;  %v97_v52 = vshra.s32 %v3414_v5, 3  ;;  %v888_v4 = vmul.f32 %v3893_v47, %v2579_v24  ;;  %vm1125_vm2 = vcmask 130048  }
 0x4a6   :  { %v851_v38 = vsub.f32 %v3772_v44, %v807_v29  ;;  %v852_v32 = vsub.f32 %v3774_v57, %v807_v29  ;;  %v885_v57 = vmul.f32 %v3893_v47, %v2576_v48  ;;  %vm159_vm3 = vcmp.eq.s32.totalorder %v3405_v2, %v3879_v27 }
 0x4a7   :  { %v810_v8 = vpop.xlane.xlu0 %809  ;;  %vm114_vm4 = vcmp.eq.s32.totalorder %v97_v52, %v3879_v27 }
 0x4a8   :  { %v909_v30 = vmul.f32 1.442695, %v851_v38  ;;  %v911_v9 = vmul.f32 1.442695, %v852_v32  ;;  %v853_v3 = vsub.f32 %v3776_v59, %v810_v8  ;;  %v854_v44 = vsub.f32 %v3780_v56, %v810_v8 }
 0x4aa   :  { %3041 = vpow2.f32 %v909_v30  ;;  %v913_v21 = vmul.f32 1.442695, %v853_v3  ;;  %v915_v22 = vmul.f32 1.442695, %v854_v44  ;;  %v98_v30 = vshra.s32 %v3417_v6, 3 }
 0x4ab   :  { %3043 = vpow2.f32 %v911_v9 }
 0x4ac   :  { %v3034_v17 = vpop.eup %3033  ;;  %3045 = vpow2.f32 %v913_v21  ;;  %vm115_vm5 = vcmp.eq.s32.totalorder %v98_v30, %v3879_v27  ;;  %v99_v30 = vshra.s32 %v3426_v10, 3 }
 0x4ad   :  { %v3036_v28 = vpop.eup %3035  ;;  %3047 = vpow2.f32 %v915_v22  ;;  %v813_v59 = vpop.xlane.xlu1 %812  ;;  %v3905_v56 = vmul.f32 %v3034_v17, %v885_v57  ;;  %v2581_v24 = vsel %vm115_vm5, 1.0, %v4774_v31 }
 0x4ae   :  { %v3038_v29 = vpop.eup %3037  ;;  %v855_v26 = vsub.f32 %v3784_v12, %v813_v59  ;;  %v856_v38 = vsub.f32 %v3786_v16, %v813_v59  ;;  %v966_v44 = vmul.f32 %v3036_v28, %v885_v57  ;;  %vm116_vm6 = vcmp.eq.s32.totalorder %v99_v30, %v3879_v27 }
 0x4af   :  { %v3040_v32 = vpop.eup %3039  ;;  %997 = vadd.xlane.f32.xlu0 %v3905_v56  ;;  %v816_v48 = vpop.xlane.xlu0 %815  ;;  %v3911_v8 = vmul.f32 %v3038_v29, %v886_v55 }
 0x4b0   :  { %v917_v9 = vmul.f32 1.442695, %v855_v26  ;;  %v919_v3 = vmul.f32 1.442695, %v856_v38  ;;  %v857_v5 = vsub.f32 %v3788_v14, %v816_v48  ;;  %v858_v12 = vsub.f32 %v3792_v25, %v816_v48 }
 0x4b1   :  { %999 = vadd.xlane.f32.xlu1 %v3911_v8  ;;  %v1142_v16 = vpack.c.bf16 %v3911_v8, %v3905_v56  ;;  %v968_v21 = vmul.f32 %v3040_v32, %v886_v55  ;;  %v2580_v25 = vsel %vm114_vm4, 1.0, %v4774_v31  ;;  %v83_v56 = vadd.s32 64, %v3402_v1 }
 0x4b2   :  { %3049 = vpow2.f32 %v917_v9  ;;  %v921_v22 = vmul.f32 1.442695, %v857_v5  ;;  %v923_v17 = vmul.f32 1.442695, %v858_v12  ;;  %v889_v48 = vmul.f32 %v3893_v47, %v2580_v25 }
 0x4b3   :  { %3051 = vpow2.f32 %v919_v3  ;;  %1029 = vadd.xlane.f32.xlu0 %v966_v44  ;;  %v1143_v6 = vpack.c.bf16 %v968_v21, %v966_v44  ;;  %v84_v8 = vadd.s32 72, %v3402_v1 }
 0x4b4   :  { %v3042_v14 = vpop.eup %3041  ;;  %3053 = vpow2.f32 %v921_v22  ;;  %v100_v22 = vshra.s32 %v3429_v11, 3 }
 0x4b5   :  { %v3044_v59 = vpop.eup %3043  ;;  %3055 = vpow2.f32 %v923_v17  ;;  %1254 = vmatprep.mubr.bf16.mxu0 %v1143_v6  ;;  %v819_v57 = vpop.xlane.xlu1 %818  ;;  %1031 = vadd.xlane.f32.xlu1 %v968_v21  ;;  %v3925_v55 = vmul.f32 %v3042_v14, %v887_v45 }
 0x4b6   :  { %v3046_v28 = vpop.eup %3045  ;;  %v859_v52 = vsub.f32 %v3796_v60, %v819_v57  ;;  %v860_v29 = vsub.f32 %v3798_v35, %v819_v57  ;;  %v970_v44 = vmul.f32 %v3044_v59, %v887_v45  ;;  %vm117_vm7 = vcmp.eq.s32.totalorder %v100_v22, %v3879_v27 }
 0x4b7   :  { %v3048_v26 = vpop.eup %3047  ;;  %1001 = vadd.xlane.f32.xlu0 %v3925_v55  ;;  %v822_v38 = vpop.xlane.xlu0 %821  ;;  %v3930_v32 = vmul.f32 %v3046_v28, %v888_v4  ;;  %v2582_v59 = vsel %vm116_vm6, 1.0, %v4774_v31 }
 0x4b8   :  { %v925_v9 = vmul.f32 1.442695, %v859_v52  ;;  %v927_v3 = vmul.f32 1.442695, %v860_v29  ;;  %v861_v5 = vsub.f32 %v3800_v50, %v822_v38  ;;  %v862_v60 = vsub.f32 %v3804_v13, %v822_v38 }
 0x4b9   :  { %v1187_v12 = vpop.permute.xlu1 %1186  ;;  %1003 = vadd.xlane.f32.xlu1 %v3930_v32  ;;  %v1144_v35 = vpack.c.bf16 %v3930_v32, %v3925_v55  ;;  %v972_v21 = vmul.f32 %v3048_v26, %v888_v4  ;;  %v890_v50 = vmul.f32 %v3893_v47, %v2581_v24  ;;  %v2583_v29 = vsel %vm117_vm7, 1.0, %v4774_v31 }
 0x4ba   :  { %3057 = vpow2.f32 %v925_v9  ;;  %v929_v17 = vmul.f32 1.442695, %v861_v5  ;;  %v931_v6 = vmul.f32 1.442695, %v862_v60  ;;  %v891_v32 = vmul.f32 %v3893_v47, %v2582_v59 }
 0x4bb   :  { %3059 = vpow2.f32 %v927_v3  ;;  %1033 = vadd.xlane.f32.xlu0 %v970_v44  ;;  %v1203_v10 = vpop.permute.xlu0 %1202  ;;  %v1145_v14 = vpack.c.bf16 %v972_v21, %v970_v44  ;;  %v892_v30 = vmul.f32 %v3893_v47, %v2583_v29 }
 0x4bc   :  { %v3050_v13 = vpop.eup %3049  ;;  %3061 = vpow2.f32 %v929_v17  ;;  %2737 = vmatprep.subr.bf16.mxu0 %v1203_v10  ;;  %v102_v10 = vshra.s32 %v84_v8, 3 }
 0x4bd   :  { %v3052_v25 = vpop.eup %3051  ;;  %3063 = vpow2.f32 %v931_v6  ;;  %v1205_v45 = vpop.permute.xlu1 %1204  ;;  %1035 = vadd.xlane.f32.xlu1 %v972_v21  ;;  %2738 = vmatpush3.bf16.msra.mxu0 %v1187_v12  ;;  %v973_v11 = vmul.f32 %v3050_v13, %v889_v48  ;;  %v101_v6 = vshra.s32 %v83_v56, 3 }
 0x4be   :  { %v3054_v4 = vpop.eup %3053  ;;  %2739 = vmatprep.subr.bf16.mxu0 %v1205_v45  ;;  %v974_v28 = vmul.f32 %v3052_v25, %v889_v48  ;;  %vm119_vm9 = vcmp.eq.s32.totalorder %v102_v10, %v3879_v27 }
 0x4bf   :  { %v3056_v57 = vpop.eup %3055  ;;  %1005 = vadd.xlane.f32.xlu0 %v973_v11  ;;  %v975_v55 = vmul.f32 %v3054_v4, %v890_v50  ;;  %vm118_vm8 = vcmp.eq.s32.totalorder %v101_v6, %v3879_v27 }
 0x4c0   :  { %v976_v52 = vmul.f32 %v3056_v57, %v890_v50  ;;  %v2584_v57 = vsel %vm118_vm8, 1.0, %v4774_v31 }
 0x4c1   :  { %v1189_v26 = vpop.permute.xlu1 %1188  ;;  %1007 = vadd.xlane.f32.xlu1 %v975_v55  ;;  %v1146_v38 = vpack.c.bf16 %v975_v55, %v973_v11 }
 0x4c2   :  { %2740 = vmatpush3.bf16.msra.mxu0 %v1189_v26  ;;  %v1147_v24 = vpack.c.bf16 %v976_v52, %v974_v28 }
 0x4c3   :  { %1037 = vadd.xlane.f32.xlu0 %v974_v28  ;;  %v88_v28 = vadd.s32 104, %v3402_v1 }
 0x4c4   :  { %v3058_v9 = vpop.eup %3057 }
 0x4c5   :  { %v3060_v3 = vpop.eup %3059  ;;  %1039 = vadd.xlane.f32.xlu1 %v976_v52  ;;  %1255 = vmatmul.mubr.bf16.vlgmr.msra.gmra.mrb[4].mxu0 %v1142_v16  ;;  %v977_v48 = vmul.f32 %v3058_v9, %v891_v32  ;;  %v85_v16 = vadd.s32 80, %v3402_v1  ;;  %v2585_v52 = vsel %vm119_vm9, 1.0, %v4774_v31 }
 0x4c6   :  { %v3062_v5 = vpop.eup %3061  ;;  %1262 = vmatprep.mubr.bf16.mxu0 %v1145_v14  ;;  %v978_v44 = vmul.f32 %v3060_v3, %v891_v32  ;;  %v86_v14 = vadd.s32 88, %v3402_v1  ;;  %v3979_v3 = vmul.f32 %v3893_v47, %v2585_v52 }
 0x4c7   :  { %v3064_v60 = vpop.eup %3063  ;;  %1009 = vadd.xlane.f32.xlu0 %v977_v48  ;;  %v979_v12 = vmul.f32 %v3062_v5, %v892_v30  ;;  %v103_v13 = vshra.s32 %v85_v16, 3  ;;  %v106_v5 = vshra.s32 %v88_v28, 3 }
 0x4c8   :  { %v980_v21 = vmul.f32 %v3064_v60, %v892_v30  ;;  %v104_v45 = vshra.s32 %v86_v14, 3 }
 0x4c9   :  { %1011 = vadd.xlane.f32.xlu1 %v979_v12  ;;  %v1148_v22 = vpack.c.bf16 %v979_v12, %v977_v48  ;;  %vm3961_vm10 = vcmp.eq.s32.totalorder %v103_v13, %v3879_v27  ;;  %vm3992_vm12 = vcmp.eq.s32.totalorder %v106_v5, %v3879_v27 }
 0x4ca   :  { %v1149_v17 = vpack.c.bf16 %v980_v21, %v978_v44  ;;  %vm3970_vm11 = vcmp.eq.s32.totalorder %v104_v45, %v3879_v27  ;;  %v2586_v48 = vsel %vm3961_vm10, 1.0, %v4774_v31 }
 0x4cb   :  { %1041 = vadd.xlane.f32.xlu0 %v978_v44 }
 0x4cd   :  { %1043 = vadd.xlane.f32.xlu1 %v980_v21  ;;  %1263 = vmatmul.mubr.bf16.gmra.mrb[8].mxu0 %v1144_v35  ;;  %v2587_v21 = vsel %vm3970_vm11, 1.0, %v4774_v31 }
 0x4ce   :  { %1270 = vmatprep.mubr.bf16.mxu0 %v1147_v24 }
 0x4d5   :  { %1271 = vmatmul.mubr.bf16.gmra.mrb[12].mxu0 %v1146_v38  ;;  %v87_v38 = vadd.s32 96, %v3402_v1 }
 0x4d6   :  { %1278 = vmatprep.mubr.bf16.mxu0 %v1149_v17 }
 0x4dd   :  { %1279 = vmatmul.mubr.bf16.gmra.mrb[16].mxu0 %v1148_v22  ;;  %v105_v22 = vshra.s32 %v87_v38, 3  ;;  %v896_v38 = vmul.f32 %v3893_v47, %v2587_v21 }
 0x4df   :  { %vm4000_vm13 = vcmp.eq.s32.totalorder %v105_v22, %v3879_v27 }
 0x4ec   :  { %v825_v50 = vpop.xlane.xlu0 %824 }
 0x4ed   :  { %v863_v25 = vsub.f32 %v3808_v62, %v825_v50  ;;  %v864_v35 = vsub.f32 %v3810_v18, %v825_v50 }
 0x4ef   :  { %v933_v11 = vmul.f32 1.442695, %v863_v25  ;;  %v935_v4 = vmul.f32 1.442695, %v864_v35  ;;  %v89_v25 = vadd.s32 112, %v3402_v1 }
 0x4f0   :  { %v831_v59 = vpop.xlane.xlu0 %830 }
 0x4f1   :  { %3065 = vpow2.f32 %v933_v11  ;;  %v867_v62 = vsub.f32 %v3824_v41, %v831_v59  ;;  %v868_v18 = vsub.f32 %v3826_v61, %v831_v59  ;;  %v893_v61 = vmul.f32 %v3893_v47, %v2584_v57 }
 0x4f2   :  { %3067 = vpow2.f32 %v935_v4  ;;  %v828_v29 = vpop.xlane.xlu1 %827 }
 0x4f3   :  { %v941_v32 = vmul.f32 1.442695, %v867_v62  ;;  %v943_v24 = vmul.f32 1.442695, %v868_v18  ;;  %v865_v30 = vsub.f32 %v3812_v63, %v828_v29  ;;  %v866_v9 = vsub.f32 %v3816_v20, %v828_v29 }
 0x4f4   :  { %v834_v41 = vpop.xlane.xlu0 %833  ;;  %v895_v29 = vmul.f32 %v3893_v47, %v2586_v48 }
 0x4f5   :  { %3069 = vpow2.f32 %v941_v32  ;;  %v937_v60 = vmul.f32 1.442695, %v865_v30  ;;  %v939_v12 = vmul.f32 1.442695, %v866_v9  ;;  %v869_v44 = vsub.f32 %v3828_v0, %v834_v41 }
 0x4f6   :  { %3071 = vpow2.f32 %v943_v24  ;;  %v870_v63 = vsub.f32 %v3832_v15, %v834_v41  ;;  %v840_v20 = vpop.xlane.xlu1 %839  ;;  %v90_v15 = vadd.s32 120, %v3402_v1  ;;  %v2589_v32 = vsel %vm3992_vm12, 1.0, %v4774_v31 }
 0x4f7   :  { %3073 = vpow2.f32 %v937_v60  ;;  %v945_v17 = vmul.f32 1.442695, %v869_v44  ;;  %v873_v56 = vsub.f32 %v3854_v7, %v840_v20  ;;  %v874_v8 = vsub.f32 %v3858_v23, %v840_v20 }
 0x4f8   :  { %3075 = vpow2.f32 %v939_v12  ;;  %v947_v16 = vmul.f32 1.442695, %v870_v63  ;;  %v837_v6 = vpop.xlane.xlu0 %836  ;;  %v108_v55 = vshra.s32 %v90_v15, 3  ;;  %v898_v12 = vmul.f32 %v3893_v47, %v2589_v32 }
 0x4f9   :  { %3077 = vpow2.f32 %v945_v17  ;;  %v953_v10 = vmul.f32 1.442695, %v873_v56  ;;  %v955_v14 = vmul.f32 1.442695, %v874_v8  ;;  %v871_v50 = vsub.f32 %v3849_v49, %v837_v6 }
 0x4fa   :  { %3079 = vpow2.f32 %v947_v16  ;;  %v872_v7 = vsub.f32 %v3852_v46, %v837_v6  ;;  %v846_v13 = vpop.xlane.xlu1 %845  ;;  %vm125_vm15 = vcmp.eq.s32.totalorder %v108_v55, %v3879_v27 }
 0x4fb   :  { %v3066_v35 = vpop.eup %3065  ;;  %3081 = vpow2.f32 %v953_v10  ;;  %v949_v45 = vmul.f32 1.442695, %v871_v50  ;;  %v877_v11 = vsub.f32 %v3868_v19, %v846_v13  ;;  %v878_v4 = vsub.f32 %v3872_v54, %v846_v13 }
 0x4fc   :  { %v3068_v59 = vpop.eup %3067  ;;  %3083 = vpow2.f32 %v955_v14  ;;  %v951_v49 = vmul.f32 1.442695, %v872_v7  ;;  %v843_v57 = vpop.xlane.xlu0 %842  ;;  %v981_v46 = vmul.f32 %v3066_v35, %v893_v61  ;;  %v107_v19 = vshra.s32 %v89_v25, 3 }
 0x4fd   :  { %3085 = vpow2.f32 %v949_v45  ;;  %v961_v28 = vmul.f32 1.442695, %v877_v11  ;;  %v963_v62 = vmul.f32 1.442695, %v878_v4  ;;  %v875_v18 = vsub.f32 %v3864_v53, %v843_v57 }
 0x4fe   :  { %3087 = vpow2.f32 %v951_v49  ;;  %v876_v52 = vsub.f32 %v3866_v51, %v843_v57  ;;  %1013 = vadd.xlane.f32.xlu0 %v981_v46  ;;  %v982_v53 = vmul.f32 %v3068_v59, %v893_v61  ;;  %v2588_v51 = vsel %vm4000_vm13, 1.0, %v4774_v31 }
 0x4ff   :  { %v3070_v26 = vpop.eup %3069  ;;  %3089 = vpow2.f32 %v961_v28  ;;  %v957_v54 = vmul.f32 1.442695, %v875_v18  ;;  %vm124_vm1 = vcmp.eq.s32.totalorder %v107_v19, %v3879_v27  ;;  %v897_v61 = vmul.f32 %v3893_v47, %v2588_v51 }
 0x500   :  { %v3072_v24 = vpop.eup %3071  ;;  %3091 = vpow2.f32 %v963_v62  ;;  %v959_v30 = vmul.f32 1.442695, %v876_v52  ;;  %v985_v20 = vmul.f32 %v3070_v26, %v895_v29  ;;  %v2591_v22 = vsel %vm125_vm15, 1.0, %v4774_v31 }
 0x501   :  { %v3074_v9 = vpop.eup %3073  ;;  %3093 = vpow2.f32 %v957_v54  ;;  %v986_v8 = vmul.f32 %v3072_v24, %v895_v29  ;;  %v2590_v6 = vsel %vm124_vm1, 1.0, %v4774_v31  ;;  %v900_v14 = vmul.f32 %v3893_v47, %v2591_v22  ;;  %v3026_v29 = vld [vmem:[#allocation5 + $0x38] sm:$0xff]  }
 0x502   :  { %v3076_v41 = vpop.eup %3075  ;;  %3095 = vpow2.f32 %v959_v30  ;;  %1045 = vadd.xlane.f32.xlu0 %v982_v53  ;;  %v983_v48 = vmul.f32 %v3074_v9, %v3979_v3  ;;  %v899_v23 = vmul.f32 %v3893_v47, %v2590_v6  ;;  %v3025_v47 = vld [vmem:[#allocation5 + $0x30] sm:$0xff]  }
 0x503   :  { %v3078_v5 = vpop.eup %3077  ;;  %v984_v60 = vmul.f32 %v3076_v41, %v3979_v3  ;;  %2871 = vmatprep.subr.bf16.mxu0 %v3025_v47 }
 0x504   :  { %v3080_v44 = vpop.eup %3079  ;;  %1015 = vadd.xlane.f32.xlu1 %v983_v48  ;;  %v1150_v63 = vpack.c.bf16 %v983_v48, %v981_v46  ;;  %v987_v21 = vmul.f32 %v3078_v5, %v896_v38  ;;  %2872 = vmatpush3.bf16.msra.mxu0 %v3025_v47 }
 0x505   :  { %v3082_v17 = vpop.eup %3081  ;;  %v1151_v56 = vpack.c.bf16 %v984_v60, %v982_v53  ;;  %v988_v16 = vmul.f32 %v3080_v44, %v896_v38  ;;  %2873 = vmatprep.subr.bf16.mxu0 %v3026_v29 }
 0x506   :  { %v3084_v0 = vpop.eup %3083  ;;  %1017 = vadd.xlane.f32.xlu0 %v985_v20  ;;  %v1152_v3 = vpack.c.bf16 %v987_v21, %v985_v20  ;;  %v991_v13 = vmul.f32 %v3082_v17, %v898_v12 }
 0x507   :  { %v3086_v15 = vpop.eup %3085  ;;  %1286 = vmatprep.mubr.bf16.mxu0 %v1151_v56  ;;  %v1153_v10 = vpack.c.bf16 %v988_v16, %v986_v8  ;;  %v992_v45 = vmul.f32 %v3084_v0, %v898_v12 }
 0x508   :  { %v3088_v50 = vpop.eup %3087  ;;  %1287 = vmatmul.mubr.bf16.gmra.mrb[20].mxu0 %v1150_v63  ;;  %1047 = vadd.xlane.f32.xlu1 %v984_v60  ;;  %v989_v7 = vmul.f32 %v3086_v15, %v897_v61 }
 0x509   :  { %v3090_v25 = vpop.eup %3089  ;;  %1294 = vmatprep.mubr.bf16.mxu0 %v1153_v10  ;;  %v990_v35 = vmul.f32 %v3088_v50, %v897_v61  ;;  %2874 = vmatpush3.bf16.msra.mxu0 %v3026_v29 }
 0x50a   :  { %v3092_v11 = vpop.eup %3091  ;;  %1049 = vadd.xlane.f32.xlu0 %v986_v8  ;;  %v1154_v4 = vpack.c.bf16 %v991_v13, %v989_v7  ;;  %v995_v55 = vmul.f32 %v3090_v25, %v900_v14 }
 0x50b   :  { %v3094_v59 = vpop.eup %3093  ;;  %v1155_v49 = vpack.c.bf16 %v992_v45, %v990_v35  ;;  %v996_v62 = vmul.f32 %v3092_v11, %v900_v14 }
 0x50c   :  { %v3096_v57 = vpop.eup %3095  ;;  %1019 = vadd.xlane.f32.xlu1 %v987_v21  ;;  %v993_v46 = vmul.f32 %v3094_v59, %v899_v23 }
 0x50d   :  { %v994_v28 = vmul.f32 %v3096_v57, %v899_v23 }
 0x50e   :  { %1021 = vadd.xlane.f32.xlu0 %v989_v7  ;;  %v1156_v18 = vpack.c.bf16 %v995_v55, %v993_v46 }
 0x50f   :  { %v1157_v52 = vpack.c.bf16 %v996_v62, %v994_v28 }
 0x510   :  { %1295 = vmatmul.mubr.bf16.gmra.mrb[24].mxu0 %v1152_v3  ;;  %1051 = vadd.xlane.f32.xlu1 %v988_v16 }
 0x511   :  { %1302 = vmatprep.mubr.bf16.mxu0 %v1155_v49 }
 0x512   :  { %1053 = vadd.xlane.f32.xlu0 %v990_v35 }
 0x514   :  { %1023 = vadd.xlane.f32.xlu1 %v991_v13 }
 0x516   :  { %1025 = vadd.xlane.f32.xlu0 %v993_v46 }
 0x518   :  { %1303 = vmatmul.mubr.bf16.gmra.mrb[28].mxu0 %v1154_v4  ;;  %1055 = vadd.xlane.f32.xlu1 %v992_v45 }
 0x519   :  { %1310 = vmatprep.mubr.bf16.mxu0 %v1157_v52 }
 0x51a   :  { %1057 = vadd.xlane.f32.xlu0 %v994_v28 }
 0x51c   :  { %1027 = vadd.xlane.f32.xlu1 %v995_v55 }
 0x520   :  { %1311 = vmatmul.mubr.bf16.gmra.mrb[32].mxu0 %v1156_v18  ;;  %1059 = vadd.xlane.f32.xlu1 %v996_v62 }
 0x53c   :  { %v998_v19 = vpop.xlane.xlu0 %997 }
 0x53d   :  { %v1061_v41 = vmax.f32 %v998_v19, 1e-20 }
 0x53e   :  { %v1000_v26 = vpop.xlane.xlu1 %999 }
 0x53f   :  { %v1062_v48 = vmax.f32 %v1000_v26, 1e-20 }
 0x540   :  { %v1030_v54 = vpop.xlane.xlu0 %1029 }
 0x541   :  { %v1093_v51 = vmax.f32 %v1030_v54, 1e-20 }
 0x542   :  { %v1032_v38 = vpop.xlane.xlu1 %1031 }
 0x543   :  { %v1094_v9 = vmax.f32 %v1032_v38, 1e-20  ;;  %3097 = vrcp.f32 %v1093_v51 }
 0x544   :  { %v1002_v32 = vpop.xlane.xlu0 %1001 }
 0x545   :  { %3099 = vrcp.f32 %v1094_v9  ;;  %v1063_v63 = vmax.f32 %v1002_v32, 1e-20 }
 0x546   :  { %v1004_v24 = vpop.xlane.xlu1 %1003  ;;  %3101 = vrcp.f32 %v1061_v41 }
 0x547   :  { %3103 = vrcp.f32 %v1062_v48  ;;  %v1064_v21 = vmax.f32 %v1004_v24, 1e-20 }
 0x548   :  { %v1034_v30 = vpop.xlane.xlu0 %1033 }
 0x549   :  { %v1095_v61 = vmax.f32 %v1034_v30, 1e-20 }
 0x54a   :  { %v1036_v53 = vpop.xlane.xlu1 %1035 }
 0x54b   :  { %v1096_v12 = vmax.f32 %v1036_v53, 1e-20  ;;  %3105 = vrcp.f32 %v1095_v61 }
 0x54c   :  { %v1006_v5 = vpop.xlane.xlu0 %1005 }
 0x54d   :  { %3107 = vrcp.f32 %v1096_v12  ;;  %v3098_v17 = vpop.eup %3097  ;;  %v1065_v23 = vmax.f32 %v1006_v5, 1e-20 }
 0x54e   :  { %v1008_v60 = vpop.xlane.xlu1 %1007  ;;  %3109 = vrcp.f32 %v1063_v63 }
 0x54f   :  { %v3100_v8 = vpop.eup %3099  ;;  %3111 = vrcp.f32 %v1064_v21  ;;  %v1066_v45 = vmax.f32 %v1008_v60, 1e-20 }
 0x550   :  { %v1038_v44 = vpop.xlane.xlu0 %1037  ;;  %v3102_v3 = vpop.eup %3101 }
 0x551   :  { %v1097_v15 = vmax.f32 %v1038_v44, 1e-20  ;;  %v3104_v50 = vpop.eup %3103  ;;  %v1126_v25 = vsel %vm1125_vm2, %v3102_v3, %v3098_v17 }
 0x552   :  { %v1040_v20 = vpop.xlane.xlu1 %1039  ;;  %v1127_v35 = vsel %vm1125_vm2, %v3104_v50, %v3100_v8 }
 0x553   :  { %v1098_v7 = vmax.f32 %v1040_v20, 1e-20  ;;  %3113 = vrcp.f32 %v1097_v15 }
 0x554   :  { %v1010_v16 = vpop.xlane.xlu0 %1009 }
 0x555   :  { %3115 = vrcp.f32 %v1098_v7  ;;  %v3106_v46 = vpop.eup %3105  ;;  %v1067_v32 = vmax.f32 %v1010_v16, 1e-20 }
 0x556   :  { %v1012_v10 = vpop.xlane.xlu1 %1011  ;;  %3117 = vrcp.f32 %v1065_v23 }
 0x557   :  { %v3108_v62 = vpop.eup %3107  ;;  %3119 = vrcp.f32 %v1066_v45  ;;  %v1068_v53 = vmax.f32 %v1012_v10, 1e-20 }
 0x558   :  { %v1042_v59 = vpop.xlane.xlu0 %1041  ;;  %v3110_v47 = vpop.eup %3109 }
 0x559   :  { %v1099_v29 = vmax.f32 %v1042_v59, 1e-20  ;;  %v3112_v26 = vpop.eup %3111  ;;  %v1128_v24 = vsel %vm1125_vm2, %v3110_v47, %v3106_v46 }
 0x55a   :  { %v1044_v55 = vpop.xlane.xlu1 %1043  ;;  %v1129_v30 = vsel %vm1125_vm2, %v3112_v26, %v3108_v62 }
 0x55b   :  { %v1100_v54 = vmax.f32 %v1044_v55, 1e-20  ;;  %3121 = vrcp.f32 %v1099_v29 }
 0x55d   :  { %3123 = vrcp.f32 %v1100_v54  ;;  %v3114_v5 = vpop.eup %3113 }
 0x55e   :  { %3125 = vrcp.f32 %v1067_v32 }
 0x55f   :  { %v3116_v61 = vpop.eup %3115  ;;  %3127 = vrcp.f32 %v1068_v53 }
 0x560   :  { %v3118_v63 = vpop.eup %3117 }
 0x561   :  { %v3120_v21 = vpop.eup %3119  ;;  %v1130_v17 = vsel %vm1125_vm2, %v3118_v63, %v3114_v5 }
 0x565   :  { %v3122_v3 = vpop.eup %3121 }
 0x567   :  { %v3124_v10 = vpop.eup %3123 }
 0x568   :  { %v3126_v7 = vpop.eup %3125 }
 0x569   :  { %v3128_v23 = vpop.eup %3127 }
 0x56a   :  { %v1133_v45 = vsel %vm1125_vm2, %v3128_v23, %v3124_v10 }
 0x598   :  { %v2741_v22 = vpop.f32.mrb[4].mxu0 }
 0x599   :  { %v2742_v56 = vpop.f32.mrb[5].mxu0 }
 0x59a   :  { %v2743_v6 = vadd.f32 %v2742_v56, %v2741_v22  ;;  %v2744_v0 = vpop.f32.mrb[6].mxu0  ;;  %v1131_v56 = vsel %vm1125_vm2, %v3120_v21, %v3116_v61 }
 0x59b   :  { %v2745_v14 = vpop.f32.mrb[7].mxu0 }
 0x59c   :  { %v2746_v13 = vadd.f32 %v2745_v14, %v2744_v0  ;;  %v1319_v11 = vmul.f32 %v2743_v6, %v1126_v25 }
 0x59e   :  { %v1320_v4 = vmul.f32 %v2746_v13, %v1127_v35  ;;  %v1132_v35 = vsel %vm1125_vm2, %v3126_v7, %v3122_v3 }
 0x5a0   :  { %v1335_v49 = vpack.c.bf16 %v1320_v4, %v1319_v11  ;;  %v2747_v57 = vpop.f32.mrb[8].mxu0 }
 0x5a1   :  { %v2748_v28 = vpop.f32.mrb[9].mxu0 }
 0x5a2   :  { %v2749_v18 = vadd.f32 %v2748_v28, %v2747_v57  ;;  %v2750_v52 = vpop.f32.mrb[10].mxu0  ;;  %2875 = vmatprep.mubr.msk.bf16.mxu0 %vm326_vm14, %v1335_v49  ;;  %v1014_v49 = vpop.xlane.xlu0 %1013 }
 0x5a3   :  { %v2751_v19 = vpop.f32.mrb[11].mxu0  ;;  %v1016_v57 = vpop.xlane.xlu1 %1015 }
 0x5a4   :  { %v2752_v38 = vadd.f32 %v2751_v19, %v2750_v52  ;;  %v1321_v51 = vmul.f32 %v2749_v18, %v1128_v24  ;;  %v1069_v19 = vmax.f32 %v1014_v49, 1e-20  ;;  %v1070_v26 = vmax.f32 %v1016_v57, 1e-20 }
 0x5a6   :  { %v1322_v9 = vmul.f32 %v2752_v38, %v1129_v30  ;;  %v1046_v46 = vpop.xlane.xlu0 %1045 }
 0x5a7   :  { %v1048_v55 = vpop.xlane.xlu1 %1047  ;;  %v1101_v47 = vmax.f32 %v1046_v46, 1e-20 }
 0x5a8   :  { %v1336_v41 = vpack.c.bf16 %v1322_v9, %v1321_v51  ;;  %v2753_v48 = vpop.f32.mrb[12].mxu0  ;;  %v1102_v29 = vmax.f32 %v1048_v55, 1e-20 }
 0x5a9   :  { %v2754_v60 = vpop.f32.mrb[13].mxu0  ;;  %3129 = vrcp.f32 %v1101_v47 }
 0x5aa   :  { %v2755_v12 = vadd.f32 %v2754_v60, %v2753_v48  ;;  %v2756_v44 = vpop.f32.mrb[14].mxu0  ;;  %2876 = vmatmul.mubr.msk.bf16.vlgmr.msra.gmra.mrb[36].mxu0 %vm326_vm14, %v1336_v41  ;;  %v1018_v28 = vpop.xlane.xlu0 %1017  ;;  %3131 = vrcp.f32 %v1102_v29 }
 0x5ab   :  { %v2757_v20 = vpop.f32.mrb[15].mxu0  ;;  %v1020_v62 = vpop.xlane.xlu1 %1019  ;;  %3133 = vrcp.f32 %v1069_v19  ;;  %v1071_v53 = vmax.f32 %v1018_v28, 1e-20 }
 0x5ac   :  { %v2758_v22 = vadd.f32 %v2757_v20, %v2756_v44  ;;  %v1323_v8 = vmul.f32 %v2755_v12, %v1130_v17  ;;  %3135 = vrcp.f32 %v1070_v26  ;;  %v1072_v9 = vmax.f32 %v1020_v62, 1e-20 }
 0x5ae   :  { %v1324_v16 = vmul.f32 %v2758_v22, %v1131_v56  ;;  %v1050_v18 = vpop.xlane.xlu0 %1049 }
 0x5af   :  { %v1052_v52 = vpop.xlane.xlu1 %1051  ;;  %v1103_v32 = vmax.f32 %v1050_v18, 1e-20 }
 0x5b0   :  { %v1337_v6 = vpack.c.bf16 %v1324_v16, %v1323_v8  ;;  %v2759_v0 = vpop.f32.mrb[16].mxu0  ;;  %v1104_v24 = vmax.f32 %v1052_v52, 1e-20 }
 0x5b1   :  { %v2760_v15 = vpop.f32.mrb[17].mxu0  ;;  %3137 = vrcp.f32 %v1103_v32 }
 0x5b2   :  { %v2761_v14 = vadd.f32 %v2760_v15, %v2759_v0  ;;  %v2762_v50 = vpop.f32.mrb[18].mxu0  ;;  %2879 = vmatprep.mubr.msk.bf16.mxu0 %vm326_vm14, %v1337_v6  ;;  %v1022_v54 = vpop.xlane.xlu0 %1021  ;;  %3139 = vrcp.f32 %v1104_v24 }
 0x5b3   :  { %v2763_v13 = vpop.f32.mrb[19].mxu0  ;;  %v1024_v38 = vpop.xlane.xlu1 %1023  ;;  %3141 = vrcp.f32 %v1071_v53  ;;  %v1073_v16 = vmax.f32 %v1022_v54, 1e-20 }
 0x5b4   :  { %v2764_v25 = vadd.f32 %v2763_v13, %v2762_v50  ;;  %v1325_v11 = vmul.f32 %v2761_v14, %v1132_v35  ;;  %v3130_v48 = vpop.eup %3129  ;;  %3143 = vrcp.f32 %v1072_v9  ;;  %v1074_v3 = vmax.f32 %v1024_v38, 1e-20 }
 0x5b5   :  { %v3132_v60 = vpop.eup %3131 }
 0x5b6   :  { %v1326_v4 = vmul.f32 %v2764_v25, %v1133_v45  ;;  %v1054_v30 = vpop.xlane.xlu0 %1053  ;;  %v3134_v63 = vpop.eup %3133 }
 0x5b7   :  { %v1056_v51 = vpop.xlane.xlu1 %1055  ;;  %v1105_v20 = vmax.f32 %v1054_v30, 1e-20  ;;  %v3136_v17 = vpop.eup %3135  ;;  %v1134_v6 = vsel %vm1125_vm2, %v3134_v63, %v3130_v48 }
 0x5b8   :  { %v1338_v59 = vpack.c.bf16 %v1326_v4, %v1325_v11  ;;  %v1106_v56 = vmax.f32 %v1056_v51, 1e-20  ;;  %v1135_v0 = vsel %vm1125_vm2, %v3136_v17, %v3132_v60 }
 0x5b9   :  { %3145 = vrcp.f32 %v1105_v20 }
 0x5ba   :  { %2880 = vmatmul.mubr.msk.bf16.gmra.mrb[40].mxu0 %vm326_vm14, %v1338_v59  ;;  %v1026_v61 = vpop.xlane.xlu0 %1025  ;;  %3147 = vrcp.f32 %v1106_v56 }
 0x5bb   :  { %v1028_v21 = vpop.xlane.xlu1 %1027  ;;  %v3138_v13 = vpop.eup %3137  ;;  %3149 = vrcp.f32 %v1073_v16  ;;  %v1075_v28 = vmax.f32 %v1026_v61, 1e-20 }
 0x5bc   :  { %v3140_v35 = vpop.eup %3139  ;;  %3151 = vrcp.f32 %v1074_v3  ;;  %v1076_v52 = vmax.f32 %v1028_v21, 1e-20 }
 0x5bd   :  { %v3142_v4 = vpop.eup %3141 }
 0x5be   :  { %v1058_v14 = vpop.xlane.xlu0 %1057  ;;  %v3144_v57 = vpop.eup %3143  ;;  %v1136_v62 = vsel %vm1125_vm2, %v3142_v4, %v3138_v13 }
 0x5bf   :  { %v1060_v23 = vpop.xlane.xlu1 %1059  ;;  %v1107_v59 = vmax.f32 %v1058_v14, 1e-20  ;;  %v1137_v18 = vsel %vm1125_vm2, %v3144_v57, %v3140_v35 }
 0x5c0   :  { %v1108_v46 = vmax.f32 %v1060_v23, 1e-20 }
 0x5c1   :  { %3153 = vrcp.f32 %v1107_v59 }
 0x5c2   :  { %3155 = vrcp.f32 %v1108_v46 }
 0x5c3   :  { %v3146_v54 = vpop.eup %3145  ;;  %3157 = vrcp.f32 %v1075_v28 }
 0x5c4   :  { %v3148_v32 = vpop.eup %3147  ;;  %3159 = vrcp.f32 %v1076_v52 }
 0x5c5   :  { %v3150_v53 = vpop.eup %3149 }
 0x5c6   :  { %v3152_v9 = vpop.eup %3151  ;;  %v1138_v48 = vsel %vm1125_vm2, %v3150_v53, %v3146_v54 }
 0x5cb   :  { %v3154_v63 = vpop.eup %3153 }
 0x5cc   :  { %v3156_v21 = vpop.eup %3155 }
 0x5cd   :  { %v3158_v56 = vpop.eup %3157 }
 0x5ce   :  { %v3160_v16 = vpop.eup %3159 }
 0x5cf   :  { %v1141_v3 = vsel %vm1125_vm2, %v3160_v16, %v3156_v21 }
 0x5db   :  { %v2765_v41 = vpop.f32.mrb[20].mxu0 }
 0x5dc   :  { %v2766_v5 = vpop.f32.mrb[21].mxu0 }
 0x5dd   :  { %v2767_v12 = vadd.f32 %v2766_v5, %v2765_v41  ;;  %v2768_v44 = vpop.f32.mrb[22].mxu0  ;;  %v1139_v5 = vsel %vm1125_vm2, %v3152_v9, %v3148_v32 }
 0x5de   :  { %v2769_v22 = vpop.f32.mrb[23].mxu0 }
 0x5df   :  { %v2770_v8 = vadd.f32 %v2769_v22, %v2768_v44  ;;  %v1327_v15 = vmul.f32 %v2767_v12, %v1134_v6 }
 0x5e1   :  { %v1328_v10 = vmul.f32 %v2770_v8, %v1135_v0  ;;  %v1140_v0 = vsel %vm1125_vm2, %v3158_v56, %v3154_v63 }
 0x5e3   :  { %v1339_v50 = vpack.c.bf16 %v1328_v10, %v1327_v15  ;;  %v2771_v7 = vpop.f32.mrb[24].mxu0 }
 0x5e4   :  { %v2772_v25 = vpop.f32.mrb[25].mxu0 }
 0x5e5   :  { %v2773_v45 = vadd.f32 %v2772_v25, %v2771_v7  ;;  %v2774_v11 = vpop.f32.mrb[26].mxu0  ;;  %2883 = vmatprep.mubr.msk.bf16.mxu0 %vm326_vm14, %v1339_v50  ;;  %v1345_v50 = vsub.s32 1, %v3402_v1 }
 0x5e6   :  { %v2775_v49 = vpop.f32.mrb[27].mxu0 }
 0x5e7   :  { %v2776_v55 = vadd.f32 %v2775_v49, %v2774_v11  ;;  %v1329_v47 = vmul.f32 %v2773_v45, %v1136_v62  ;;  %v4053_v7 = vrot.slane %v3501_v58, %v1345_v50 }
 0x5e9   :  { %v1330_v29 = vmul.f32 %v2776_v55, %v1137_v18 }
 0x5eb   :  { %v1340_v19 = vpack.c.bf16 %v1330_v29, %v1329_v47  ;;  %v2777_v26 = vpop.f32.mrb[28].mxu0 }
 0x5ec   :  { %v2778_v38 = vpop.f32.mrb[29].mxu0 }
 0x5ed   :  { %v2779_v24 = vadd.f32 %v2778_v38, %v2777_v26  ;;  %v2780_v30 = vpop.f32.mrb[30].mxu0  ;;  %2884 = vmatmul.mubr.msk.bf16.gmra.mrb[44].mxu0 %vm326_vm14, %v1340_v19 }
 0x5ee   :  { %v2781_v51 = vpop.f32.mrb[31].mxu0 }
 0x5ef   :  { %v2782_v41 = vadd.f32 %v2781_v51, %v2780_v30  ;;  %v1331_v60 = vmul.f32 %v2779_v24, %v1138_v48 }
 0x5f1   :  { %v1332_v61 = vmul.f32 %v2782_v41, %v1139_v5  ;;  %v4783_v5 = vld [vmem:[#allocation11_spill] sm:$0xff] }
 0x5f3   :  { %v1341_v12 = vpack.c.bf16 %v1332_v61, %v1331_v60  ;;  %v2783_v44 = vpop.f32.mrb[32].mxu0 }
 0x5f4   :  { %v2784_v20 = vpop.f32.mrb[33].mxu0 }
 0x5f5   :  { %v2785_v22 = vadd.f32 %v2784_v20, %v2783_v44  ;;  %v2786_v17 = vpop.f32.mrb[34].mxu0  ;;  %2887 = vmatprep.mubr.msk.bf16.mxu0 %vm326_vm14, %v1341_v12  ;;  %v4784_v44 = vld [vmem:[#allocation13_spill] sm:$0xff]  ;;  %v4785_v20 = vld [vmem:[#allocation12_spill] sm:$0xff] }
 0x5f6   :  { %v2787_v8 = vpop.f32.mrb[35].mxu0 }
 0x5f7   :  { %v2788_v6 = vadd.f32 %v2787_v8, %v2786_v17  ;;  %v1333_v15 = vmul.f32 %v2785_v22, %v1140_v0  ;;  %v4786_v17 = vld [vmem:[#allocation14_spill] sm:$0xff] }
 0x5f9   :  { %v1334_v10 = vmul.f32 %v2788_v6, %v1141_v3 }
 0x5fb   :  { %v1342_v14 = vpack.c.bf16 %v1334_v10, %v1333_v15 }
 0x5fd   :  { %2888 = vmatmul.mubr.msk.bf16.gmra.mrb[48].mxu0 %vm326_vm14, %v1342_v14 }
 0x67d   :  { %v2877_v13 = vpop.f32.mrb[36].mxu0 }
 0x67e   :  { %v1417_v23 = vpop.f32.mrb[37].mxu0  ;;  %v1426_v25 = vadd.f32 %v2877_v13, %v4053_v7  ;;  %v4787_v13 = vld [vmem:[#allocation15_spill] sm:$0xff] }
 0x67f   :  { %v1418_v35 = vadd.f32 %v1417_v23, %v4053_v7  ;;  %v2878_v45 = vpop.f32.mrb[38].mxu0 }
 0x680   :  { %v1420_v11 = vpop.f32.mrb[39].mxu0  ;;  %v1429_v4 = vadd.f32 %v2878_v45, %v4053_v7  ;;  %v4068_v55 = vadd.f32 %v1426_v25, %v3452_v36  ;;  %v4788_v45 = vld [vmem:[#allocation17_spill] sm:$0xff] }
 0x681   :  { %v1421_v59 = vadd.f32 %v1420_v11, %v4053_v7  ;;  %v4060_v49 = vadd.f32 %v1418_v35, %v3445_v33 }
 0x682   :  { %v4071_v28 = vadd.f32 %v1429_v4, %v3454_v37  ;;  %v1502_v33 = vsel %vm326_vm14, %v4068_v55, 0.0  ;;  %v4789_v4 = vld [vmem:[#allocation16_spill] sm:$0xff] }
 0x683   :  { %v4063_v57 = vadd.f32 %v1421_v59, %v3447_v34  ;;  %v1496_v46 = vsel %vm326_vm14, %v4060_v49, 0.0 }
 0x684   :  { %1497 = vadd.xlane.f32.xlu0 %v1496_v46  ;;  %v1505_v34 = vsel %vm326_vm14, %v4071_v28, 0.0 }
 0x685   :  { %v1499_v62 = vsel %vm326_vm14, %v4063_v57, 0.0 }
 0x686   :  { %1500 = vadd.xlane.f32.xlu1 %v1499_v62  ;;  %v4790_v62 = vld [vmem:[#allocation18_spill] sm:$0xff] }
 0x688   :  { %1503 = vadd.xlane.f32.xlu0 %v1502_v33 }
 0x68a   :  { %1506 = vadd.xlane.f32.xlu1 %v1505_v34 }
 0x68d   :  { %v2881_v18 = vpop.f32.mrb[40].mxu0 }
 0x68e   :  { %v1433_v52 = vpop.f32.mrb[41].mxu0  ;;  %v1442_v36 = vadd.f32 %v2881_v18, %v4053_v7 }
 0x68f   :  { %v1434_v47 = vadd.f32 %v1433_v52, %v4053_v7  ;;  %v2882_v37 = vpop.f32.mrb[42].mxu0 }
 0x690   :  { %v1436_v29 = vpop.f32.mrb[43].mxu0  ;;  %v1445_v19 = vadd.f32 %v2882_v37, %v4053_v7  ;;  %v4087_v38 = vadd.f32 %v1442_v36, %v3466_v42 }
 0x691   :  { %v1437_v26 = vadd.f32 %v1436_v29, %v4053_v7  ;;  %v4084_v54 = vadd.f32 %v1434_v47, %v3459_v39 }
 0x692   :  { %v4095_v30 = vadd.f32 %v1445_v19, %v3468_v43  ;;  %v1514_v39 = vsel %vm326_vm14, %v4087_v38, 0.0 }
 0x693   :  { %v4090_v32 = vadd.f32 %v1437_v26, %v3461_v40  ;;  %v1508_v24 = vsel %vm326_vm14, %v4084_v54, 0.0 }
 0x694   :  { %1509 = vadd.xlane.f32.xlu0 %v1508_v24  ;;  %v1517_v42 = vsel %vm326_vm14, %v4095_v30, 0.0 }
 0x695   :  { %v1511_v53 = vsel %vm326_vm14, %v4090_v32, 0.0 }
 0x696   :  { %1512 = vadd.xlane.f32.xlu1 %v1511_v53 }
 0x698   :  { %1515 = vadd.xlane.f32.xlu0 %v1514_v39 }
 0x69a   :  { %1518 = vadd.xlane.f32.xlu1 %v1517_v42 }
 0x6c0   :  { %v2885_v40 = vpop.f32.mrb[44].mxu0 }
 0x6c1   :  { %v1449_v51 = vpop.f32.mrb[45].mxu0  ;;  %v1458_v9 = vadd.f32 %v2885_v40, %v4053_v7 }
 0x6c2   :  { %v1450_v41 = vadd.f32 %v1449_v51, %v4053_v7  ;;  %v2886_v43 = vpop.f32.mrb[46].mxu0 }
 0x6c3   :  { %v1452_v48 = vpop.f32.mrb[47].mxu0  ;;  %v1461_v61 = vadd.f32 %v2886_v43, %v4053_v7  ;;  %v4111_v63 = vadd.f32 %v1458_v9, %v4784_v44 }
 0x6c4   :  { %v4106_v60 = vadd.f32 %v1450_v41, %v4783_v5  ;;  %v1453_v12 = vadd.f32 %v1452_v48, %v4053_v7 }
 0x6c5   :  { %v4119_v56 = vadd.f32 %v1461_v61, %v4786_v17  ;;  %v1526_v16 = vsel %vm326_vm14, %v4111_v63, 0.0 }
 0x6c6   :  { %v4114_v21 = vadd.f32 %v1453_v12, %v4785_v20  ;;  %v1520_v22 = vsel %vm326_vm14, %v4106_v60, 0.0 }
 0x6c7   :  { %1521 = vadd.xlane.f32.xlu0 %v1520_v22  ;;  %v1529_v6 = vsel %vm326_vm14, %v4119_v56, 0.0 }
 0x6c8   :  { %v1523_v8 = vsel %vm326_vm14, %v4114_v21, 0.0 }
 0x6c9   :  { %1524 = vadd.xlane.f32.xlu1 %v1523_v8 }
 0x6cb   :  { %1527 = vadd.xlane.f32.xlu0 %v1526_v16 }
 0x6cd   :  { %1530 = vadd.xlane.f32.xlu1 %v1529_v6 }
 0x6d0   :  { %v2889_v0 = vpop.f32.mrb[48].mxu0 }
 0x6d1   :  { %v1465_v3 = vpop.f32.mrb[49].mxu0  ;;  %v1474_v15 = vadd.f32 %v2889_v0, %v4053_v7 }
 0x6d2   :  { %v1466_v10 = vadd.f32 %v1465_v3, %v4053_v7  ;;  %v2890_v14 = vpop.f32.mrb[50].mxu0 }
 0x6d3   :  { %v1468_v50 = vpop.f32.mrb[51].mxu0  ;;  %v1477_v25 = vadd.f32 %v2890_v14, %v4053_v7  ;;  %v4135_v11 = vadd.f32 %v1474_v15, %v4788_v45 }
 0x6d4   :  { %v4130_v23 = vadd.f32 %v1466_v10, %v4787_v13  ;;  %v1469_v35 = vadd.f32 %v1468_v50, %v4053_v7  ;;  %v3027_v13 = vld [vmem:[#allocation5 + $0x40] sm:$0xff]  }
 0x6d5   :  { %v4143_v33 = vadd.f32 %v1477_v25, %v4790_v62  ;;  %v1538_v7 = vsel %vm326_vm14, %v4135_v11, 0.0  ;;  %2891 = vmatprep.subr.bf16.mxu1 %v3027_v13 }
 0x6d6   :  { %v4138_v59 = vadd.f32 %v1469_v35, %v4789_v4  ;;  %v1532_v46 = vsel %vm326_vm14, %v4130_v23, 0.0  ;;  %2892 = vmatpush3.bf16.msra.mxu1 %v3027_v13 }
 0x6d7   :  { %1533 = vadd.xlane.f32.xlu0 %v1532_v46  ;;  %v1541_v18 = vsel %vm326_vm14, %v4143_v33, 0.0 }
 0x6d8   :  { %v1535_v34 = vsel %vm326_vm14, %v4138_v59, 0.0 }
 0x6d9   :  { %1536 = vadd.xlane.f32.xlu1 %v1535_v34 }
 0x6db   :  { %1539 = vadd.xlane.f32.xlu0 %v1538_v7 }
 0x6dd   :  { %1542 = vadd.xlane.f32.xlu1 %v1541_v18 }
 0x711   :  { %v1498_v52 = vpop.xlane.xlu0 %1497 }
 0x712   :  { %v1545_v36 = vmul.f32 0.03125, %v1498_v52 }
 0x713   :  { %v1501_v47 = vpop.xlane.xlu1 %1500 }
 0x714   :  { %v4152_v37 = vsub.f32 %v4060_v49, %v1545_v36  ;;  %v1546_v29 = vmul.f32 0.03125, %v1501_v47 }
 0x715   :  { %v1504_v19 = vpop.xlane.xlu0 %1503 }
 0x716   :  { %v4155_v26 = vsub.f32 %v4063_v57, %v1546_v29  ;;  %v1547_v24 = vmul.f32 0.03125, %v1504_v19  ;;  %v1577_v53 = vmul.f32 %v4152_v37, %v4152_v37 }
 0x717   :  { %v1507_v39 = vpop.xlane.xlu1 %1506 }
 0x718   :  { %v4160_v42 = vsub.f32 %v4068_v55, %v1547_v24  ;;  %v1548_v40 = vmul.f32 0.03125, %v1507_v39  ;;  %v1593_v51 = vsel %vm326_vm14, %v1577_v53, 0.0  ;;  %v1578_v49 = vmul.f32 %v4155_v26, %v4155_v26 }
 0x719   :  { %1594 = vadd.xlane.f32.xlu0 %v1593_v51 }
 0x71a   :  { %v4166_v9 = vsub.f32 %v4071_v28, %v1548_v40  ;;  %v1596_v57 = vsel %vm326_vm14, %v1578_v49, 0.0  ;;  %v1579_v41 = vmul.f32 %v4160_v42, %v4160_v42 }
 0x71b   :  { %1597 = vadd.xlane.f32.xlu1 %v1596_v57 }
 0x71c   :  { %v1599_v43 = vsel %vm326_vm14, %v1579_v41, 0.0  ;;  %v1580_v55 = vmul.f32 %v4166_v9, %v4166_v9 }
 0x71d   :  { %1600 = vadd.xlane.f32.xlu0 %v1599_v43 }
 0x71e   :  { %v1602_v48 = vsel %vm326_vm14, %v1580_v55, 0.0 }
 0x71f   :  { %1603 = vadd.xlane.f32.xlu1 %v1602_v48 }
 0x721   :  { %v1510_v5 = vpop.xlane.xlu0 %1509 }
 0x722   :  { %v1549_v61 = vmul.f32 0.03125, %v1510_v5 }
 0x723   :  { %v1513_v12 = vpop.xlane.xlu1 %1512 }
 0x724   :  { %v4176_v28 = vsub.f32 %v4084_v54, %v1549_v61  ;;  %v1550_v44 = vmul.f32 0.03125, %v1513_v12 }
 0x725   :  { %v1516_v20 = vpop.xlane.xlu0 %1515 }
 0x726   :  { %v4179_v22 = vsub.f32 %v4090_v32, %v1550_v44  ;;  %v1551_v17 = vmul.f32 0.03125, %v1516_v20  ;;  %v1581_v8 = vmul.f32 %v4176_v28, %v4176_v28 }
 0x727   :  { %v1519_v16 = vpop.xlane.xlu1 %1518 }
 0x728   :  { %v4184_v6 = vsub.f32 %v4087_v38, %v1551_v17  ;;  %v1552_v0 = vmul.f32 0.03125, %v1519_v16  ;;  %v1605_v3 = vsel %vm326_vm14, %v1581_v8, 0.0  ;;  %v1582_v54 = vmul.f32 %v4179_v22, %v4179_v22 }
 0x729   :  { %1606 = vadd.xlane.f32.xlu0 %v1605_v3 }
 0x72a   :  { %v4190_v15 = vsub.f32 %v4095_v30, %v1552_v0  ;;  %v1608_v32 = vsel %vm326_vm14, %v1582_v54, 0.0  ;;  %v1583_v10 = vmul.f32 %v4184_v6, %v4184_v6  ;;  %v3028_v30 = vld [vmem:[#allocation5 + $0x48] sm:$0xff]  }
 0x72b   :  { %1609 = vadd.xlane.f32.xlu1 %v1608_v32  ;;  %2893 = vmatprep.subr.bf16.mxu1 %v3028_v30 }
 0x72c   :  { %v1611_v14 = vsel %vm326_vm14, %v1583_v10, 0.0  ;;  %v1584_v38 = vmul.f32 %v4190_v15, %v4190_v15  ;;  %2894 = vmatpush3.bf16.msra.mxu1 %v3028_v30 }
 0x72d   :  { %1612 = vadd.xlane.f32.xlu0 %v1611_v14 }
 0x72e   :  { %v1614_v50 = vsel %vm326_vm14, %v1584_v38, 0.0 }
 0x72f   :  { %1615 = vadd.xlane.f32.xlu1 %v1614_v50 }
 0x754   :  { %v1522_v25 = vpop.xlane.xlu0 %1521 }
 0x755   :  { %v1553_v35 = vmul.f32 0.03125, %v1522_v25 }
 0x756   :  { %v1525_v45 = vpop.xlane.xlu1 %1524 }
 0x757   :  { %v4200_v4 = vsub.f32 %v4106_v60, %v1553_v35  ;;  %v1554_v46 = vmul.f32 0.03125, %v1525_v45  ;;  %v1707_v35 = vsub.s32 4, %v3402_v1 }
 0x758   :  { %v1528_v62 = vpop.xlane.xlu0 %1527 }
 0x759   :  { %v4203_v34 = vsub.f32 %v4114_v21, %v1554_v46  ;;  %v1555_v7 = vmul.f32 0.03125, %v1528_v62  ;;  %v1585_v18 = vmul.f32 %v4200_v4, %v4200_v4  ;;  %v4249_v45 = vrot.slane %v3501_v58, %v1707_v35 }
 0x75a   :  { %v1531_v52 = vpop.xlane.xlu1 %1530  ;;  %v1727_v46 = vsub.s32 5, %v3402_v1 }
 0x75b   :  { %v4208_v36 = vsub.f32 %v4111_v63, %v1555_v7  ;;  %v1556_v47 = vmul.f32 0.03125, %v1531_v52  ;;  %v1617_v29 = vsel %vm326_vm14, %v1585_v18, 0.0  ;;  %v1586_v60 = vmul.f32 %v4203_v34, %v4203_v34 }
 0x75c   :  { %1618 = vadd.xlane.f32.xlu0 %v1617_v29 }
 0x75d   :  { %v4214_v19 = vsub.f32 %v4119_v56, %v1556_v47  ;;  %v1620_v21 = vsel %vm326_vm14, %v1586_v60, 0.0  ;;  %v1587_v24 = vmul.f32 %v4208_v36, %v4208_v36  ;;  %v4255_v60 = vrot.slane %v3501_v58, %v1727_v46 }
 0x75e   :  { %1621 = vadd.xlane.f32.xlu1 %v1620_v21 }
 0x75f   :  { %v1623_v53 = vsel %vm326_vm14, %v1587_v24, 0.0  ;;  %v1588_v63 = vmul.f32 %v4214_v19, %v4214_v19 }
 0x760   :  { %1624 = vadd.xlane.f32.xlu0 %v1623_v53 }
 0x761   :  { %v1626_v39 = vsel %vm326_vm14, %v1588_v63, 0.0 }
 0x762   :  { %1627 = vadd.xlane.f32.xlu1 %v1626_v39 }
 0x764   :  { %v1534_v40 = vpop.xlane.xlu0 %1533 }
 0x765   :  { %v1557_v51 = vmul.f32 0.03125, %v1534_v40 }
 0x766   :  { %v1537_v49 = vpop.xlane.xlu1 %1536 }
 0x767   :  { %v4224_v56 = vsub.f32 %v4130_v23, %v1557_v51  ;;  %v1558_v57 = vmul.f32 0.03125, %v1537_v49 }
 0x768   :  { %v1540_v41 = vpop.xlane.xlu0 %1539 }
 0x769   :  { %v4227_v43 = vsub.f32 %v4138_v59, %v1558_v57  ;;  %v1559_v55 = vmul.f32 0.03125, %v1540_v41  ;;  %v1589_v48 = vmul.f32 %v4224_v56, %v4224_v56 }
 0x76a   :  { %v1543_v5 = vpop.xlane.xlu1 %1542 }
 0x76b   :  { %v4232_v61 = vsub.f32 %v4135_v11, %v1559_v55  ;;  %v1560_v12 = vmul.f32 0.03125, %v1543_v5  ;;  %v1629_v44 = vsel %vm326_vm14, %v1589_v48, 0.0  ;;  %v1590_v23 = vmul.f32 %v4227_v43, %v4227_v43 }
 0x76c   :  { %1630 = vadd.xlane.f32.xlu0 %v1629_v44 }
 0x76d   :  { %v4238_v20 = vsub.f32 %v4143_v33, %v1560_v12  ;;  %v1632_v59 = vsel %vm326_vm14, %v1590_v23, 0.0  ;;  %v1591_v17 = vmul.f32 %v4232_v61, %v4232_v61 }
 0x76e   :  { %1633 = vadd.xlane.f32.xlu1 %v1632_v59 }
 0x76f   :  { %v1635_v8 = vsel %vm326_vm14, %v1591_v17, 0.0  ;;  %v1592_v11 = vmul.f32 %v4238_v20, %v4238_v20 }
 0x770   :  { %1636 = vadd.xlane.f32.xlu0 %v1635_v8 }
 0x771   :  { %v1638_v16 = vsel %vm326_vm14, %v1592_v11, 0.0 }
 0x772   :  { %1639 = vadd.xlane.f32.xlu1 %v1638_v16 }
 0x7a6   :  { %v1595_v0 = vpop.xlane.xlu0 %1594 }
 0x7a7   :  { %v1641_v3 = vmul.f32 0.03125, %v1595_v0 }
 0x7a8   :  { %v1598_v54 = vpop.xlane.xlu1 %1597 }
 0x7a9   :  { %v1657_v33 = vadd.f32 1e-05, %v1641_v3  ;;  %v1642_v32 = vmul.f32 0.03125, %v1598_v54 }
 0x7aa   :  { %v1601_v10 = vpop.xlane.xlu0 %1600 }
 0x7ab   :  { %3161 = vrsqrt.f32 %v1657_v33  ;;  %v1658_v14 = vadd.f32 1e-05, %v1642_v32  ;;  %v1643_v38 = vmul.f32 0.03125, %v1601_v10 }
 0x7ac   :  { %v1604_v50 = vpop.xlane.xlu1 %1603 }
 0x7ad   :  { %3163 = vrsqrt.f32 %v1658_v14  ;;  %v1659_v13 = vadd.f32 1e-05, %v1643_v38  ;;  %v1644_v30 = vmul.f32 0.03125, %v1604_v50 }
 0x7af   :  { %3165 = vrsqrt.f32 %v1659_v13  ;;  %v1660_v25 = vadd.f32 1e-05, %v1644_v30 }
 0x7b1   :  { %3167 = vrsqrt.f32 %v1660_v25 }
 0x7b5   :  { %v3162_v62 = vpop.eup %3161 }
 0x7b6   :  { %v1689_v7 = vmul.f32 %v3162_v62, %v4152_v37  ;;  %v1607_v18 = vpop.xlane.xlu0 %1606 }
 0x7b7   :  { %v3164_v52 = vpop.eup %3163  ;;  %v1645_v47 = vmul.f32 0.03125, %v1607_v18 }
 0x7b8   :  { %v1690_v29 = vmul.f32 %v3164_v52, %v4155_v26  ;;  %v1610_v21 = vpop.xlane.xlu1 %1609  ;;  %v1709_v24 = vmul.f32 %v4249_v45, %v1689_v7 }
 0x7b9   :  { %v3166_v53 = vpop.eup %3165  ;;  %v1661_v63 = vadd.f32 1e-05, %v1645_v47  ;;  %v1646_v39 = vmul.f32 0.03125, %v1610_v21 }
 0x7ba   :  { %v1691_v40 = vmul.f32 %v3166_v53, %v4160_v42  ;;  %v1613_v51 = vpop.xlane.xlu0 %1612  ;;  %v1710_v49 = vmul.f32 %v4249_v45, %v1690_v29  ;;  %v4263_v5 = vadd.f32 %v4255_v60, %v1709_v24 }
 0x7bb   :  { %v3168_v37 = vpop.eup %3167  ;;  %3169 = vrsqrt.f32 %v1661_v63  ;;  %v1662_v57 = vadd.f32 1e-05, %v1646_v39  ;;  %v1647_v41 = vmul.f32 0.03125, %v1613_v51 }
 0x7bc   :  { %v1711_v26 = vmul.f32 %v4249_v45, %v1691_v40  ;;  %v1692_v55 = vmul.f32 %v3168_v37, %v4166_v9  ;;  %v1616_v48 = vpop.xlane.xlu1 %1615  ;;  %v4266_v12 = vadd.f32 %v4255_v60, %v1710_v49 }
 0x7bd   :  { %3171 = vrsqrt.f32 %v1662_v57  ;;  %v1663_v42 = vadd.f32 1e-05, %v1647_v41  ;;  %v1648_v44 = vmul.f32 0.03125, %v1616_v48 }
 0x7be   :  { %v1712_v23 = vmul.f32 %v4249_v45, %v1692_v55  ;;  %v1745_v59 = vpack.c.bf16 %v4266_v12, %v4263_v5  ;;  %v4272_v8 = vadd.f32 %v4255_v60, %v1711_v26 }
 0x7bf   :  { %3173 = vrsqrt.f32 %v1663_v42  ;;  %v1664_v17 = vadd.f32 1e-05, %v1648_v44 }
 0x7c0   :  { %v4275_v9 = vadd.f32 %v4255_v60, %v1712_v23  ;;  %2895 = vmatprep.mubr.msk.bf16.mxu1 %vm326_vm14, %v1745_v59 }
 0x7c1   :  { %3175 = vrsqrt.f32 %v1664_v17 }
 0x7c2   :  { %v1746_v11 = vpack.c.bf16 %v4275_v9, %v4272_v8 }
 0x7c4   :  { %2896 = vmatmul.mubr.msk.bf16.vlgmr.msra.gmra.mrb[48].mxu1 %vm326_vm14, %v1746_v11 }
 0x7c5   :  { %v3170_v16 = vpop.eup %3169 }
 0x7c6   :  { %v1693_v0 = vmul.f32 %v3170_v16, %v4176_v28 }
 0x7c7   :  { %v3172_v3 = vpop.eup %3171 }
 0x7c8   :  { %v1694_v54 = vmul.f32 %v3172_v3, %v4179_v22  ;;  %v1713_v33 = vmul.f32 %v4249_v45, %v1693_v0 }
 0x7c9   :  { %v3174_v32 = vpop.eup %3173 }
 0x7ca   :  { %v1695_v10 = vmul.f32 %v3174_v32, %v4184_v6  ;;  %v1714_v14 = vmul.f32 %v4249_v45, %v1694_v54  ;;  %v4288_v13 = vadd.f32 %v4255_v60, %v1713_v33 }
 0x7cb   :  { %v3176_v38 = vpop.eup %3175 }
 0x7cc   :  { %v1696_v50 = vmul.f32 %v3176_v38, %v4190_v15  ;;  %v4291_v30 = vadd.f32 %v4255_v60, %v1714_v14  ;;  %v1715_v28 = vmul.f32 %v4249_v45, %v1695_v10 }
 0x7ce   :  { %v1747_v22 = vpack.c.bf16 %v4291_v30, %v4288_v13  ;;  %v1716_v25 = vmul.f32 %v4249_v45, %v1696_v50  ;;  %v4299_v6 = vadd.f32 %v4255_v60, %v1715_v28 }
 0x7d0   :  { %2899 = vmatprep.mubr.msk.bf16.mxu1 %vm326_vm14, %v1747_v22  ;;  %v4302_v15 = vadd.f32 %v4255_v60, %v1716_v25 }
 0x7d2   :  { %v1748_v35 = vpack.c.bf16 %v4302_v15, %v4299_v6 }
 0x7d4   :  { %2900 = vmatmul.mubr.msk.bf16.gmra.mrb[52].mxu1 %vm326_vm14, %v1748_v35 }
 0x7e9   :  { %v1619_v46 = vpop.xlane.xlu0 %1618 }
 0x7ea   :  { %v1649_v62 = vmul.f32 0.03125, %v1619_v46 }
 0x7eb   :  { %v1622_v7 = vpop.xlane.xlu1 %1621 }
 0x7ec   :  { %v1665_v18 = vadd.f32 1e-05, %v1649_v62  ;;  %v1650_v52 = vmul.f32 0.03125, %v1622_v7 }
 0x7ed   :  { %v1625_v47 = vpop.xlane.xlu0 %1624 }
 0x7ee   :  { %3177 = vrsqrt.f32 %v1665_v18  ;;  %v1666_v29 = vadd.f32 1e-05, %v1650_v52  ;;  %v1651_v21 = vmul.f32 0.03125, %v1625_v47 }
 0x7ef   :  { %v1628_v24 = vpop.xlane.xlu1 %1627 }
 0x7f0   :  { %3179 = vrsqrt.f32 %v1666_v29  ;;  %v1667_v53 = vadd.f32 1e-05, %v1651_v21  ;;  %v1652_v63 = vmul.f32 0.03125, %v1628_v24 }
 0x7f2   :  { %3181 = vrsqrt.f32 %v1667_v53  ;;  %v1668_v39 = vadd.f32 1e-05, %v1652_v63 }
 0x7f4   :  { %3183 = vrsqrt.f32 %v1668_v39  ;;  %v3029_v39 = vld [vmem:[#allocation5 + $0x50] sm:$0xff]  }
 0x7f5   :  { %2911 = vmatprep.subr.bf16.mxu0 %v3029_v39 }
 0x7f6   :  { %2912 = vmatpush3.bf16.msra.mxu0 %v3029_v39 }
 0x7f8   :  { %v3178_v40 = vpop.eup %3177 }
 0x7f9   :  { %v1697_v51 = vmul.f32 %v3178_v40, %v4200_v4  ;;  %v1631_v49 = vpop.xlane.xlu0 %1630  ;;  %v3030_v40 = vld [vmem:[#allocation5 + $0x58] sm:$0xff]  }
 0x7fa   :  { %v3180_v37 = vpop.eup %3179  ;;  %v1653_v57 = vmul.f32 0.03125, %v1631_v49  ;;  %2913 = vmatprep.subr.bf16.mxu0 %v3030_v40 }
 0x7fb   :  { %v1698_v41 = vmul.f32 %v3180_v37, %v4203_v34  ;;  %v1634_v26 = vpop.xlane.xlu1 %1633  ;;  %v1717_v55 = vmul.f32 %v4249_v45, %v1697_v51  ;;  %2914 = vmatpush3.bf16.msra.mxu0 %v3030_v40  ;;  %v3032_v51 = vld [vmem:[#allocation5 + $0x68] sm:$0xff]  }
 0x7fc   :  { %v3182_v48 = vpop.eup %3181  ;;  %v1669_v42 = vadd.f32 1e-05, %v1653_v57  ;;  %v1654_v44 = vmul.f32 0.03125, %v1634_v26 }
 0x7fd   :  { %v1699_v23 = vmul.f32 %v3182_v48, %v4208_v36  ;;  %v1637_v59 = vpop.xlane.xlu0 %1636  ;;  %v1718_v17 = vmul.f32 %v4249_v45, %v1698_v41  ;;  %v4314_v34 = vadd.f32 %v4255_v60, %v1717_v55 }
 0x7fe   :  { %v3184_v11 = vpop.eup %3183  ;;  %3185 = vrsqrt.f32 %v1669_v42  ;;  %v1670_v16 = vadd.f32 1e-05, %v1654_v44  ;;  %v1655_v4 = vmul.f32 0.03125, %v1637_v59 }
 0x7ff   :  { %v1700_v0 = vmul.f32 %v3184_v11, %v4214_v19  ;;  %v1640_v3 = vpop.xlane.xlu1 %1639  ;;  %v4317_v54 = vadd.f32 %v4255_v60, %v1718_v17  ;;  %v1719_v33 = vmul.f32 %v4249_v45, %v1699_v23 }
 0x800   :  { %3187 = vrsqrt.f32 %v1670_v16  ;;  %v1671_v36 = vadd.f32 1e-05, %v1655_v4  ;;  %v1656_v32 = vmul.f32 0.03125, %v1640_v3 }
 0x801   :  { %v1749_v10 = vpack.c.bf16 %v4317_v54, %v4314_v34  ;;  %v1720_v14 = vmul.f32 %v4249_v45, %v1700_v0  ;;  %v4325_v19 = vadd.f32 %v4255_v60, %v1719_v33 }
 0x802   :  { %3189 = vrsqrt.f32 %v1671_v36  ;;  %v1672_v38 = vadd.f32 1e-05, %v1656_v32 }
 0x803   :  { %2903 = vmatprep.mubr.msk.bf16.mxu1 %vm326_vm14, %v1749_v10  ;;  %v4328_v50 = vadd.f32 %v4255_v60, %v1720_v14 }
 0x804   :  { %3191 = vrsqrt.f32 %v1672_v38 }
 0x805   :  { %v1750_v28 = vpack.c.bf16 %v4328_v50, %v4325_v19 }
 0x807   :  { %2904 = vmatmul.mubr.msk.bf16.gmra.mrb[56].mxu1 %vm326_vm14, %v1750_v28 }
 0x808   :  { %v3186_v22 = vpop.eup %3185 }
 0x809   :  { %v1701_v25 = vmul.f32 %v3186_v22, %v4224_v56 }
 0x80a   :  { %v3188_v35 = vpop.eup %3187 }
 0x80b   :  { %v1702_v46 = vmul.f32 %v3188_v35, %v4227_v43  ;;  %v1721_v62 = vmul.f32 %v4249_v45, %v1701_v25 }
 0x80c   :  { %v3190_v7 = vpop.eup %3189 }
 0x80d   :  { %v1703_v18 = vmul.f32 %v3190_v7, %v4232_v61  ;;  %v1722_v52 = vmul.f32 %v4249_v45, %v1702_v46  ;;  %v4340_v21 = vadd.f32 %v4255_v60, %v1721_v62 }
 0x80e   :  { %v3192_v47 = vpop.eup %3191 }
 0x80f   :  { %v1704_v29 = vmul.f32 %v3192_v47, %v4238_v20  ;;  %v4343_v24 = vadd.f32 %v4255_v60, %v1722_v52  ;;  %v1723_v56 = vmul.f32 %v4249_v45, %v1703_v18 }
 0x811   :  { %v1751_v43 = vpack.c.bf16 %v4343_v24, %v4340_v21  ;;  %v1724_v53 = vmul.f32 %v4249_v45, %v1704_v29  ;;  %v4351_v61 = vadd.f32 %v4255_v60, %v1723_v56  ;;  %v3031_v45 = vld [vmem:[#allocation5 + $0x60] sm:$0xff]  }
 0x812   :  { %2915 = vmatprep.subr.bf16.mxu0 %v3031_v45 }
 0x813   :  { %2907 = vmatprep.mubr.msk.bf16.mxu1 %vm326_vm14, %v1751_v43  ;;  %v4354_v20 = vadd.f32 %v4255_v60, %v1724_v53  ;;  %2916 = vmatpush3.bf16.msra.mxu0 %v3031_v45  ;;  %v1755_v60 = vsub.s32 2, %v3402_v1 }
 0x814   :  { %2917 = vmatprep.subr.bf16.mxu0 %v3032_v51 }
 0x815   :  { %v1752_v63 = vpack.c.bf16 %v4354_v20, %v4351_v61  ;;  %v4361_v49 = vrot.slane %v3501_v58, %v1755_v60 }
 0x817   :  { %2908 = vmatmul.mubr.msk.bf16.gmra.mrb[60].mxu1 %vm326_vm14, %v1752_v63  ;;  %2918 = vmatpush3.bf16.msra.mxu0 %v3032_v51 }
 0x897   :  { %v2897_v37 = vpop.f32.mrb[48].mxu1 }
 0x898   :  { %v4364_v57 = vadd.f32 %v2897_v37, %v4361_v49  ;;  %v1827_v41 = vpop.f32.mrb[49].mxu1 }
 0x899   :  { %v4367_v26 = vadd.f32 %v1827_v41, %v4361_v49  ;;  %v2898_v55 = vpop.f32.mrb[50].mxu1 }
 0x89a   :  { %v1892_v48 = vmul.f32 %v4364_v57, %v4364_v57  ;;  %v4372_v42 = vadd.f32 %v2898_v55, %v4361_v49  ;;  %v1830_v44 = vpop.f32.mrb[51].mxu1 }
 0x89b   :  { %v1890_v23 = vmul.f32 %v4367_v26, %v4367_v26  ;;  %v4377_v59 = vadd.f32 %v1830_v44, %v4361_v49 }
 0x89c   :  { %v1908_v17 = vmul.f32 %v1892_v48, %v4364_v57  ;;  %v1893_v11 = vmul.f32 %v4372_v42, %v4372_v42 }
 0x89d   :  { %v1906_v16 = vmul.f32 %v1890_v23, %v4367_v26  ;;  %v1891_v4 = vmul.f32 %v4377_v59, %v4377_v59 }
 0x89e   :  { %v1924_v0 = vmul.f32 0.044715, %v1908_v17  ;;  %v1909_v3 = vmul.f32 %v1893_v11, %v4372_v42 }
 0x89f   :  { %v1922_v33 = vmul.f32 0.044715, %v1906_v16  ;;  %v1907_v36 = vmul.f32 %v1891_v4, %v4377_v59 }
 0x8a0   :  { %v1940_v32 = vadd.f32 %v1924_v0, %v4364_v57  ;;  %v1925_v10 = vmul.f32 0.044715, %v1909_v3 }
 0x8a1   :  { %v1938_v14 = vadd.f32 %v1922_v33, %v4367_v26  ;;  %v1923_v38 = vmul.f32 0.044715, %v1907_v36 }
 0x8a2   :  { %v1956_v28 = vmul.f32 0.7978846, %v1940_v32  ;;  %v1941_v22 = vadd.f32 %v1925_v10, %v4372_v42 }
 0x8a3   :  { %v1954_v25 = vmul.f32 0.7978846, %v1938_v14  ;;  %v1939_v35 = vadd.f32 %v1923_v38, %v4377_v59 }
 0x8a4   :  { %3193 = vtanh.f32 %v1956_v28  ;;  %v1957_v46 = vmul.f32 0.7978846, %v1941_v22 }
 0x8a5   :  { %3195 = vtanh.f32 %v1954_v25  ;;  %v1955_v62 = vmul.f32 0.7978846, %v1939_v35 }
 0x8a6   :  { %3197 = vtanh.f32 %v1957_v46 }
 0x8a7   :  { %3199 = vtanh.f32 %v1955_v62  ;;  %v2901_v7 = vpop.f32.mrb[52].mxu1 }
 0x8a8   :  { %v4392_v18 = vadd.f32 %v2901_v7, %v4361_v49  ;;  %v1843_v52 = vpop.f32.mrb[53].mxu1 }
 0x8a9   :  { %v4395_v47 = vadd.f32 %v1843_v52, %v4361_v49  ;;  %v2902_v29 = vpop.f32.mrb[54].mxu1 }
 0x8aa   :  { %v1896_v56 = vmul.f32 %v4392_v18, %v4392_v18  ;;  %v1855_v43 = vadd.f32 %v2902_v29, %v4361_v49  ;;  %v1846_v53 = vpop.f32.mrb[55].mxu1 }
 0x8ab   :  { %v1894_v63 = vmul.f32 %v4395_v47, %v4395_v47  ;;  %v1847_v39 = vadd.f32 %v1846_v53, %v4361_v49 }
 0x8ac   :  { %v1912_v40 = vmul.f32 %v1896_v56, %v4392_v18  ;;  %v1897_v45 = vmul.f32 %v1855_v43, %v1855_v43 }
 0x8ad   :  { %v1910_v51 = vmul.f32 %v1894_v63, %v4395_v47  ;;  %v1895_v60 = vmul.f32 %v1847_v39, %v1847_v39 }
 0x8ae   :  { %v3194_v37 = vpop.eup %3193  ;;  %v1928_v41 = vmul.f32 0.044715, %v1912_v40  ;;  %v1913_v55 = vmul.f32 %v1897_v45, %v1855_v43 }
 0x8af   :  { %v3196_v48 = vpop.eup %3195  ;;  %v1988_v44 = vadd.f32 1.0, %v3194_v37  ;;  %v1926_v23 = vmul.f32 0.044715, %v1910_v51  ;;  %v1911_v17 = vmul.f32 %v1895_v60, %v1847_v39 }
 0x8b0   :  { %v3198_v11 = vpop.eup %3197  ;;  %v1986_v16 = vadd.f32 1.0, %v3196_v48  ;;  %v1944_v4 = vadd.f32 %v1928_v41, %v4392_v18  ;;  %v1929_v0 = vmul.f32 0.044715, %v1913_v55 }
 0x8b1   :  { %v3200_v3 = vpop.eup %3199  ;;  %v2004_v33 = vmul.f32 0.5, %v1988_v44  ;;  %v1989_v36 = vadd.f32 1.0, %v3198_v11  ;;  %v1942_v32 = vadd.f32 %v1926_v23, %v4395_v47  ;;  %v1927_v10 = vmul.f32 0.044715, %v1911_v17 }
 0x8b2   :  { %v2002_v14 = vmul.f32 0.5, %v1986_v16  ;;  %v1987_v38 = vadd.f32 1.0, %v3200_v3  ;;  %v1960_v28 = vmul.f32 0.7978846, %v1944_v4  ;;  %v1945_v22 = vadd.f32 %v1929_v0, %v1855_v43 }
 0x8b3   :  { %v2005_v25 = vmul.f32 0.5, %v1989_v36  ;;  %v1958_v35 = vmul.f32 0.7978846, %v1942_v32  ;;  %v1943_v46 = vadd.f32 %v1927_v10, %v1847_v39  ;;  %v2020_v52 = vmul.f32 %v2004_v33, %v4364_v57 }
 0x8b4   :  { %v2003_v62 = vmul.f32 0.5, %v1987_v38  ;;  %3201 = vtanh.f32 %v1960_v28  ;;  %v1961_v7 = vmul.f32 0.7978846, %v1945_v22  ;;  %v2018_v53 = vmul.f32 %v2002_v14, %v4367_v26 }
 0x8b5   :  { %v2021_v29 = vmul.f32 %v2005_v25, %v4372_v42  ;;  %3203 = vtanh.f32 %v1958_v35  ;;  %v1959_v56 = vmul.f32 0.7978846, %v1943_v46 }
 0x8b6   :  { %v2019_v63 = vmul.f32 %v2003_v62, %v4377_v59  ;;  %3205 = vtanh.f32 %v1961_v7 }
 0x8b7   :  { %v2035_v40 = vpack.c.bf16 %v2021_v29, %v2020_v52  ;;  %3207 = vtanh.f32 %v1959_v56 }
 0x8b8   :  { %v2034_v45 = vpack.c.bf16 %v2019_v63, %v2018_v53 }
 0x8ba   :  { %2919 = vmatprep.mubr.msk.bf16.mxu0 %vm214_vm0, %v2034_v45 }
 0x8bb   :  { %2920 = vmatmul.mubr.msk.bf16.vlgmr.msra.gmra.mrb[52].mxu0 %vm214_vm0, %v2035_v40 }
 0x8be   :  { %v3202_v51 = vpop.eup %3201 }
 0x8bf   :  { %v3204_v60 = vpop.eup %3203  ;;  %v1992_v37 = vadd.f32 1.0, %v3202_v51 }
 0x8c0   :  { %v3206_v57 = vpop.eup %3205  ;;  %v1990_v41 = vadd.f32 1.0, %v3204_v60 }
 0x8c1   :  { %v3208_v42 = vpop.eup %3207  ;;  %v2008_v55 = vmul.f32 0.5, %v1992_v37  ;;  %v1993_v48 = vadd.f32 1.0, %v3206_v57 }
 0x8c2   :  { %v2006_v44 = vmul.f32 0.5, %v1990_v41  ;;  %v1991_v26 = vadd.f32 1.0, %v3208_v42 }
 0x8c3   :  { %v2009_v23 = vmul.f32 0.5, %v1993_v48  ;;  %v2024_v17 = vmul.f32 %v2008_v55, %v4392_v18 }
 0x8c4   :  { %v2007_v59 = vmul.f32 0.5, %v1991_v26  ;;  %v2022_v16 = vmul.f32 %v2006_v44, %v4395_v47 }
 0x8c5   :  { %v2025_v11 = vmul.f32 %v2009_v23, %v1855_v43 }
 0x8c6   :  { %v2023_v4 = vmul.f32 %v2007_v59, %v1847_v39 }
 0x8c7   :  { %v2037_v0 = vpack.c.bf16 %v2025_v11, %v2024_v17 }
 0x8c8   :  { %v2036_v3 = vpack.c.bf16 %v2023_v4, %v2022_v16 }
 0x8ca   :  { %2923 = vmatprep.mubr.msk.bf16.mxu0 %vm214_vm0, %v2036_v3 }
 0x8cb   :  { %2924 = vmatmul.mubr.msk.bf16.gmra.mrb[56].mxu0 %vm214_vm0, %v2037_v0 }
 0x8da   :  { %v2905_v33 = vpop.f32.mrb[56].mxu1 }
 0x8db   :  { %v4418_v36 = vadd.f32 %v2905_v33, %v4361_v49  ;;  %v1859_v32 = vpop.f32.mrb[57].mxu1 }
 0x8dc   :  { %v4421_v10 = vadd.f32 %v1859_v32, %v4361_v49  ;;  %v2906_v14 = vpop.f32.mrb[58].mxu1 }
 0x8dd   :  { %v1900_v18 = vmul.f32 %v4418_v36, %v4418_v36  ;;  %v4426_v47 = vadd.f32 %v2906_v14, %v4361_v49  ;;  %v1862_v43 = vpop.f32.mrb[59].mxu1 }
 0x8de   :  { %v1898_v39 = vmul.f32 %v4421_v10, %v4421_v10  ;;  %v4431_v38 = vadd.f32 %v1862_v43, %v4361_v49 }
 0x8df   :  { %v1916_v28 = vmul.f32 %v1900_v18, %v4418_v36  ;;  %v1901_v22 = vmul.f32 %v4426_v47, %v4426_v47 }
 0x8e0   :  { %v1914_v25 = vmul.f32 %v1898_v39, %v4421_v10  ;;  %v1899_v35 = vmul.f32 %v4431_v38, %v4431_v38 }
 0x8e1   :  { %v1932_v46 = vmul.f32 0.044715, %v1916_v28  ;;  %v1917_v62 = vmul.f32 %v1901_v22, %v4426_v47 }
 0x8e2   :  { %v1930_v7 = vmul.f32 0.044715, %v1914_v25  ;;  %v1915_v52 = vmul.f32 %v1899_v35, %v4431_v38 }
 0x8e3   :  { %v1948_v29 = vadd.f32 %v1932_v46, %v4418_v36  ;;  %v1933_v56 = vmul.f32 0.044715, %v1917_v62 }
 0x8e4   :  { %v1946_v53 = vadd.f32 %v1930_v7, %v4421_v10  ;;  %v1931_v63 = vmul.f32 0.044715, %v1915_v52 }
 0x8e5   :  { %v1964_v40 = vmul.f32 0.7978846, %v1948_v29  ;;  %v1949_v45 = vadd.f32 %v1933_v56, %v4426_v47 }
 0x8e6   :  { %v1962_v51 = vmul.f32 0.7978846, %v1946_v53  ;;  %v1947_v60 = vadd.f32 %v1931_v63, %v4431_v38 }
 0x8e7   :  { %3209 = vtanh.f32 %v1964_v40  ;;  %v1965_v37 = vmul.f32 0.7978846, %v1949_v45 }
 0x8e8   :  { %3211 = vtanh.f32 %v1962_v51  ;;  %v1963_v57 = vmul.f32 0.7978846, %v1947_v60 }
 0x8e9   :  { %3213 = vtanh.f32 %v1965_v37 }
 0x8ea   :  { %3215 = vtanh.f32 %v1963_v57  ;;  %v2909_v41 = vpop.f32.mrb[60].mxu1 }
 0x8eb   :  { %v4446_v42 = vadd.f32 %v2909_v41, %v4361_v49  ;;  %v1875_v55 = vpop.f32.mrb[61].mxu1 }
 0x8ec   :  { %v4449_v48 = vadd.f32 %v1875_v55, %v4361_v49  ;;  %v2910_v44 = vpop.f32.mrb[62].mxu1 }
 0x8ed   :  { %v1904_v26 = vmul.f32 %v4446_v42, %v4446_v42  ;;  %v1887_v23 = vadd.f32 %v2910_v44, %v4361_v49  ;;  %v1878_v59 = vpop.f32.mrb[63].mxu1 }
 0x8ee   :  { %v1902_v17 = vmul.f32 %v4449_v48, %v4449_v48  ;;  %v1879_v11 = vadd.f32 %v1878_v59, %v4361_v49 }
 0x8ef   :  { %v1920_v16 = vmul.f32 %v1904_v26, %v4446_v42  ;;  %v1905_v4 = vmul.f32 %v1887_v23, %v1887_v23 }
 0x8f0   :  { %v1918_v0 = vmul.f32 %v1902_v17, %v4449_v48  ;;  %v1903_v3 = vmul.f32 %v1879_v11, %v1879_v11 }
 0x8f1   :  { %v3210_v33 = vpop.eup %3209  ;;  %v1936_v32 = vmul.f32 0.044715, %v1920_v16  ;;  %v1921_v14 = vmul.f32 %v1905_v4, %v1887_v23 }
 0x8f2   :  { %v3212_v18 = vpop.eup %3211  ;;  %v1996_v43 = vadd.f32 1.0, %v3210_v33  ;;  %v1934_v39 = vmul.f32 0.044715, %v1918_v0  ;;  %v1919_v28 = vmul.f32 %v1903_v3, %v1879_v11 }
 0x8f3   :  { %v3214_v22 = vpop.eup %3213  ;;  %v1994_v25 = vadd.f32 1.0, %v3212_v18  ;;  %v1952_v35 = vadd.f32 %v1936_v32, %v4446_v42  ;;  %v1937_v46 = vmul.f32 0.044715, %v1921_v14 }
 0x8f4   :  { %v3216_v62 = vpop.eup %3215  ;;  %v2012_v49 = vmul.f32 0.5, %v1996_v43  ;;  %v1997_v7 = vadd.f32 1.0, %v3214_v22  ;;  %v1950_v52 = vadd.f32 %v1934_v39, %v4449_v48  ;;  %v1935_v29 = vmul.f32 0.044715, %v1919_v28 }
 0x8f5   :  { %v2010_v56 = vmul.f32 0.5, %v1994_v25  ;;  %v1995_v53 = vadd.f32 1.0, %v3216_v62  ;;  %v1968_v63 = vmul.f32 0.7978846, %v1952_v35  ;;  %v1953_v40 = vadd.f32 %v1937_v46, %v1887_v23 }
 0x8f6   :  { %v2013_v45 = vmul.f32 0.5, %v1997_v7  ;;  %v1966_v51 = vmul.f32 0.7978846, %v1950_v52  ;;  %v1951_v60 = vadd.f32 %v1935_v29, %v1879_v11  ;;  %v2028_v41 = vmul.f32 %v2012_v49, %v4418_v36 }
 0x8f7   :  { %v2011_v37 = vmul.f32 0.5, %v1995_v53  ;;  %3217 = vtanh.f32 %v1968_v63  ;;  %v1969_v57 = vmul.f32 0.7978846, %v1953_v40  ;;  %v2026_v26 = vmul.f32 %v2010_v56, %v4421_v10 }
 0x8f8   :  { %v2029_v55 = vmul.f32 %v2013_v45, %v4426_v47  ;;  %3219 = vtanh.f32 %v1966_v51  ;;  %v1967_v44 = vmul.f32 0.7978846, %v1951_v60  ;;  %v2044_v62 = vsub.s32 3, %v3402_v1 }
 0x8f9   :  { %v2027_v59 = vmul.f32 %v2011_v37, %v4431_v38  ;;  %3221 = vtanh.f32 %v1969_v57 }
 0x8fa   :  { %3223 = vtanh.f32 %v1967_v44  ;;  %v2039_v17 = vpack.c.bf16 %v2029_v55, %v2028_v41  ;;  %v4473_v49 = vrot.slane %v3501_v58, %v2044_v62 }
 0x8fb   :  { %v2038_v16 = vpack.c.bf16 %v2027_v59, %v2026_v26 }
 0x8fd   :  { %2927 = vmatprep.mubr.msk.bf16.mxu0 %vm214_vm0, %v2038_v16 }
 0x8fe   :  { %2928 = vmatmul.mubr.msk.bf16.gmra.mrb[60].mxu0 %vm214_vm0, %v2039_v17 }
 0x901   :  { %v3218_v4 = vpop.eup %3217 }
 0x902   :  { %v3220_v0 = vpop.eup %3219  ;;  %v2000_v3 = vadd.f32 1.0, %v3218_v4 }
 0x903   :  { %v3222_v36 = vpop.eup %3221  ;;  %v1998_v33 = vadd.f32 1.0, %v3220_v0 }
 0x904   :  { %v3224_v47 = vpop.eup %3223  ;;  %v2016_v32 = vmul.f32 0.5, %v2000_v3  ;;  %v2001_v14 = vadd.f32 1.0, %v3222_v36 }
 0x905   :  { %v2014_v18 = vmul.f32 0.5, %v1998_v33  ;;  %v1999_v10 = vadd.f32 1.0, %v3224_v47 }
 0x906   :  { %v2017_v43 = vmul.f32 0.5, %v2001_v14  ;;  %v2032_v39 = vmul.f32 %v2016_v32, %v4446_v42 }
 0x907   :  { %v2015_v38 = vmul.f32 0.5, %v1999_v10  ;;  %v2030_v22 = vmul.f32 %v2014_v18, %v4449_v48 }
 0x908   :  { %v2033_v28 = vmul.f32 %v2017_v43, %v1887_v23 }
 0x909   :  { %v2031_v25 = vmul.f32 %v2015_v38, %v1879_v11 }
 0x90a   :  { %v2041_v35 = vpack.c.bf16 %v2033_v28, %v2032_v39 }
 0x90b   :  { %v2040_v46 = vpack.c.bf16 %v2031_v25, %v2030_v22 }
 0x90d   :  { %2931 = vmatprep.mubr.msk.bf16.mxu0 %vm214_vm0, %v2040_v46 }
 0x90e   :  { %2932 = vmatmul.mubr.msk.bf16.gmra.mrb[64].mxu0 %vm214_vm0, %v2041_v35  ;;  %vm158_vm0 = vcmp.eq.s32.totalorder %v3402_v1, %v3879_v27 }
 0x98e   :  { %v2921_v7 = vpop.f32.mrb[52].mxu0 }
 0x98f   :  { %v2128_v52 = vpop.f32.mrb[53].mxu0  ;;  %v2137_v29 = vadd.f32 %v2921_v7, %v4473_v49 }
 0x990   :  { %v2129_v42 = vadd.f32 %v2128_v52, %v4473_v49  ;;  %v2922_v23 = vpop.f32.mrb[54].mxu0 }
 0x991   :  { %v2131_v48 = vpop.f32.mrb[55].mxu0  ;;  %v2140_v56 = vadd.f32 %v2922_v23, %v4473_v49  ;;  %v4483_v63 = vadd.f32 %v2137_v29, %v4272_v8 }
 0x992   :  { %v4478_v11 = vadd.f32 %v2129_v42, %v4263_v5  ;;  %v2132_v53 = vadd.f32 %v2131_v48, %v4473_v49 }
 0x993   :  { %v4491_v51 = vadd.f32 %v2140_v56, %v4275_v9  ;;  %v2213_v60 = vsel %vm326_vm14, %v4483_v63, 0.0 }
 0x994   :  { %v4486_v40 = vadd.f32 %v2132_v53, %v4266_v12  ;;  %v2207_v45 = vsel %vm326_vm14, %v4478_v11, 0.0 }
 0x995   :  { %2208 = vadd.xlane.f32.xlu0 %v2207_v45  ;;  %v2216_v8 = vsel %vm326_vm14, %v4491_v51, 0.0 }
 0x996   :  { %v2210_v5 = vsel %vm326_vm14, %v4486_v40, 0.0 }
 0x997   :  { %2211 = vadd.xlane.f32.xlu1 %v2210_v5 }
 0x999   :  { %2214 = vadd.xlane.f32.xlu0 %v2213_v60 }
 0x99b   :  { %2217 = vadd.xlane.f32.xlu1 %v2216_v8 }
 0x99e   :  { %v2925_v12 = vpop.f32.mrb[56].mxu0 }
 0x99f   :  { %v2144_v37 = vpop.f32.mrb[57].mxu0  ;;  %v2153_v57 = vadd.f32 %v2925_v12, %v4473_v49 }
 0x9a0   :  { %v2145_v41 = vadd.f32 %v2144_v37, %v4473_v49  ;;  %v2926_v9 = vpop.f32.mrb[58].mxu0 }
 0x9a1   :  { %v2147_v55 = vpop.f32.mrb[59].mxu0  ;;  %v2156_v26 = vadd.f32 %v2926_v9, %v4473_v49  ;;  %v4507_v17 = vadd.f32 %v2153_v57, %v4299_v6 }
 0x9a2   :  { %v4502_v44 = vadd.f32 %v2145_v41, %v4288_v13  ;;  %v2148_v59 = vadd.f32 %v2147_v55, %v4473_v49 }
 0x9a3   :  { %v4515_v0 = vadd.f32 %v2156_v26, %v4302_v15  ;;  %v2225_v3 = vsel %vm326_vm14, %v4507_v17, 0.0 }
 0x9a4   :  { %v4510_v16 = vadd.f32 %v2148_v59, %v4291_v30  ;;  %v2219_v4 = vsel %vm326_vm14, %v4502_v44, 0.0 }
 0x9a5   :  { %2220 = vadd.xlane.f32.xlu0 %v2219_v4  ;;  %v2228_v6 = vsel %vm326_vm14, %v4515_v0, 0.0 }
 0x9a6   :  { %v2222_v13 = vsel %vm326_vm14, %v4510_v16, 0.0 }
 0x9a7   :  { %2223 = vadd.xlane.f32.xlu1 %v2222_v13 }
 0x9a9   :  { %2226 = vadd.xlane.f32.xlu0 %v2225_v3 }
 0x9ab   :  { %2229 = vadd.xlane.f32.xlu1 %v2228_v6 }
 0x9d1   :  { %v2929_v30 = vpop.f32.mrb[60].mxu0 }
 0x9d2   :  { %v2160_v36 = vpop.f32.mrb[61].mxu0  ;;  %v2169_v33 = vadd.f32 %v2929_v30, %v4473_v49 }
 0x9d3   :  { %v2161_v47 = vadd.f32 %v2160_v36, %v4473_v49  ;;  %v2930_v15 = vpop.f32.mrb[62].mxu0 }
 0x9d4   :  { %v2163_v32 = vpop.f32.mrb[63].mxu0  ;;  %v2172_v18 = vadd.f32 %v2930_v15, %v4473_v49  ;;  %v4531_v43 = vadd.f32 %v2169_v33, %v4325_v19 }
 0x9d5   :  { %v4526_v14 = vadd.f32 %v2161_v47, %v4314_v34  ;;  %v2164_v10 = vadd.f32 %v2163_v32, %v4473_v49 }
 0x9d6   :  { %v4539_v28 = vadd.f32 %v2172_v18, %v4328_v50  ;;  %v2237_v22 = vsel %vm326_vm14, %v4531_v43, 0.0 }
 0x9d7   :  { %v4534_v38 = vadd.f32 %v2164_v10, %v4317_v54  ;;  %v2231_v39 = vsel %vm326_vm14, %v4526_v14, 0.0 }
 0x9d8   :  { %2232 = vadd.xlane.f32.xlu0 %v2231_v39  ;;  %v2240_v19 = vsel %vm326_vm14, %v4539_v28, 0.0 }
 0x9d9   :  { %v2234_v34 = vsel %vm326_vm14, %v4534_v38, 0.0 }
 0x9da   :  { %2235 = vadd.xlane.f32.xlu1 %v2234_v34 }
 0x9dc   :  { %2238 = vadd.xlane.f32.xlu0 %v2237_v22 }
 0x9de   :  { %2241 = vadd.xlane.f32.xlu1 %v2240_v19 }
 0x9e1   :  { %v2933_v54 = vpop.f32.mrb[64].mxu0 }
 0x9e2   :  { %v2176_v25 = vpop.f32.mrb[65].mxu0  ;;  %v2185_v35 = vadd.f32 %v2933_v54, %v4473_v49 }
 0x9e3   :  { %v2177_v46 = vadd.f32 %v2176_v25, %v4473_v49  ;;  %v2934_v50 = vpop.f32.mrb[66].mxu0 }
 0x9e4   :  { %v2179_v62 = vpop.f32.mrb[67].mxu0  ;;  %v2188_v52 = vadd.f32 %v2934_v50, %v4473_v49  ;;  %v4555_v42 = vadd.f32 %v2185_v35, %v4351_v61 }
 0x9e5   :  { %v4550_v7 = vadd.f32 %v2177_v46, %v4340_v21  ;;  %v2180_v29 = vadd.f32 %v2179_v62, %v4473_v49 }
 0x9e6   :  { %v4563_v56 = vadd.f32 %v2188_v52, %v4354_v20  ;;  %v2249_v49 = vsel %vm326_vm14, %v4555_v42, 0.0 }
 0x9e7   :  { %v4558_v23 = vadd.f32 %v2180_v29, %v4343_v24  ;;  %v2243_v48 = vsel %vm326_vm14, %v4550_v7, 0.0 }
 0x9e8   :  { %2244 = vadd.xlane.f32.xlu0 %v2243_v48  ;;  %v2252_v61 = vsel %vm326_vm14, %v4563_v56, 0.0 }
 0x9e9   :  { %v2246_v21 = vsel %vm326_vm14, %v4558_v23, 0.0 }
 0x9ea   :  { %2247 = vadd.xlane.f32.xlu1 %v2246_v21 }
 0x9ec   :  { %2250 = vadd.xlane.f32.xlu0 %v2249_v49 }
 0x9ee   :  { %2253 = vadd.xlane.f32.xlu1 %v2252_v61 }
 0xa22   :  { %v2209_v24 = vpop.xlane.xlu0 %2208 }
 0xa23   :  { %v2255_v53 = vmul.f32 0.03125, %v2209_v24 }
 0xa24   :  { %v2212_v45 = vpop.xlane.xlu1 %2211 }
 0xa25   :  { %v4572_v5 = vsub.f32 %v4478_v11, %v2255_v53  ;;  %v2256_v20 = vmul.f32 0.03125, %v2212_v45 }
 0xa26   :  { %v2215_v60 = vpop.xlane.xlu0 %2214 }
 0xa27   :  { %v4575_v8 = vsub.f32 %v4486_v40, %v2256_v20  ;;  %v2257_v12 = vmul.f32 0.03125, %v2215_v60  ;;  %v2287_v37 = vmul.f32 %v4572_v5, %v4572_v5 }
 0xa28   :  { %v2218_v57 = vpop.xlane.xlu1 %2217 }
 0xa29   :  { %v4580_v41 = vsub.f32 %v4483_v63, %v2257_v12  ;;  %v2258_v9 = vmul.f32 0.03125, %v2218_v57  ;;  %v2303_v55 = vsel %vm326_vm14, %v2287_v37, 0.0  ;;  %v2288_v11 = vmul.f32 %v4575_v8, %v4575_v8 }
 0xa2a   :  { %2304 = vadd.xlane.f32.xlu0 %v2303_v55 }
 0xa2b   :  { %v4586_v26 = vsub.f32 %v4491_v51, %v2258_v9  ;;  %v2306_v40 = vsel %vm326_vm14, %v2288_v11, 0.0  ;;  %v2289_v59 = vmul.f32 %v4580_v41, %v4580_v41 }
 0xa2c   :  { %2307 = vadd.xlane.f32.xlu1 %v2306_v40 }
 0xa2d   :  { %v2309_v4 = vsel %vm326_vm14, %v2289_v59, 0.0  ;;  %v2290_v63 = vmul.f32 %v4586_v26, %v4586_v26 }
 0xa2e   :  { %2310 = vadd.xlane.f32.xlu0 %v2309_v4 }
 0xa2f   :  { %v2312_v13 = vsel %vm326_vm14, %v2290_v63, 0.0 }
 0xa30   :  { %2313 = vadd.xlane.f32.xlu1 %v2312_v13 }
 0xa32   :  { %v2221_v3 = vpop.xlane.xlu0 %2220 }
 0xa33   :  { %v2259_v6 = vmul.f32 0.03125, %v2221_v3 }
 0xa34   :  { %v2224_v30 = vpop.xlane.xlu1 %2223 }
 0xa35   :  { %v4596_v51 = vsub.f32 %v4502_v44, %v2259_v6  ;;  %v2260_v36 = vmul.f32 0.03125, %v2224_v30 }
 0xa36   :  { %v2227_v33 = vpop.xlane.xlu0 %2226 }
 0xa37   :  { %v4599_v47 = vsub.f32 %v4510_v16, %v2260_v36  ;;  %v2261_v15 = vmul.f32 0.03125, %v2227_v33  ;;  %v2291_v32 = vmul.f32 %v4596_v51, %v4596_v51 }
 0xa38   :  { %v2230_v18 = vpop.xlane.xlu1 %2229 }
 0xa39   :  { %v4604_v10 = vsub.f32 %v4507_v17, %v2261_v15  ;;  %v2262_v39 = vmul.f32 0.03125, %v2230_v18  ;;  %v2315_v34 = vsel %vm326_vm14, %v2291_v32, 0.0  ;;  %v2292_v44 = vmul.f32 %v4599_v47, %v4599_v47  ;;  %v3265_v18 = vld [vmem:[%s4753_s1] ss:$0 sm:$0xff]  ;;  %s3346_s1 = smov [#allocation7]  }
 0xa3a   :  { %2316 = vadd.xlane.f32.xlu0 %v2315_v34  ;;  %v2593_v32 = vsel %vm159_vm3, 1.0, %v4774_v31  ;;  %s2563_s16 = sshll.u32 %s3346_s1, 4  ;;  %s2564_s16 = int_to_ptr.vmem [resolvable:$true] %s2563_s16 }
 0xa3b   :  { %v4610_v22 = vsub.f32 %v4515_v0, %v2262_v39  ;;  %v2318_v16 = vsel %vm326_vm14, %v2292_v44, 0.0  ;;  %v2293_v19 = vmul.f32 %v4604_v10, %v4604_v10  ;;  %v4676_v34 = vmul.f32 %v3265_v18, %v2593_v32  ;;  %s3310_s17 = scalar_lea.vmem %s2564_s16, 256  ;;  %p3315_p3 = scmp.lt.s32.totalorder %s2564_s16, %s2564_s16 }
 0xa3c   :  { %2319 = vadd.xlane.f32.xlu1 %v2318_v16  ;;  %p3311_p2 = scmp.ne.s32.totalorder %s2564_s16, %s3310_s17  ;;  %p3316_p4 = scmp.lt.s32.totalorder %s3310_s17, %s3310_s17 }
 0xa3d   :  { %v2321_v54 = vsel %vm326_vm14, %v2293_v19, 0.0  ;;  %v2294_v17 = vmul.f32 %v4610_v22, %v4610_v22 }
 0xa3e   :  { %2322 = vadd.xlane.f32.xlu0 %v2321_v54  ;;  %p3317_p5 = por %p3316_p4, %p3315_p3 }
 0xa3f   :  { %v2324_v25 = vsel %vm326_vm14, %v2294_v17, 0.0 }
 0xa40   :  { %2325 = vadd.xlane.f32.xlu1 %v2324_v25  ;;  %p3318_p6 = pnand %p3317_p5, %p3311_p2 }
 0xa65   :  { %v2233_v35 = vpop.xlane.xlu0 %2232 }
 0xa66   :  { %v2263_v46 = vmul.f32 0.03125, %v2233_v35 }
 0xa67   :  { %v2236_v50 = vpop.xlane.xlu1 %2235 }
 0xa68   :  { %v4620_v0 = vsub.f32 %v4526_v14, %v2263_v46  ;;  %v2264_v62 = vmul.f32 0.03125, %v2236_v50 }
 0xa69   :  { %v2239_v52 = vpop.xlane.xlu0 %2238 }
 0xa6a   :  { %v4623_v29 = vsub.f32 %v4534_v38, %v2264_v62  ;;  %v2265_v48 = vmul.f32 0.03125, %v2239_v52  ;;  %v2295_v21 = vmul.f32 %v4620_v0, %v4620_v0  ;;  %v2417_v62 = vsub.s32 6, %v3402_v1 }
 0xa6b   :  { %v2242_v49 = vpop.xlane.xlu1 %2241 }
 0xa6c   :  { %v4628_v61 = vsub.f32 %v4531_v43, %v2265_v48  ;;  %v2266_v24 = vmul.f32 0.03125, %v2242_v49  ;;  %v2327_v53 = vsel %vm326_vm14, %v2295_v21, 0.0  ;;  %v2296_v14 = vmul.f32 %v4623_v29, %v4623_v29 }
 0xa6d   :  { %2328 = vadd.xlane.f32.xlu0 %v2327_v53  ;;  %v4681_v52 = vrot.slane %v3501_v58, %v2417_v62  ;;  %v2437_v48 = vsub.s32 7, %v3402_v1 }
 0xa6e   :  { %v4634_v45 = vsub.f32 %v4539_v28, %v2266_v24  ;;  %v2330_v38 = vsel %vm326_vm14, %v2296_v14, 0.0  ;;  %v2297_v20 = vmul.f32 %v4628_v61, %v4628_v61 }
 0xa6f   :  { %2331 = vadd.xlane.f32.xlu1 %v2330_v38 }
 0xa70   :  { %v2333_v60 = vsel %vm326_vm14, %v2297_v20, 0.0  ;;  %v2298_v43 = vmul.f32 %v4634_v45, %v4634_v45 }
 0xa71   :  { %2334 = vadd.xlane.f32.xlu0 %v2333_v60 }
 0xa72   :  { %v2336_v12 = vsel %vm326_vm14, %v2298_v43, 0.0  ;;  %v4688_v43 = vrot.slane %v3501_v58, %v2437_v48 }
 0xa73   :  { %2337 = vadd.xlane.f32.xlu1 %v2336_v12 }
 0xa75   :  { %v2245_v37 = vpop.xlane.xlu0 %2244 }
 0xa76   :  { %v2267_v57 = vmul.f32 0.03125, %v2245_v37 }
 0xa77   :  { %v2248_v9 = vpop.xlane.xlu1 %2247 }
 0xa78   :  { %v4644_v28 = vsub.f32 %v4550_v7, %v2267_v57  ;;  %v2268_v55 = vmul.f32 0.03125, %v2248_v9 }
 0xa79   :  { %v2251_v11 = vpop.xlane.xlu0 %2250 }
 0xa7a   :  { %v4647_v40 = vsub.f32 %v4558_v23, %v2268_v55  ;;  %v2269_v59 = vmul.f32 0.03125, %v2251_v11  ;;  %v2299_v4 = vmul.f32 %v4644_v28, %v4644_v28 }
 0xa7b   :  { %v2254_v63 = vpop.xlane.xlu1 %2253 }
 0xa7c   :  { %v4652_v13 = vsub.f32 %v4555_v42, %v2269_v59  ;;  %v2270_v3 = vmul.f32 0.03125, %v2254_v63  ;;  %v2339_v6 = vsel %vm326_vm14, %v2299_v4, 0.0  ;;  %v2300_v7 = vmul.f32 %v4647_v40, %v4647_v40 }
 0xa7d   :  { %2340 = vadd.xlane.f32.xlu0 %v2339_v6 }
 0xa7e   :  { %v4658_v30 = vsub.f32 %v4563_v56, %v2270_v3  ;;  %v2342_v23 = vsel %vm326_vm14, %v2300_v7, 0.0  ;;  %v2301_v36 = vmul.f32 %v4652_v13, %v4652_v13  ;;  %v2592_v56 = vsel %vm158_vm0, 1.0, %v4774_v31 }
 0xa7f   :  { %2343 = vadd.xlane.f32.xlu1 %v2342_v23  ;;  %v2455_v39 = vmul.f32 %v3265_v18, %v2592_v56 }
 0xa80   :  { %v2345_v33 = vsel %vm326_vm14, %v2301_v36, 0.0  ;;  %v2302_v42 = vmul.f32 %v4658_v30, %v4658_v30 }
 0xa81   :  { %2346 = vadd.xlane.f32.xlu0 %v2345_v33  ;;  %2967 = vmatprep.mubr.f32.mxu1 %v2455_v39 }
 0xa82   :  { %v2348_v15 = vsel %vm326_vm14, %v2302_v42, 0.0 }
 0xa83   :  { %2349 = vadd.xlane.f32.xlu1 %v2348_v15 }
 0xa85   :  { %2532 = vadd.xlane.f32.xlu0 %v2455_v39 }
 0xa87   :  { %2534 = vadd.xlane.f32.xlu1 %v4676_v34 }
 0xab7   :  { %v2305_v44 = vpop.xlane.xlu0 %2304 }
 0xab8   :  { %v2351_v16 = vmul.f32 0.03125, %v2305_v44 }
 0xab9   :  { %v2308_v19 = vpop.xlane.xlu1 %2307 }
 0xaba   :  { %v2367_v54 = vadd.f32 1e-05, %v2351_v16  ;;  %v2352_v2 = vmul.f32 0.03125, %v2308_v19 }
 0xabb   :  { %v2311_v27 = vpop.xlane.xlu0 %2310 }
 0xabc   :  { %3225 = vrsqrt.f32 %v2367_v54  ;;  %v2368_v17 = vadd.f32 1e-05, %v2352_v2  ;;  %v2353_v31 = vmul.f32 0.03125, %v2311_v27 }
 0xabd   :  { %v2314_v25 = vpop.xlane.xlu1 %2313 }
 0xabe   :  { %3227 = vrsqrt.f32 %v2368_v17  ;;  %v2369_v35 = vadd.f32 1e-05, %v2353_v31  ;;  %v2354_v46 = vmul.f32 0.03125, %v2314_v25 }
 0xac0   :  { %3229 = vrsqrt.f32 %v2369_v35  ;;  %v2370_v50 = vadd.f32 1e-05, %v2354_v46 }
 0xac2   :  { %3231 = vrsqrt.f32 %v2370_v50 }
 0xac6   :  { %v3226_v21 = vpop.eup %3225 }
 0xac7   :  { %v2317_v49 = vpop.xlane.xlu0 %2316  ;;  %v2399_v24 = vmul.f32 %v3226_v21, %v4572_v5 }
 0xac8   :  { %v3228_v53 = vpop.eup %3227  ;;  %v2355_v14 = vmul.f32 0.03125, %v2317_v49 }
 0xac9   :  { %v2320_v38 = vpop.xlane.xlu1 %2319  ;;  %v2400_v20 = vmul.f32 %v3228_v53, %v4575_v8  ;;  %v2419_v60 = vmul.f32 %v4681_v52, %v2399_v24 }
 0xaca   :  { %v3230_v12 = vpop.eup %3229  ;;  %v2371_v37 = vadd.f32 1e-05, %v2355_v14  ;;  %v2356_v57 = vmul.f32 0.03125, %v2320_v38 }
 0xacb   :  { %v2323_v9 = vpop.xlane.xlu0 %2322  ;;  %v2420_v1 = vmul.f32 %v4681_v52, %v2400_v20  ;;  %v2401_v55 = vmul.f32 %v3230_v12, %v4580_v41  ;;  %v2439_v8 = vadd.f32 %v4688_v43, %v2419_v60 }
 0xacc   :  { %v3232_v11 = vpop.eup %3231  ;;  %3233 = vrsqrt.f32 %v2371_v37  ;;  %v2372_v5 = vadd.f32 1e-05, %v2356_v57  ;;  %v2357_v59 = vmul.f32 0.03125, %v2323_v9 }
 0xacd   :  { %v2326_v4 = vpop.xlane.xlu1 %2325  ;;  %v2440_v63 = vadd.f32 %v4688_v43, %v2420_v1  ;;  %v2402_v58 = vmul.f32 %v3232_v11, %v4586_v26  ;;  %v2421_v3 = vmul.f32 %v4681_v52, %v2401_v55 }
 0xace   :  { %3235 = vrsqrt.f32 %v2372_v5  ;;  %v2373_v6 = vadd.f32 1e-05, %v2357_v59  ;;  %v2358_v7 = vmul.f32 0.03125, %v2326_v4 }
 0xacf   :  { %v2970_v23 = vpack.c.bf16 %v2440_v63, %v2439_v8  ;;  %v2422_v36 = vmul.f32 %v4681_v52, %v2402_v58  ;;  %v2441_v33 = vadd.f32 %v4688_v43, %v2421_v3 }
 0xad0   :  { %3237 = vrsqrt.f32 %v2373_v6  ;;  %v2374_v41 = vadd.f32 1e-05, %v2358_v7 }
 0xad1   :  { %2971 = vmatprep.subr.bf16.mxu1 %v2970_v23  ;;  %v2442_v42 = vadd.f32 %v4688_v43, %v2422_v36 }
 0xad2   :  { %3239 = vrsqrt.f32 %v2374_v41  ;;  %2973 = vmatpush3.bf16.msra.mxu1 %v2970_v23 }
 0xad3   :  { %v2974_v15 = vpack.c.bf16 %v2442_v42, %v2441_v33 }
 0xad5   :  { %2975 = vmatprep.subr.bf16.mxu1 %v2974_v15 }
 0xad6   :  { %v3234_v26 = vpop.eup %3233  ;;  %2977 = vmatpush3.bf16.msra.mxu1 %v2974_v15 }
 0xad7   :  { %v2403_v56 = vmul.f32 %v3234_v26, %v4596_v51 }
 0xad8   :  { %v3236_v32 = vpop.eup %3235 }
 0xad9   :  { %v2404_v18 = vmul.f32 %v3236_v32, %v4599_v47  ;;  %v2423_v39 = vmul.f32 %v4681_v52, %v2403_v56 }
 0xada   :  { %v3238_v44 = vpop.eup %3237 }
 0xadb   :  { %v2424_v16 = vmul.f32 %v4681_v52, %v2404_v18  ;;  %v2405_v19 = vmul.f32 %v3238_v44, %v4604_v10  ;;  %v2443_v2 = vadd.f32 %v4688_v43, %v2423_v39 }
 0xadc   :  { %v3240_v54 = vpop.eup %3239 }
 0xadd   :  { %v2444_v27 = vadd.f32 %v4688_v43, %v2424_v16  ;;  %v2406_v17 = vmul.f32 %v3240_v54, %v4610_v22  ;;  %v2425_v31 = vmul.f32 %v4681_v52, %v2405_v19 }
 0xadf   :  { %v2978_v51 = vpack.c.bf16 %v2444_v27, %v2443_v2  ;;  %v2426_v25 = vmul.f32 %v4681_v52, %v2406_v17  ;;  %v2445_v47 = vadd.f32 %v4688_v43, %v2425_v31 }
 0xae1   :  { %2979 = vmatprep.subr.bf16.mxu1 %v2978_v51  ;;  %v2446_v35 = vadd.f32 %v4688_v43, %v2426_v25 }
 0xae2   :  { %2981 = vmatpush3.bf16.msra.mxu1 %v2978_v51 }
 0xae3   :  { %v2982_v46 = vpack.c.bf16 %v2446_v35, %v2445_v47 }
 0xae5   :  { %2983 = vmatprep.subr.bf16.mxu1 %v2982_v46 }
 0xae6   :  { %2985 = vmatpush3.bf16.msra.mxu1 %v2982_v46 }
 0xafa   :  { %v2329_v10 = vpop.xlane.xlu0 %2328 }
 0xafb   :  { %v2359_v50 = vmul.f32 0.03125, %v2329_v10 }
 0xafc   :  { %v2332_v62 = vpop.xlane.xlu1 %2331 }
 0xafd   :  { %v2375_v48 = vadd.f32 1e-05, %v2359_v50  ;;  %v2360_v21 = vmul.f32 0.03125, %v2332_v62 }
 0xafe   :  { %v2335_v22 = vpop.xlane.xlu0 %2334 }
 0xaff   :  { %3241 = vrsqrt.f32 %v2375_v48  ;;  %v2376_v49 = vadd.f32 1e-05, %v2360_v21  ;;  %v2361_v24 = vmul.f32 0.03125, %v2335_v22 }
 0xb00   :  { %v2338_v53 = vpop.xlane.xlu1 %2337 }
 0xb01   :  { %3243 = vrsqrt.f32 %v2376_v49  ;;  %v2377_v14 = vadd.f32 1e-05, %v2361_v24  ;;  %v2362_v38 = vmul.f32 0.03125, %v2338_v53 }
 0xb03   :  { %3245 = vrsqrt.f32 %v2377_v14  ;;  %v2378_v20 = vadd.f32 1e-05, %v2362_v38 }
 0xb05   :  { %3247 = vrsqrt.f32 %v2378_v20 }
 0xb09   :  { %v3242_v60 = vpop.eup %3241 }
 0xb0a   :  { %v2341_v12 = vpop.xlane.xlu0 %2340  ;;  %v2407_v37 = vmul.f32 %v3242_v60, %v4620_v0 }
 0xb0b   :  { %v3244_v57 = vpop.eup %3243  ;;  %v2363_v9 = vmul.f32 0.03125, %v2341_v12 }
 0xb0c   :  { %v2344_v1 = vpop.xlane.xlu1 %2343  ;;  %v2408_v55 = vmul.f32 %v3244_v57, %v4623_v29  ;;  %v2427_v11 = vmul.f32 %v4681_v52, %v2407_v37 }
 0xb0d   :  { %v3246_v5 = vpop.eup %3245  ;;  %v2379_v59 = vadd.f32 1e-05, %v2363_v9  ;;  %v2364_v4 = vmul.f32 0.03125, %v2344_v1 }
 0xb0e   :  { %v2347_v8 = vpop.xlane.xlu0 %2346  ;;  %v2428_v63 = vmul.f32 %v4681_v52, %v2408_v55  ;;  %v2409_v58 = vmul.f32 %v3246_v5, %v4628_v61  ;;  %v2447_v23 = vadd.f32 %v4688_v43, %v2427_v11 }
 0xb0f   :  { %v3248_v3 = vpop.eup %3247  ;;  %3249 = vrsqrt.f32 %v2379_v59  ;;  %v2380_v6 = vadd.f32 1e-05, %v2364_v4  ;;  %v2365_v7 = vmul.f32 0.03125, %v2347_v8 }
 0xb10   :  { %v2350_v0 = vpop.xlane.xlu1 %2349  ;;  %v2448_v36 = vadd.f32 %v4688_v43, %v2428_v63  ;;  %v2410_v29 = vmul.f32 %v3248_v3, %v4634_v45  ;;  %v2429_v41 = vmul.f32 %v4681_v52, %v2409_v58 }
 0xb11   :  { %3251 = vrsqrt.f32 %v2380_v6  ;;  %v2381_v33 = vadd.f32 1e-05, %v2365_v7  ;;  %v2366_v42 = vmul.f32 0.03125, %v2350_v0 }
 0xb12   :  { %v2986_v15 = vpack.c.bf16 %v2448_v36, %v2447_v23  ;;  %v2430_v26 = vmul.f32 %v4681_v52, %v2410_v29  ;;  %v2449_v56 = vadd.f32 %v4688_v43, %v2429_v41  ;;  %v2533_v50 = vpop.xlane.xlu0 %2532 }
 0xb13   :  { %3253 = vrsqrt.f32 %v2381_v33  ;;  %v2382_v61 = vadd.f32 1e-05, %v2366_v42 }
 0xb14   :  { %2987 = vmatprep.subr.bf16.mxu1 %v2986_v15  ;;  %v2450_v32 = vadd.f32 %v4688_v43, %v2430_v26 }
 0xb15   :  { %3255 = vrsqrt.f32 %v2382_v61  ;;  %2989 = vmatpush3.bf16.msra.mxu1 %v2986_v15 }
 0xb16   :  { %v2990_v18 = vpack.c.bf16 %v2450_v32, %v2449_v56 }
 0xb18   :  { %2991 = vmatprep.subr.bf16.mxu1 %v2990_v18 }
 0xb19   :  { %v3250_v45 = vpop.eup %3249  ;;  %2993 = vmatpush3.bf16.msra.mxu1 %v2990_v18 }
 0xb1a   :  { %v2411_v39 = vmul.f32 %v3250_v45, %v4644_v28 }
 0xb1b   :  { %v3252_v44 = vpop.eup %3251 }
 0xb1c   :  { %v2412_v16 = vmul.f32 %v3252_v44, %v4647_v40  ;;  %v2431_v19 = vmul.f32 %v4681_v52, %v2411_v39 }
 0xb1d   :  { %v3254_v54 = vpop.eup %3253 }
 0xb1e   :  { %v2432_v2 = vmul.f32 %v4681_v52, %v2412_v16  ;;  %v2413_v27 = vmul.f32 %v3254_v54, %v4652_v13  ;;  %v2451_v31 = vadd.f32 %v4688_v43, %v2431_v19  ;;  %v2535_v13 = vpop.xlane.xlu1 %2534 }
 0xb1f   :  { %v3256_v17 = vpop.eup %3255  ;;  %v2537_v62 = vmax.f32 %v2535_v13, 1e-09 }
 0xb20   :  { %v2452_v51 = vadd.f32 %v4688_v43, %v2432_v2  ;;  %v2414_v25 = vmul.f32 %v3256_v17, %v4658_v30  ;;  %v2433_v47 = vmul.f32 %v4681_v52, %v2413_v27  ;;  %v2536_v30 = vmax.f32 %v2533_v50, 1e-09 }
 0xb21   :  { %3257 = vrcp.f32 %v2537_v62 }
 0xb22   :  { %v2994_v28 = vpack.c.bf16 %v2452_v51, %v2451_v31  ;;  %v2434_v35 = vmul.f32 %v4681_v52, %v2414_v25  ;;  %v2453_v40 = vadd.f32 %v4688_v43, %v2433_v47  ;;  %3259 = vrcp.f32 %v2536_v30 }
 0xb24   :  { %2995 = vmatprep.subr.bf16.mxu1 %v2994_v28  ;;  %v2454_v46 = vadd.f32 %v4688_v43, %v2434_v35 }
 0xb25   :  { %2997 = vmatpush3.bf16.msra.mxu1 %v2994_v28 }
 0xb26   :  { %v2998_v10 = vpack.c.bf16 %v2454_v46, %v2453_v40 }
 0xb28   :  { %2999 = vmatprep.subr.bf16.mxu1 %v2998_v10 }
 0xb29   :  { %3001 = vmatpush3.bf16.msra.mxu1 %v2998_v10 }
 0xb2b   :  { %v3258_v48 = vpop.eup %3257 }
 0xb2c   :  { %2968 = vmatmul.mubr.f32.vlgmr.msra.gmra.mrb[64].mxu1 %v4676_v34  ;;  %v3260_v21 = vpop.eup %3259 }
 0xbff   :  { %v2969_v52 = vpop.f32.mrb[64].mxu1 }
 0xc00   :  { %v2541_v22 = vmul.f32 %v3258_v48, %v2969_v52  ;;  %v2523_v49 = vpop.f32.mrb[65].mxu1 }
 0xc01   :  { %v2540_v24 = vmul.f32 %v3260_v21, %v2523_v49 }
 0xc02   :  { %v2543_v53 = vmul.f32 %v2541_v22, %v2541_v22 }
 0xc03   :  { %v2542_v43 = vmul.f32 %v2540_v24, %v2540_v24 }
 0xc04   :  { %v2547_v14 = vsel %vm326_vm14, %v2543_v53, 0.0 }
 0xc05   :  { %2548 = vadd.xlane.f32.xlu1 %v2547_v14  ;;  %v2544_v38 = vsel %vm326_vm14, %v2542_v43, 0.0 }
 0xc06   :  { %2545 = vadd.xlane.f32.xlu0 %v2544_v38 }
 0xc92   :  { %v2549_v34 = vpop.xlane.xlu1 %2548 }
 0xc93   :  { %v2551_v20 = vmax.f32 %v2549_v34, 1e-24  ;;  %v2546_v60 = vpop.xlane.xlu0 %2545 }
 0xc94   :  { %v2550_v12 = vmax.f32 %v2546_v60, 1e-24 }
 0xc95   :  { %3261 = vrsqrt.f32 %v2551_v20 }
 0xc96   :  { %3263 = vrsqrt.f32 %v2550_v12 }
 0xc9f   :  { %v3262_v37 = vpop.eup %3261 }
 0xca0   :  { %v3264_v57 = vpop.eup %3263  ;;  %v2555_v9 = vmul.f32 %v3262_v37, %v2541_v22 }
 0xca1   :  { %v2554_v1 = vmul.f32 %v3264_v57, %v2540_v24 }
 0xca2   :  { %2557 = vst.msk [vmem:[#allocation7 + $0x8] sm:$0xff] %vm326_vm14, %v2555_v9 }
 0xca3   :  { %2556 = vst.msk [vmem:[#allocation7] sm:$0xff] %vm326_vm14, %v2554_v1 }
 0xca4   :  { %3321 = shalt.err (!%p3318_p6)
}
 0xca5   :  { %s3322_s20 = scalar_lea.hbm %s4755_s3, 256 }
 0xca6   :  { %p3323_p7 = scmp.ne.s32.totalorder %s4755_s3, %s3322_s20  ;;  %p3326_p8 = scmp.lt.u32.totalorder %s3322_s20, %s4755_s3 }
 0xca8   :  { %p3328_p9 = pnand %p3326_p8, %p3323_p7 }
 0xcaa   :  { %3331 = shalt.err (!%p3328_p9)
}
 0xcab   :  { %s3347_s25 = smov 128   ;;  %s3348_s26 = smov 8  }
 0xcac   :  { %2569 = dma.vmem_to_hbm [thread:$0]  %s2564_s16, 256, %s4755_s3, [#allocation4], %s3347_s25, %s3347_s25, %s3348_s26  }
 0xcad   :  { %3336 = dma.done.wait [#allocation4], 256  }
 0xcae   :  { %3337 = vsyncadd [#allocation4], 4294967040 }
 0xcaf   :  { %2573 = vsyncpa [#allocation3], 1 }
 0xcb0   :  { %2574 = vsyncpa [#allocation6], 1 }
 0xcb1   :  { %2575 = vsyncpa [#allocation4], 1 }

</bundles_post_ra>
